<compile_context>
chip_gen: v7x
topology: tpu7x:2x2x1
jax: 0.10.0
libtpu: 0.0.40
codegen_flags: <defaults>
</compile_context>

<pallas_src>
import jax
import jax.numpy as jnp
from jax.experimental import pallas as pl
from jax.experimental.pallas import tpu as pltpu

# ---- model hyper-parameters (small, consistent with the module) -------------
HIDDEN = 32                         # hidden_size
VOCAB = 64                          # output_size
MAX_LENGTH = 8                      # analog of MAX_TENSOR_LEN (kept small)
SENT_RATIO = 5
ATTN_LEN = MAX_LENGTH * SENT_RATIO  # 40: width of attn Linear / encoder rows

LANE = 128                          # TPU lane width
NEG_INF = -1e30                     # bias on padded softmax columns


def fused_decode_kernel(
    tok_ref,                        # SMEM (T,) int32 (scalar prefetch)
    emb_ref,                        # (VOCAB, H)  embedding table
    enc_ref,                        # (LANE, H)   zero-padded encoder outputs
    h0_ref,                         # (1, H)      initial hidden
    w_attn_ref, b_attn_ref,         # (2H, LANE), (1, LANE)  pad cols biased -1e30
    w_comb_ref, b_comb_ref,         # (2H, H),   (1, H)
    w_ih_ref, b_ih_ref,             # (H, LANE), (1, LANE)   gates r|z|n in lanes 0:96
    w_hh_ref, b_hh_ref,             # (H, LANE), (1, LANE)
    w_out_ref, b_out_ref,           # (H, LANE), (1, LANE)   pad cols biased -1e30
    out_ref,                        # (T, 3, LANE): per step [logp | attw | hidden]
):
    H = HIDDEN
    T = tok_ref.shape[0]

    # Hoisted once: JAX does not CSE broadcast_in_dim inside the loop.
    h_zpad = jnp.zeros((1, LANE - H), jnp.float32)

    def step(t, hid):               # hid: (1, H) loop carry (stays in vregs)
        tok = tok_ref[t]
        emb = emb_ref[pl.ds(tok, 1), :]                        # (1, H) in-kernel gather
        # TODO(synk): dropout(embedded) is identity here (eval mode).

        # ---- attn_weights = softmax(Linear(cat(emb, hid))) -- one dot, K=2H -
        eh = jnp.concatenate([emb, hid], axis=1)               # (1, 2H)
        a_logits = (jnp.dot(eh, w_attn_ref[...],
                            preferred_element_type=jnp.float32)
                    + b_attn_ref[...])                         # (1, LANE)
        a_max = jnp.max(a_logits, axis=1, keepdims=True)
        a_exp = jnp.exp(a_logits - a_max)                      # padded lanes -> 0
        attw = a_exp / jnp.sum(a_exp, axis=1, keepdims=True)   # exact divide

        # ---- attn_applied = attn_weights @ encoder_outputs -------------------
        applied = jnp.dot(attw, enc_ref[...],
                          preferred_element_type=jnp.float32)  # (1, H)

        # ---- relu(attn_combine(cat(emb, attn_applied))) -- one dot, K=2H -----
        ea = jnp.concatenate([emb, applied], axis=1)           # (1, 2H)
        x = jnp.maximum(
            jnp.dot(ea, w_comb_ref[...], preferred_element_type=jnp.float32)
            + b_comb_ref[...], 0.0)                            # (1, H)

        # ---- GRU cell (PyTorch gate order r,z,n), gates packed on lanes ------
        gi = (jnp.dot(x, w_ih_ref[...], preferred_element_type=jnp.float32)
              + b_ih_ref[...])                                 # (1, LANE)
        gh = (jnp.dot(hid, w_hh_ref[...], preferred_element_type=jnp.float32)
              + b_hh_ref[...])                                 # (1, LANE)
        r = jax.nn.sigmoid(gi[:, 0:H] + gh[:, 0:H])
        z = jax.nn.sigmoid(gi[:, H:2 * H] + gh[:, H:2 * H])
        n = jnp.tanh(gi[:, 2 * H:3 * H] + r * gh[:, 2 * H:3 * H])
        h_new = (1.0 - z) * n + z * hid                        # (1, H)

        # ---- log_softmax(out(h_new))  (padded cols carry -1e30 bias) ---------
        o_logits = (jnp.dot(h_new, w_out_ref[...],
                            preferred_element_type=jnp.float32)
                    + b_out_ref[...])                          # (1, LANE)
        o_max = jnp.max(o_logits, axis=1, keepdims=True)
        lse = jnp.log(jnp.sum(jnp.exp(o_logits - o_max), axis=1,
                              keepdims=True)) + o_max
        logp = o_logits - lse                                  # (1, LANE)

        # ---- one lane-dense (1,3,128) store per step into the resident block -
        h_row = jnp.concatenate([h_new, h_zpad], axis=1)       # (1, LANE)
        row = jnp.concatenate([logp, attw, h_row], axis=0)     # (3, LANE)
        out_ref[pl.ds(t, 1)] = row.reshape(1, 3, LANE)
        return h_new

    jax.lax.fori_loop(0, T, step, h0_ref[...], unroll=True)


def pack_params(params, encoder_outputs):
    """One-time weight padding/packing.  Called OUTSIDE the jitted decode path."""
    H, V, L = HIDDEN, VOCAB, ATTN_LEN
    f32 = jnp.float32

    emb_tbl = params["embedding"].astype(f32)                            # (V, H)
    enc_p = jnp.zeros((LANE, H), f32).at[:L, :].set(encoder_outputs.astype(f32))

    w_attn_p = jnp.zeros((2 * H, LANE), f32).at[:, :L].set(params["w_attn"])
    b_attn_p = jnp.full((1, LANE), NEG_INF, f32).at[:, :L].set(params["b_attn"])

    w_comb = params["w_comb"].astype(f32)                                # (2H, H)
    b_comb = params["b_comb"].astype(f32)                                # (1, H)

    w_ih_p = jnp.zeros((H, LANE), f32).at[:, :3 * H].set(params["w_ih"])
    b_ih_p = jnp.zeros((1, LANE), f32).at[:, :3 * H].set(params["b_ih"])
    w_hh_p = jnp.zeros((H, LANE), f32).at[:, :3 * H].set(params["w_hh"])
    b_hh_p = jnp.zeros((1, LANE), f32).at[:, :3 * H].set(params["b_hh"])

    w_out_p = jnp.zeros((H, LANE), f32).at[:, :V].set(params["w_out"])
    b_out_p = jnp.full((1, LANE), NEG_INF, f32).at[:, :V].set(params["b_out"])

    return (emb_tbl, enc_p, w_attn_p, b_attn_p, w_comb, b_comb,
            w_ih_p, b_ih_p, w_hh_p, b_hh_p, w_out_p, b_out_p)


@jax.jit
def attn_decoder_decode(tokens, hidden0, packed):
    """Run AttnDecoderRNN.forward for every token in `tokens` (T steps) inside ONE
    fused Pallas kernel invocation.  Returns per-step (log_probs, hiddens, attn_weights)."""
    T = tokens.shape[0]
    H, V, L = HIDDEN, VOCAB, ATTN_LEN

    (emb_tbl, enc_p, w_attn_p, b_attn_p, w_comb, b_comb,
     w_ih_p, b_ih_p, w_hh_p, b_hh_p, w_out_p, b_out_p) = packed
    h0 = hidden0.reshape(1, H).astype(jnp.float32)

    inputs = (emb_tbl, enc_p, h0,
              w_attn_p, b_attn_p, w_comb, b_comb,
              w_ih_p, b_ih_p, w_hh_p, b_hh_p, w_out_p, b_out_p)

    def resident(x):
        # Single grid step + constant index_map -> DMA'd once, VMEM-resident.
        nd = x.ndim
        return pl.BlockSpec(x.shape, lambda i, tok, _nd=nd: (0,) * _nd)

    in_specs = [resident(x) for x in inputs]
    out_spec = pl.BlockSpec((T, 3, LANE), lambda i, tok: (0, 0, 0))

    per_step_flops = 2 * (2 * H * LANE + LANE * H + 2 * H * H + 3 * H * LANE)
    flops = T * per_step_flops
    transcendentals = T * (2 * LANE + 3 * H + 1)
    bytes_accessed = sum(int(x.size) * 4 for x in inputs) + T * (3 * LANE * 4 + 4)

    out = pl.pallas_call(
        fused_decode_kernel,
        out_shape=jax.ShapeDtypeStruct((T, 3, LANE), jnp.float32),
        grid_spec=pltpu.PrefetchScalarGridSpec(
            num_scalar_prefetch=1,
            grid=(1,),                       # whole decode = one pipeline step
            in_specs=in_specs,
            out_specs=out_spec,
        ),
        compiler_params=pltpu.CompilerParams(
            dimension_semantics=("arbitrary",)),
        cost_estimate=pl.CostEstimate(
            flops=flops, transcendentals=transcendentals,
            bytes_accessed=bytes_accessed),
    )(tokens.astype(jnp.int32), *inputs)

    log_probs = out[:, 0, :V]     # (T, V)
    attws = out[:, 1, :L]         # (T, L)
    hiddens = out[:, 2, :H]       # (T, H)
    return log_probs, hiddens, attws


def make_params(key):
    """Deterministic init matching AttnDecoderRNN.__init__ (weights stored as W.T)."""
    H, V, L = HIDDEN, VOCAB, ATTN_LEN
    ks = jax.random.split(key, 12)

    def u(k, shape, fan_in):
        bound = 1.0 / jnp.sqrt(fan_in)
        return jax.random.uniform(k, shape, jnp.float32, -bound, bound)

    return {
        "embedding": jax.random.normal(ks[0], (V, H), jnp.float32),
        "w_attn": u(ks[1], (2 * H, L), 2 * H),   # nn.Linear(2H, L)
        "b_attn": u(ks[2], (1, L), 2 * H),
        "w_comb": u(ks[3], (2 * H, H), 2 * H),   # nn.Linear(2H, H)
        "b_comb": u(ks[4], (1, H), 2 * H),
        "w_ih": u(ks[5], (H, 3 * H), H),         # nn.GRU(H, H)
        "b_ih": u(ks[6], (1, 3 * H), H),
        "w_hh": u(ks[7], (H, 3 * H), H),
        "b_hh": u(ks[8], (1, 3 * H), H),
        "w_out": u(ks[9], (H, V), H),            # nn.Linear(H, V)
        "b_out": u(ks[10], (1, V), H),
    }


def reference_decode(tokens, hidden0, encoder_outputs, p):
    """Pure-JAX step-by-step reference of the same decode loop."""
    H = HIDDEN

    def step(hid, tok):
        emb = p["embedding"][tok][None, :]
        cat1 = jnp.concatenate([emb, hid], axis=1)
        attw = jax.nn.softmax(cat1 @ p["w_attn"] + p["b_attn"], axis=1)
        applied = attw @ encoder_outputs
        x = jnp.maximum(
            jnp.concatenate([emb, applied], axis=1) @ p["w_comb"] + p["b_comb"], 0.0)
        gi = x @ p["w_ih"] + p["b_ih"]
        gh = hid @ p["w_hh"] + p["b_hh"]
        r = jax.nn.sigmoid(gi[:, :H] + gh[:, :H])
        z = jax.nn.sigmoid(gi[:, H:2 * H] + gh[:, H:2 * H])
        n = jnp.tanh(gi[:, 2 * H:] + r * gh[:, 2 * H:])
        h_new = (1.0 - z) * n + z * hid
        logp = jax.nn.log_softmax(h_new @ p["w_out"] + p["b_out"], axis=1)
        return h_new, (logp[0], h_new[0], attw[0])

    _, (logps, hs, attws) = jax.lax.scan(step, hidden0.reshape(1, H), tokens)
    return logps, hs, attws


if __name__ == "__main__":
    key = jax.random.PRNGKey(0)
    k_par, k_hid, k_enc, k_tok = jax.random.split(key, 4)

    T = 8
    params = make_params(k_par)
    tokens = jax.random.randint(k_tok, (T,), 0, VOCAB, dtype=jnp.int32)
    hidden0 = jax.random.normal(k_hid, (1, 1, HIDDEN), jnp.float32)
    encoder_outputs = jax.random.normal(k_enc, (ATTN_LEN, HIDDEN), jnp.float32)

    # One-time packing, kept out of the jitted per-call decode path.
    packed = pack_params(params, encoder_outputs)

    log_probs, hiddens, attws = attn_decoder_decode(tokens, hidden0, packed)
    jax.block_until_ready((log_probs, hiddens, attws))

    ref_lp, ref_h, ref_aw = reference_decode(tokens, hidden0, encoder_outputs, params)
    # Exact softmax divide now (no approx reciprocal); remaining tolerance covers
    # MXU-vs-XLA default matmul precision differences through the 8-step recurrence.
    assert jnp.allclose(log_probs, ref_lp, atol=5e-3, rtol=5e-3)
    assert jnp.allclose(hiddens, ref_h, atol=5e-3, rtol=5e-3)
    assert jnp.allclose(attws, ref_aw, atol=5e-3, rtol=5e-3)

    print("KERNEL_OK")
</pallas_src>

<mosaic_0001>
module attributes {stable_mosaic.version = 11 : i64} {
  func.func @fused_decode_kernel(%arg0: i32, %arg1: memref<8xi32, #tpu.memory_space<smem>>, %arg2: memref<64x32xf32, #tpu.memory_space<vmem>>, %arg3: memref<128x32xf32, #tpu.memory_space<vmem>>, %arg4: memref<1x32xf32, #tpu.memory_space<vmem>>, %arg5: memref<64x128xf32, #tpu.memory_space<vmem>>, %arg6: memref<1x128xf32, #tpu.memory_space<vmem>>, %arg7: memref<64x32xf32, #tpu.memory_space<vmem>>, %arg8: memref<1x32xf32, #tpu.memory_space<vmem>>, %arg9: memref<32x128xf32, #tpu.memory_space<vmem>>, %arg10: memref<1x128xf32, #tpu.memory_space<vmem>>, %arg11: memref<32x128xf32, #tpu.memory_space<vmem>>, %arg12: memref<1x128xf32, #tpu.memory_space<vmem>>, %arg13: memref<32x128xf32, #tpu.memory_space<vmem>>, %arg14: memref<1x128xf32, #tpu.memory_space<vmem>>, %arg15: memref<8x3x128xf32, #tpu.memory_space<vmem>>) attributes {dimension_semantics = [#tpu.dimension_semantics<arbitrary>], iteration_bounds = array<i64: 1>, scalar_prefetch = 1 : i64, scratch_operands = 0 : i64, tpu.core_type = #tpu.core_type<tc>, window_params = [{pipeline_mode = #tpu.pipeline_mode<synchronous>, transform_indices = @transform_0, window_bounds = array<i64: 64, 32>}, {pipeline_mode = #tpu.pipeline_mode<synchronous>, transform_indices = @transform_1, window_bounds = array<i64: 128, 32>}, {pipeline_mode = #tpu.pipeline_mode<synchronous>, transform_indices = @transform_2, window_bounds = array<i64: 1, 32>}, {pipeline_mode = #tpu.pipeline_mode<synchronous>, transform_indices = @transform_3, window_bounds = array<i64: 64, 128>}, {pipeline_mode = #tpu.pipeline_mode<synchronous>, transform_indices = @transform_4, window_bounds = array<i64: 1, 128>}, {pipeline_mode = #tpu.pipeline_mode<synchronous>, transform_indices = @transform_5, window_bounds = array<i64: 64, 32>}, {pipeline_mode = #tpu.pipeline_mode<synchronous>, transform_indices = @transform_6, window_bounds = array<i64: 1, 32>}, {pipeline_mode = #tpu.pipeline_mode<synchronous>, transform_indices = @transform_7, window_bounds = array<i64: 32, 128>}, {pipeline_mode = #tpu.pipeline_mode<synchronous>, transform_indices = @transform_8, window_bounds = array<i64: 1, 128>}, {pipeline_mode = #tpu.pipeline_mode<synchronous>, transform_indices = @transform_9, window_bounds = array<i64: 32, 128>}, {pipeline_mode = #tpu.pipeline_mode<synchronous>, transform_indices = @transform_10, window_bounds = array<i64: 1, 128>}, {pipeline_mode = #tpu.pipeline_mode<synchronous>, transform_indices = @transform_11, window_bounds = array<i64: 32, 128>}, {pipeline_mode = #tpu.pipeline_mode<synchronous>, transform_indices = @transform_12, window_bounds = array<i64: 1, 128>}, {pipeline_mode = #tpu.pipeline_mode<synchronous>, transform_indices = @transform_13, window_bounds = array<i64: 8, 3, 128>}]} {
    %cst = arith.constant 0.000000e+00 : f32
    %0 = vector.broadcast %cst : f32 to vector<1x96xf32>
    %c0 = arith.constant 0 : index
    %c0_0 = arith.constant 0 : index
    %1 = vector.load %arg4[%c0, %c0_0] : memref<1x32xf32, #tpu.memory_space<vmem>>, vector<1x32xf32>
    %c0_i32 = arith.constant 0 : i32
    %2 = arith.index_cast %c0_i32 : i32 to index
    %3 = memref.load %arg1[%2] : memref<8xi32, #tpu.memory_space<smem>>
    %4 = arith.index_cast %3 : i32 to index
    %c0_1 = arith.constant 0 : index
    %5 = vector.load %arg2[%4, %c0_1] : memref<64x32xf32, #tpu.memory_space<vmem>>, vector<1x32xf32>
    %6 = tpu.concatenate %5, %1 in 1 : vector<1x32xf32>, vector<1x32xf32> -> vector<1x64xf32>
    %c0_2 = arith.constant 0 : index
    %c0_3 = arith.constant 0 : index
    %7 = vector.load %arg5[%c0_2, %c0_3] : memref<64x128xf32, #tpu.memory_space<vmem>>, vector<64x128xf32>
    %cst_4 = arith.constant dense<0.000000e+00> : vector<1x128xf32>
    %8 = tpu.matmul %6, %7, %cst_4 {dimension_numbers = #tpu.dot_dimension_numbers<[1], [0], [0], [1], [0, 0, 1, 1], [], []>} : vector<1x64xf32>, vector<64x128xf32>, vector<1x128xf32> -> vector<1x128xf32>
    %c0_5 = arith.constant 0 : index
    %c0_6 = arith.constant 0 : index
    %9 = vector.load %arg6[%c0_5, %c0_6] : memref<1x128xf32, #tpu.memory_space<vmem>>, vector<1x128xf32>
    %10 = arith.addf %8, %9 : vector<1x128xf32>
    %cst_7 = arith.constant dense<0xFF800000> : vector<1xf32>
    %11 = vector.multi_reduction <maximumf>, %10, %cst_7 [1] : vector<1x128xf32> to vector<1xf32>
    %12 = vector.shape_cast %11 : vector<1xf32> to vector<1x1xf32>
    %13 = vector.broadcast %12 : vector<1x1xf32> to vector<1x128xf32>
    %14 = arith.subf %10, %13 : vector<1x128xf32>
    %15 = math.exp %14 : vector<1x128xf32>
    %cst_8 = arith.constant dense<0.000000e+00> : vector<1xf32>
    %16 = vector.multi_reduction <add>, %15, %cst_8 [1] : vector<1x128xf32> to vector<1xf32>
    %17 = vector.shape_cast %16 : vector<1xf32> to vector<1x1xf32>
    %18 = vector.broadcast %17 : vector<1x1xf32> to vector<1x128xf32>
    %19 = arith.divf %15, %18 : vector<1x128xf32>
    %c0_9 = arith.constant 0 : index
    %c0_10 = arith.constant 0 : index
    %20 = vector.load %arg3[%c0_9, %c0_10] : memref<128x32xf32, #tpu.memory_space<vmem>>, vector<128x32xf32>
    %cst_11 = arith.constant dense<0.000000e+00> : vector<1x32xf32>
    %21 = tpu.matmul %19, %20, %cst_11 {dimension_numbers = #tpu.dot_dimension_numbers<[1], [0], [0], [1], [0, 0, 1, 1], [], []>} : vector<1x128xf32>, vector<128x32xf32>, vector<1x32xf32> -> vector<1x32xf32>
    %22 = tpu.concatenate %5, %21 in 1 : vector<1x32xf32>, vector<1x32xf32> -> vector<1x64xf32>
    %c0_12 = arith.constant 0 : index
    %c0_13 = arith.constant 0 : index
    %23 = vector.load %arg7[%c0_12, %c0_13] : memref<64x32xf32, #tpu.memory_space<vmem>>, vector<64x32xf32>
    %cst_14 = arith.constant dense<0.000000e+00> : vector<1x32xf32>
    %24 = tpu.matmul %22, %23, %cst_14 {dimension_numbers = #tpu.dot_dimension_numbers<[1], [0], [0], [1], [0, 0, 1, 1], [], []>} : vector<1x64xf32>, vector<64x32xf32>, vector<1x32xf32> -> vector<1x32xf32>
    %c0_15 = arith.constant 0 : index
    %c0_16 = arith.constant 0 : index
    %25 = vector.load %arg8[%c0_15, %c0_16] : memref<1x32xf32, #tpu.memory_space<vmem>>, vector<1x32xf32>
    %26 = arith.addf %24, %25 : vector<1x32xf32>
    %cst_17 = arith.constant 0.000000e+00 : f32
    %27 = vector.broadcast %cst_17 : f32 to vector<1x32xf32>
    %28 = arith.maximumf %26, %27 : vector<1x32xf32>
    %c0_18 = arith.constant 0 : index
    %c0_19 = arith.constant 0 : index
    %29 = vector.load %arg9[%c0_18, %c0_19] : memref<32x128xf32, #tpu.memory_space<vmem>>, vector<32x128xf32>
    %cst_20 = arith.constant dense<0.000000e+00> : vector<1x128xf32>
    %30 = tpu.matmul %28, %29, %cst_20 {dimension_numbers = #tpu.dot_dimension_numbers<[1], [0], [0], [1], [0, 0, 1, 1], [], []>} : vector<1x32xf32>, vector<32x128xf32>, vector<1x128xf32> -> vector<1x128xf32>
    %c0_21 = arith.constant 0 : index
    %c0_22 = arith.constant 0 : index
    %31 = vector.load %arg10[%c0_21, %c0_22] : memref<1x128xf32, #tpu.memory_space<vmem>>, vector<1x128xf32>
    %32 = arith.addf %30, %31 : vector<1x128xf32>
    %c0_23 = arith.constant 0 : index
    %c0_24 = arith.constant 0 : index
    %33 = vector.load %arg11[%c0_23, %c0_24] : memref<32x128xf32, #tpu.memory_space<vmem>>, vector<32x128xf32>
    %cst_25 = arith.constant dense<0.000000e+00> : vector<1x128xf32>
    %34 = tpu.matmul %1, %33, %cst_25 {dimension_numbers = #tpu.dot_dimension_numbers<[1], [0], [0], [1], [0, 0, 1, 1], [], []>} : vector<1x32xf32>, vector<32x128xf32>, vector<1x128xf32> -> vector<1x128xf32>
    %c0_26 = arith.constant 0 : index
    %c0_27 = arith.constant 0 : index
    %35 = vector.load %arg12[%c0_26, %c0_27] : memref<1x128xf32, #tpu.memory_space<vmem>>, vector<1x128xf32>
    %36 = arith.addf %34, %35 : vector<1x128xf32>
    %37 = vector.extract_strided_slice %32 {offsets = [0, 0], sizes = [1, 32], strides = [1, 1]} : vector<1x128xf32> to vector<1x32xf32>
    %38 = vector.extract_strided_slice %36 {offsets = [0, 0], sizes = [1, 32], strides = [1, 1]} : vector<1x128xf32> to vector<1x32xf32>
    %39 = arith.addf %37, %38 : vector<1x32xf32>
    %40 = arith.negf %39 : vector<1x32xf32>
    %41 = math.exp %40 : vector<1x32xf32>
    %cst_28 = arith.constant 1.000000e+00 : f32
    %42 = vector.broadcast %cst_28 : f32 to vector<1x32xf32>
    %43 = arith.addf %42, %41 : vector<1x32xf32>
    %44 = arith.divf %42, %43 : vector<1x32xf32>
    %45 = vector.extract_strided_slice %32 {offsets = [0, 32], sizes = [1, 32], strides = [1, 1]} : vector<1x128xf32> to vector<1x32xf32>
    %46 = vector.extract_strided_slice %36 {offsets = [0, 32], sizes = [1, 32], strides = [1, 1]} : vector<1x128xf32> to vector<1x32xf32>
    %47 = arith.addf %45, %46 : vector<1x32xf32>
    %48 = arith.negf %47 : vector<1x32xf32>
    %49 = math.exp %48 : vector<1x32xf32>
    %cst_29 = arith.constant 1.000000e+00 : f32
    %50 = vector.broadcast %cst_29 : f32 to vector<1x32xf32>
    %51 = arith.addf %50, %49 : vector<1x32xf32>
    %52 = arith.divf %50, %51 : vector<1x32xf32>
    %53 = vector.extract_strided_slice %32 {offsets = [0, 64], sizes = [1, 32], strides = [1, 1]} : vector<1x128xf32> to vector<1x32xf32>
    %54 = vector.extract_strided_slice %36 {offsets = [0, 64], sizes = [1, 32], strides = [1, 1]} : vector<1x128xf32> to vector<1x32xf32>
    %55 = arith.mulf %44, %54 : vector<1x32xf32>
    %56 = arith.addf %53, %55 : vector<1x32xf32>
    %57 = math.tanh %56 : vector<1x32xf32>
    %cst_30 = arith.constant 1.000000e+00 : f32
    %58 = vector.broadcast %cst_30 : f32 to vector<1x32xf32>
    %59 = arith.subf %58, %52 : vector<1x32xf32>
    %60 = arith.mulf %59, %57 : vector<1x32xf32>
    %61 = arith.mulf %52, %1 : vector<1x32xf32>
    %62 = arith.addf %60, %61 : vector<1x32xf32>
    %c0_31 = arith.constant 0 : index
    %c0_32 = arith.constant 0 : index
    %63 = vector.load %arg13[%c0_31, %c0_32] : memref<32x128xf32, #tpu.memory_space<vmem>>, vector<32x128xf32>
    %cst_33 = arith.constant dense<0.000000e+00> : vector<1x128xf32>
    %64 = tpu.matmul %62, %63, %cst_33 {dimension_numbers = #tpu.dot_dimension_numbers<[1], [0], [0], [1], [0, 0, 1, 1], [], []>} : vector<1x32xf32>, vector<32x128xf32>, vector<1x128xf32> -> vector<1x128xf32>
    %c0_34 = arith.constant 0 : index
    %c0_35 = arith.constant 0 : index
    %65 = vector.load %arg14[%c0_34, %c0_35] : memref<1x128xf32, #tpu.memory_space<vmem>>, vector<1x128xf32>
    %66 = arith.addf %64, %65 : vector<1x128xf32>
    %cst_36 = arith.constant dense<0xFF800000> : vector<1xf32>
    %67 = vector.multi_reduction <maximumf>, %66, %cst_36 [1] : vector<1x128xf32> to vector<1xf32>
    %68 = vector.shape_cast %67 : vector<1xf32> to vector<1x1xf32>
    %69 = vector.broadcast %68 : vector<1x1xf32> to vector<1x128xf32>
    %70 = arith.subf %66, %69 : vector<1x128xf32>
    %71 = math.exp %70 : vector<1x128xf32>
    %cst_37 = arith.constant dense<0.000000e+00> : vector<1xf32>
    %72 = vector.multi_reduction <add>, %71, %cst_37 [1] : vector<1x128xf32> to vector<1xf32>
    %73 = vector.shape_cast %72 : vector<1xf32> to vector<1x1xf32>
    %74 = math.log %73 : vector<1x1xf32>
    %75 = arith.addf %74, %68 : vector<1x1xf32>
    %76 = vector.broadcast %75 : vector<1x1xf32> to vector<1x128xf32>
    %77 = arith.subf %66, %76 : vector<1x128xf32>
    %78 = tpu.concatenate %62, %0 in 1 : vector<1x32xf32>, vector<1x96xf32> -> vector<1x128xf32>
    %79 = tpu.concatenate %77, %19, %78 in 0 : vector<1x128xf32>, vector<1x128xf32>, vector<1x128xf32> -> vector<3x128xf32>
    %80 = vector.shape_cast %79 : vector<3x128xf32> to vector<1x3x128xf32>
    %81 = arith.index_cast %c0_i32 : i32 to index
    %c0_38 = arith.constant 0 : index
    %c0_39 = arith.constant 0 : index
    %82 = vector.load %arg15[%81, %c0_38, %c0_39] : memref<8x3x128xf32, #tpu.memory_space<vmem>>, vector<1x3x128xf32>
    tpu.vector_store %arg15[%81, %c0_38, %c0_39], %80 {strides = array<i32>} : memref<8x3x128xf32, #tpu.memory_space<vmem>>, vector<1x3x128xf32>,
    %c1_i32 = arith.constant 1 : i32
    %83 = arith.index_cast %c1_i32 : i32 to index
    %84 = memref.load %arg1[%83] : memref<8xi32, #tpu.memory_space<smem>>
    %85 = arith.index_cast %84 : i32 to index
    %c0_40 = arith.constant 0 : index
    %86 = vector.load %arg2[%85, %c0_40] : memref<64x32xf32, #tpu.memory_space<vmem>>, vector<1x32xf32>
    %87 = tpu.concatenate %86, %62 in 1 : vector<1x32xf32>, vector<1x32xf32> -> vector<1x64xf32>
    %c0_41 = arith.constant 0 : index
    %c0_42 = arith.constant 0 : index
    %88 = vector.load %arg5[%c0_41, %c0_42] : memref<64x128xf32, #tpu.memory_space<vmem>>, vector<64x128xf32>
    %cst_43 = arith.constant dense<0.000000e+00> : vector<1x128xf32>
    %89 = tpu.matmul %87, %88, %cst_43 {dimension_numbers = #tpu.dot_dimension_numbers<[1], [0], [0], [1], [0, 0, 1, 1], [], []>} : vector<1x64xf32>, vector<64x128xf32>, vector<1x128xf32> -> vector<1x128xf32>
    %c0_44 = arith.constant 0 : index
    %c0_45 = arith.constant 0 : index
    %90 = vector.load %arg6[%c0_44, %c0_45] : memref<1x128xf32, #tpu.memory_space<vmem>>, vector<1x128xf32>
    %91 = arith.addf %89, %90 : vector<1x128xf32>
    %cst_46 = arith.constant dense<0xFF800000> : vector<1xf32>
    %92 = vector.multi_reduction <maximumf>, %91, %cst_46 [1] : vector<1x128xf32> to vector<1xf32>
    %93 = vector.shape_cast %92 : vector<1xf32> to vector<1x1xf32>
    %94 = vector.broadcast %93 : vector<1x1xf32> to vector<1x128xf32>
    %95 = arith.subf %91, %94 : vector<1x128xf32>
    %96 = math.exp %95 : vector<1x128xf32>
    %cst_47 = arith.constant dense<0.000000e+00> : vector<1xf32>
    %97 = vector.multi_reduction <add>, %96, %cst_47 [1] : vector<1x128xf32> to vector<1xf32>
    %98 = vector.shape_cast %97 : vector<1xf32> to vector<1x1xf32>
    %99 = vector.broadcast %98 : vector<1x1xf32> to vector<1x128xf32>
    %100 = arith.divf %96, %99 : vector<1x128xf32>
    %c0_48 = arith.constant 0 : index
    %c0_49 = arith.constant 0 : index
    %101 = vector.load %arg3[%c0_48, %c0_49] : memref<128x32xf32, #tpu.memory_space<vmem>>, vector<128x32xf32>
    %cst_50 = arith.constant dense<0.000000e+00> : vector<1x32xf32>
    %102 = tpu.matmul %100, %101, %cst_50 {dimension_numbers = #tpu.dot_dimension_numbers<[1], [0], [0], [1], [0, 0, 1, 1], [], []>} : vector<1x128xf32>, vector<128x32xf32>, vector<1x32xf32> -> vector<1x32xf32>
    %103 = tpu.concatenate %86, %102 in 1 : vector<1x32xf32>, vector<1x32xf32> -> vector<1x64xf32>
    %c0_51 = arith.constant 0 : index
    %c0_52 = arith.constant 0 : index
    %104 = vector.load %arg7[%c0_51, %c0_52] : memref<64x32xf32, #tpu.memory_space<vmem>>, vector<64x32xf32>
    %cst_53 = arith.constant dense<0.000000e+00> : vector<1x32xf32>
    %105 = tpu.matmul %103, %104, %cst_53 {dimension_numbers = #tpu.dot_dimension_numbers<[1], [0], [0], [1], [0, 0, 1, 1], [], []>} : vector<1x64xf32>, vector<64x32xf32>, vector<1x32xf32> -> vector<1x32xf32>
    %c0_54 = arith.constant 0 : index
    %c0_55 = arith.constant 0 : index
    %106 = vector.load %arg8[%c0_54, %c0_55] : memref<1x32xf32, #tpu.memory_space<vmem>>, vector<1x32xf32>
    %107 = arith.addf %105, %106 : vector<1x32xf32>
    %cst_56 = arith.constant 0.000000e+00 : f32
    %108 = vector.broadcast %cst_56 : f32 to vector<1x32xf32>
    %109 = arith.maximumf %107, %108 : vector<1x32xf32>
    %c0_57 = arith.constant 0 : index
    %c0_58 = arith.constant 0 : index
    %110 = vector.load %arg9[%c0_57, %c0_58] : memref<32x128xf32, #tpu.memory_space<vmem>>, vector<32x128xf32>
    %cst_59 = arith.constant dense<0.000000e+00> : vector<1x128xf32>
    %111 = tpu.matmul %109, %110, %cst_59 {dimension_numbers = #tpu.dot_dimension_numbers<[1], [0], [0], [1], [0, 0, 1, 1], [], []>} : vector<1x32xf32>, vector<32x128xf32>, vector<1x128xf32> -> vector<1x128xf32>
    %c0_60 = arith.constant 0 : index
    %c0_61 = arith.constant 0 : index
    %112 = vector.load %arg10[%c0_60, %c0_61] : memref<1x128xf32, #tpu.memory_space<vmem>>, vector<1x128xf32>
    %113 = arith.addf %111, %112 : vector<1x128xf32>
    %c0_62 = arith.constant 0 : index
    %c0_63 = arith.constant 0 : index
    %114 = vector.load %arg11[%c0_62, %c0_63] : memref<32x128xf32, #tpu.memory_space<vmem>>, vector<32x128xf32>
    %cst_64 = arith.constant dense<0.000000e+00> : vector<1x128xf32>
    %115 = tpu.matmul %62, %114, %cst_64 {dimension_numbers = #tpu.dot_dimension_numbers<[1], [0], [0], [1], [0, 0, 1, 1], [], []>} : vector<1x32xf32>, vector<32x128xf32>, vector<1x128xf32> -> vector<1x128xf32>
    %c0_65 = arith.constant 0 : index
    %c0_66 = arith.constant 0 : index
    %116 = vector.load %arg12[%c0_65, %c0_66] : memref<1x128xf32, #tpu.memory_space<vmem>>, vector<1x128xf32>
    %117 = arith.addf %115, %116 : vector<1x128xf32>
    %118 = vector.extract_strided_slice %113 {offsets = [0, 0], sizes = [1, 32], strides = [1, 1]} : vector<1x128xf32> to vector<1x32xf32>
    %119 = vector.extract_strided_slice %117 {offsets = [0, 0], sizes = [1, 32], strides = [1, 1]} : vector<1x128xf32> to vector<1x32xf32>
    %120 = arith.addf %118, %119 : vector<1x32xf32>
    %121 = arith.negf %120 : vector<1x32xf32>
    %122 = math.exp %121 : vector<1x32xf32>
    %cst_67 = arith.constant 1.000000e+00 : f32
    %123 = vector.broadcast %cst_67 : f32 to vector<1x32xf32>
    %124 = arith.addf %123, %122 : vector<1x32xf32>
    %125 = arith.divf %123, %124 : vector<1x32xf32>
    %126 = vector.extract_strided_slice %113 {offsets = [0, 32], sizes = [1, 32], strides = [1, 1]} : vector<1x128xf32> to vector<1x32xf32>
    %127 = vector.extract_strided_slice %117 {offsets = [0, 32], sizes = [1, 32], strides = [1, 1]} : vector<1x128xf32> to vector<1x32xf32>
    %128 = arith.addf %126, %127 : vector<1x32xf32>
    %129 = arith.negf %128 : vector<1x32xf32>
    %130 = math.exp %129 : vector<1x32xf32>
    %cst_68 = arith.constant 1.000000e+00 : f32
    %131 = vector.broadcast %cst_68 : f32 to vector<1x32xf32>
    %132 = arith.addf %131, %130 : vector<1x32xf32>
    %133 = arith.divf %131, %132 : vector<1x32xf32>
    %134 = vector.extract_strided_slice %113 {offsets = [0, 64], sizes = [1, 32], strides = [1, 1]} : vector<1x128xf32> to vector<1x32xf32>
    %135 = vector.extract_strided_slice %117 {offsets = [0, 64], sizes = [1, 32], strides = [1, 1]} : vector<1x128xf32> to vector<1x32xf32>
    %136 = arith.mulf %125, %135 : vector<1x32xf32>
    %137 = arith.addf %134, %136 : vector<1x32xf32>
    %138 = math.tanh %137 : vector<1x32xf32>
    %cst_69 = arith.constant 1.000000e+00 : f32
    %139 = vector.broadcast %cst_69 : f32 to vector<1x32xf32>
    %140 = arith.subf %139, %133 : vector<1x32xf32>
    %141 = arith.mulf %140, %138 : vector<1x32xf32>
    %142 = arith.mulf %133, %62 : vector<1x32xf32>
    %143 = arith.addf %141, %142 : vector<1x32xf32>
    %c0_70 = arith.constant 0 : index
    %c0_71 = arith.constant 0 : index
    %144 = vector.load %arg13[%c0_70, %c0_71] : memref<32x128xf32, #tpu.memory_space<vmem>>, vector<32x128xf32>
    %cst_72 = arith.constant dense<0.000000e+00> : vector<1x128xf32>
    %145 = tpu.matmul %143, %144, %cst_72 {dimension_numbers = #tpu.dot_dimension_numbers<[1], [0], [0], [1], [0, 0, 1, 1], [], []>} : vector<1x32xf32>, vector<32x128xf32>, vector<1x128xf32> -> vector<1x128xf32>
    %c0_73 = arith.constant 0 : index
    %c0_74 = arith.constant 0 : index
    %146 = vector.load %arg14[%c0_73, %c0_74] : memref<1x128xf32, #tpu.memory_space<vmem>>, vector<1x128xf32>
    %147 = arith.addf %145, %146 : vector<1x128xf32>
    %cst_75 = arith.constant dense<0xFF800000> : vector<1xf32>
    %148 = vector.multi_reduction <maximumf>, %147, %cst_75 [1] : vector<1x128xf32> to vector<1xf32>
    %149 = vector.shape_cast %148 : vector<1xf32> to vector<1x1xf32>
    %150 = vector.broadcast %149 : vector<1x1xf32> to vector<1x128xf32>
    %151 = arith.subf %147, %150 : vector<1x128xf32>
    %152 = math.exp %151 : vector<1x128xf32>
    %cst_76 = arith.constant dense<0.000000e+00> : vector<1xf32>
    %153 = vector.multi_reduction <add>, %152, %cst_76 [1] : vector<1x128xf32> to vector<1xf32>
    %154 = vector.shape_cast %153 : vector<1xf32> to vector<1x1xf32>
    %155 = math.log %154 : vector<1x1xf32>
    %156 = arith.addf %155, %149 : vector<1x1xf32>
    %157 = vector.broadcast %156 : vector<1x1xf32> to vector<1x128xf32>
    %158 = arith.subf %147, %157 : vector<1x128xf32>
    %159 = tpu.concatenate %143, %0 in 1 : vector<1x32xf32>, vector<1x96xf32> -> vector<1x128xf32>
    %160 = tpu.concatenate %158, %100, %159 in 0 : vector<1x128xf32>, vector<1x128xf32>, vector<1x128xf32> -> vector<3x128xf32>
    %161 = vector.shape_cast %160 : vector<3x128xf32> to vector<1x3x128xf32>
    %162 = arith.index_cast %c1_i32 : i32 to index
    %c0_77 = arith.constant 0 : index
    %c0_78 = arith.constant 0 : index
    %163 = vector.load %arg15[%162, %c0_77, %c0_78] : memref<8x3x128xf32, #tpu.memory_space<vmem>>, vector<1x3x128xf32>
    tpu.vector_store %arg15[%162, %c0_77, %c0_78], %161 {strides = array<i32>} : memref<8x3x128xf32, #tpu.memory_space<vmem>>, vector<1x3x128xf32>,
    %c2_i32 = arith.constant 2 : i32
    %164 = arith.index_cast %c2_i32 : i32 to index
    %165 = memref.load %arg1[%164] : memref<8xi32, #tpu.memory_space<smem>>
    %166 = arith.index_cast %165 : i32 to index
    %c0_79 = arith.constant 0 : index
    %167 = vector.load %arg2[%166, %c0_79] : memref<64x32xf32, #tpu.memory_space<vmem>>, vector<1x32xf32>
    %168 = tpu.concatenate %167, %143 in 1 : vector<1x32xf32>, vector<1x32xf32> -> vector<1x64xf32>
    %c0_80 = arith.constant 0 : index
    %c0_81 = arith.constant 0 : index
    %169 = vector.load %arg5[%c0_80, %c0_81] : memref<64x128xf32, #tpu.memory_space<vmem>>, vector<64x128xf32>
    %cst_82 = arith.constant dense<0.000000e+00> : vector<1x128xf32>
    %170 = tpu.matmul %168, %169, %cst_82 {dimension_numbers = #tpu.dot_dimension_numbers<[1], [0], [0], [1], [0, 0, 1, 1], [], []>} : vector<1x64xf32>, vector<64x128xf32>, vector<1x128xf32> -> vector<1x128xf32>
    %c0_83 = arith.constant 0 : index
    %c0_84 = arith.constant 0 : index
    %171 = vector.load %arg6[%c0_83, %c0_84] : memref<1x128xf32, #tpu.memory_space<vmem>>, vector<1x128xf32>
    %172 = arith.addf %170, %171 : vector<1x128xf32>
    %cst_85 = arith.constant dense<0xFF800000> : vector<1xf32>
    %173 = vector.multi_reduction <maximumf>, %172, %cst_85 [1] : vector<1x128xf32> to vector<1xf32>
    %174 = vector.shape_cast %173 : vector<1xf32> to vector<1x1xf32>
    %175 = vector.broadcast %174 : vector<1x1xf32> to vector<1x128xf32>
    %176 = arith.subf %172, %175 : vector<1x128xf32>
    %177 = math.exp %176 : vector<1x128xf32>
    %cst_86 = arith.constant dense<0.000000e+00> : vector<1xf32>
    %178 = vector.multi_reduction <add>, %177, %cst_86 [1] : vector<1x128xf32> to vector<1xf32>
    %179 = vector.shape_cast %178 : vector<1xf32> to vector<1x1xf32>
    %180 = vector.broadcast %179 : vector<1x1xf32> to vector<1x128xf32>
    %181 = arith.divf %177, %180 : vector<1x128xf32>
    %c0_87 = arith.constant 0 : index
    %c0_88 = arith.constant 0 : index
    %182 = vector.load %arg3[%c0_87, %c0_88] : memref<128x32xf32, #tpu.memory_space<vmem>>, vector<128x32xf32>
    %cst_89 = arith.constant dense<0.000000e+00> : vector<1x32xf32>
    %183 = tpu.matmul %181, %182, %cst_89 {dimension_numbers = #tpu.dot_dimension_numbers<[1], [0], [0], [1], [0, 0, 1, 1], [], []>} : vector<1x128xf32>, vector<128x32xf32>, vector<1x32xf32> -> vector<1x32xf32>
    %184 = tpu.concatenate %167, %183 in 1 : vector<1x32xf32>, vector<1x32xf32> -> vector<1x64xf32>
    %c0_90 = arith.constant 0 : index
    %c0_91 = arith.constant 0 : index
    %185 = vector.load %arg7[%c0_90, %c0_91] : memref<64x32xf32, #tpu.memory_space<vmem>>, vector<64x32xf32>
    %cst_92 = arith.constant dense<0.000000e+00> : vector<1x32xf32>
    %186 = tpu.matmul %184, %185, %cst_92 {dimension_numbers = #tpu.dot_dimension_numbers<[1], [0], [0], [1], [0, 0, 1, 1], [], []>} : vector<1x64xf32>, vector<64x32xf32>, vector<1x32xf32> -> vector<1x32xf32>
    %c0_93 = arith.constant 0 : index
    %c0_94 = arith.constant 0 : index
    %187 = vector.load %arg8[%c0_93, %c0_94] : memref<1x32xf32, #tpu.memory_space<vmem>>, vector<1x32xf32>
    %188 = arith.addf %186, %187 : vector<1x32xf32>
    %cst_95 = arith.constant 0.000000e+00 : f32
    %189 = vector.broadcast %cst_95 : f32 to vector<1x32xf32>
    %190 = arith.maximumf %188, %189 : vector<1x32xf32>
    %c0_96 = arith.constant 0 : index
    %c0_97 = arith.constant 0 : index
    %191 = vector.load %arg9[%c0_96, %c0_97] : memref<32x128xf32, #tpu.memory_space<vmem>>, vector<32x128xf32>
    %cst_98 = arith.constant dense<0.000000e+00> : vector<1x128xf32>
    %192 = tpu.matmul %190, %191, %cst_98 {dimension_numbers = #tpu.dot_dimension_numbers<[1], [0], [0], [1], [0, 0, 1, 1], [], []>} : vector<1x32xf32>, vector<32x128xf32>, vector<1x128xf32> -> vector<1x128xf32>
    %c0_99 = arith.constant 0 : index
    %c0_100 = arith.constant 0 : index
    %193 = vector.load %arg10[%c0_99, %c0_100] : memref<1x128xf32, #tpu.memory_space<vmem>>, vector<1x128xf32>
    %194 = arith.addf %192, %193 : vector<1x128xf32>
    %c0_101 = arith.constant 0 : index
    %c0_102 = arith.constant 0 : index
    %195 = vector.load %arg11[%c0_101, %c0_102] : memref<32x128xf32, #tpu.memory_space<vmem>>, vector<32x128xf32>
    %cst_103 = arith.constant dense<0.000000e+00> : vector<1x128xf32>
    %196 = tpu.matmul %143, %195, %cst_103 {dimension_numbers = #tpu.dot_dimension_numbers<[1], [0], [0], [1], [0, 0, 1, 1], [], []>} : vector<1x32xf32>, vector<32x128xf32>, vector<1x128xf32> -> vector<1x128xf32>
    %c0_104 = arith.constant 0 : index
    %c0_105 = arith.constant 0 : index
    %197 = vector.load %arg12[%c0_104, %c0_105] : memref<1x128xf32, #tpu.memory_space<vmem>>, vector<1x128xf32>
    %198 = arith.addf %196, %197 : vector<1x128xf32>
    %199 = vector.extract_strided_slice %194 {offsets = [0, 0], sizes = [1, 32], strides = [1, 1]} : vector<1x128xf32> to vector<1x32xf32>
    %200 = vector.extract_strided_slice %198 {offsets = [0, 0], sizes = [1, 32], strides = [1, 1]} : vector<1x128xf32> to vector<1x32xf32>
    %201 = arith.addf %199, %200 : vector<1x32xf32>
    %202 = arith.negf %201 : vector<1x32xf32>
    %203 = math.exp %202 : vector<1x32xf32>
    %cst_106 = arith.constant 1.000000e+00 : f32
    %204 = vector.broadcast %cst_106 : f32 to vector<1x32xf32>
    %205 = arith.addf %204, %203 : vector<1x32xf32>
    %206 = arith.divf %204, %205 : vector<1x32xf32>
    %207 = vector.extract_strided_slice %194 {offsets = [0, 32], sizes = [1, 32], strides = [1, 1]} : vector<1x128xf32> to vector<1x32xf32>
    %208 = vector.extract_strided_slice %198 {offsets = [0, 32], sizes = [1, 32], strides = [1, 1]} : vector<1x128xf32> to vector<1x32xf32>
    %209 = arith.addf %207, %208 : vector<1x32xf32>
    %210 = arith.negf %209 : vector<1x32xf32>
    %211 = math.exp %210 : vector<1x32xf32>
    %cst_107 = arith.constant 1.000000e+00 : f32
    %212 = vector.broadcast %cst_107 : f32 to vector<1x32xf32>
    %213 = arith.addf %212, %211 : vector<1x32xf32>
    %214 = arith.divf %212, %213 : vector<1x32xf32>
    %215 = vector.extract_strided_slice %194 {offsets = [0, 64], sizes = [1, 32], strides = [1, 1]} : vector<1x128xf32> to vector<1x32xf32>
    %216 = vector.extract_strided_slice %198 {offsets = [0, 64], sizes = [1, 32], strides = [1, 1]} : vector<1x128xf32> to vector<1x32xf32>
    %217 = arith.mulf %206, %216 : vector<1x32xf32>
    %218 = arith.addf %215, %217 : vector<1x32xf32>
    %219 = math.tanh %218 : vector<1x32xf32>
    %cst_108 = arith.constant 1.000000e+00 : f32
    %220 = vector.broadcast %cst_108 : f32 to vector<1x32xf32>
    %221 = arith.subf %220, %214 : vector<1x32xf32>
    %222 = arith.mulf %221, %219 : vector<1x32xf32>
    %223 = arith.mulf %214, %143 : vector<1x32xf32>
    %224 = arith.addf %222, %223 : vector<1x32xf32>
    %c0_109 = arith.constant 0 : index
    %c0_110 = arith.constant 0 : index
    %225 = vector.load %arg13[%c0_109, %c0_110] : memref<32x128xf32, #tpu.memory_space<vmem>>, vector<32x128xf32>
    %cst_111 = arith.constant dense<0.000000e+00> : vector<1x128xf32>
    %226 = tpu.matmul %224, %225, %cst_111 {dimension_numbers = #tpu.dot_dimension_numbers<[1], [0], [0], [1], [0, 0, 1, 1], [], []>} : vector<1x32xf32>, vector<32x128xf32>, vector<1x128xf32> -> vector<1x128xf32>
    %c0_112 = arith.constant 0 : index
    %c0_113 = arith.constant 0 : index
    %227 = vector.load %arg14[%c0_112, %c0_113] : memref<1x128xf32, #tpu.memory_space<vmem>>, vector<1x128xf32>
    %228 = arith.addf %226, %227 : vector<1x128xf32>
    %cst_114 = arith.constant dense<0xFF800000> : vector<1xf32>
    %229 = vector.multi_reduction <maximumf>, %228, %cst_114 [1] : vector<1x128xf32> to vector<1xf32>
    %230 = vector.shape_cast %229 : vector<1xf32> to vector<1x1xf32>
    %231 = vector.broadcast %230 : vector<1x1xf32> to vector<1x128xf32>
    %232 = arith.subf %228, %231 : vector<1x128xf32>
    %233 = math.exp %232 : vector<1x128xf32>
    %cst_115 = arith.constant dense<0.000000e+00> : vector<1xf32>
    %234 = vector.multi_reduction <add>, %233, %cst_115 [1] : vector<1x128xf32> to vector<1xf32>
    %235 = vector.shape_cast %234 : vector<1xf32> to vector<1x1xf32>
    %236 = math.log %235 : vector<1x1xf32>
    %237 = arith.addf %236, %230 : vector<1x1xf32>
    %238 = vector.broadcast %237 : vector<1x1xf32> to vector<1x128xf32>
    %239 = arith.subf %228, %238 : vector<1x128xf32>
    %240 = tpu.concatenate %224, %0 in 1 : vector<1x32xf32>, vector<1x96xf32> -> vector<1x128xf32>
    %241 = tpu.concatenate %239, %181, %240 in 0 : vector<1x128xf32>, vector<1x128xf32>, vector<1x128xf32> -> vector<3x128xf32>
    %242 = vector.shape_cast %241 : vector<3x128xf32> to vector<1x3x128xf32>
    %243 = arith.index_cast %c2_i32 : i32 to index
    %c0_116 = arith.constant 0 : index
    %c0_117 = arith.constant 0 : index
    %244 = vector.load %arg15[%243, %c0_116, %c0_117] : memref<8x3x128xf32, #tpu.memory_space<vmem>>, vector<1x3x128xf32>
    tpu.vector_store %arg15[%243, %c0_116, %c0_117], %242 {strides = array<i32>} : memref<8x3x128xf32, #tpu.memory_space<vmem>>, vector<1x3x128xf32>,
    %c3_i32 = arith.constant 3 : i32
    %245 = arith.index_cast %c3_i32 : i32 to index
    %246 = memref.load %arg1[%245] : memref<8xi32, #tpu.memory_space<smem>>
    %247 = arith.index_cast %246 : i32 to index
    %c0_118 = arith.constant 0 : index
    %248 = vector.load %arg2[%247, %c0_118] : memref<64x32xf32, #tpu.memory_space<vmem>>, vector<1x32xf32>
    %249 = tpu.concatenate %248, %224 in 1 : vector<1x32xf32>, vector<1x32xf32> -> vector<1x64xf32>
    %c0_119 = arith.constant 0 : index
    %c0_120 = arith.constant 0 : index
    %250 = vector.load %arg5[%c0_119, %c0_120] : memref<64x128xf32, #tpu.memory_space<vmem>>, vector<64x128xf32>
    %cst_121 = arith.constant dense<0.000000e+00> : vector<1x128xf32>
    %251 = tpu.matmul %249, %250, %cst_121 {dimension_numbers = #tpu.dot_dimension_numbers<[1], [0], [0], [1], [0, 0, 1, 1], [], []>} : vector<1x64xf32>, vector<64x128xf32>, vector<1x128xf32> -> vector<1x128xf32>
    %c0_122 = arith.constant 0 : index
    %c0_123 = arith.constant 0 : index
    %252 = vector.load %arg6[%c0_122, %c0_123] : memref<1x128xf32, #tpu.memory_space<vmem>>, vector<1x128xf32>
    %253 = arith.addf %251, %252 : vector<1x128xf32>
    %cst_124 = arith.constant dense<0xFF800000> : vector<1xf32>
    %254 = vector.multi_reduction <maximumf>, %253, %cst_124 [1] : vector<1x128xf32> to vector<1xf32>
    %255 = vector.shape_cast %254 : vector<1xf32> to vector<1x1xf32>
    %256 = vector.broadcast %255 : vector<1x1xf32> to vector<1x128xf32>
    %257 = arith.subf %253, %256 : vector<1x128xf32>
    %258 = math.exp %257 : vector<1x128xf32>
    %cst_125 = arith.constant dense<0.000000e+00> : vector<1xf32>
    %259 = vector.multi_reduction <add>, %258, %cst_125 [1] : vector<1x128xf32> to vector<1xf32>
    %260 = vector.shape_cast %259 : vector<1xf32> to vector<1x1xf32>
    %261 = vector.broadcast %260 : vector<1x1xf32> to vector<1x128xf32>
    %262 = arith.divf %258, %261 : vector<1x128xf32>
    %c0_126 = arith.constant 0 : index
    %c0_127 = arith.constant 0 : index
    %263 = vector.load %arg3[%c0_126, %c0_127] : memref<128x32xf32, #tpu.memory_space<vmem>>, vector<128x32xf32>
    %cst_128 = arith.constant dense<0.000000e+00> : vector<1x32xf32>
    %264 = tpu.matmul %262, %263, %cst_128 {dimension_numbers = #tpu.dot_dimension_numbers<[1], [0], [0], [1], [0, 0, 1, 1], [], []>} : vector<1x128xf32>, vector<128x32xf32>, vector<1x32xf32> -> vector<1x32xf32>
    %265 = tpu.concatenate %248, %264 in 1 : vector<1x32xf32>, vector<1x32xf32> -> vector<1x64xf32>
    %c0_129 = arith.constant 0 : index
    %c0_130 = arith.constant 0 : index
    %266 = vector.load %arg7[%c0_129, %c0_130] : memref<64x32xf32, #tpu.memory_space<vmem>>, vector<64x32xf32>
    %cst_131 = arith.constant dense<0.000000e+00> : vector<1x32xf32>
    %267 = tpu.matmul %265, %266, %cst_131 {dimension_numbers = #tpu.dot_dimension_numbers<[1], [0], [0], [1], [0, 0, 1, 1], [], []>} : vector<1x64xf32>, vector<64x32xf32>, vector<1x32xf32> -> vector<1x32xf32>
    %c0_132 = arith.constant 0 : index
    %c0_133 = arith.constant 0 : index
    %268 = vector.load %arg8[%c0_132, %c0_133] : memref<1x32xf32, #tpu.memory_space<vmem>>, vector<1x32xf32>
    %269 = arith.addf %267, %268 : vector<1x32xf32>
    %cst_134 = arith.constant 0.000000e+00 : f32
    %270 = vector.broadcast %cst_134 : f32 to vector<1x32xf32>
    %271 = arith.maximumf %269, %270 : vector<1x32xf32>
    %c0_135 = arith.constant 0 : index
    %c0_136 = arith.constant 0 : index
    %272 = vector.load %arg9[%c0_135, %c0_136] : memref<32x128xf32, #tpu.memory_space<vmem>>, vector<32x128xf32>
    %cst_137 = arith.constant dense<0.000000e+00> : vector<1x128xf32>
    %273 = tpu.matmul %271, %272, %cst_137 {dimension_numbers = #tpu.dot_dimension_numbers<[1], [0], [0], [1], [0, 0, 1, 1], [], []>} : vector<1x32xf32>, vector<32x128xf32>, vector<1x128xf32> -> vector<1x128xf32>
    %c0_138 = arith.constant 0 : index
    %c0_139 = arith.constant 0 : index
    %274 = vector.load %arg10[%c0_138, %c0_139] : memref<1x128xf32, #tpu.memory_space<vmem>>, vector<1x128xf32>
    %275 = arith.addf %273, %274 : vector<1x128xf32>
    %c0_140 = arith.constant 0 : index
    %c0_141 = arith.constant 0 : index
    %276 = vector.load %arg11[%c0_140, %c0_141] : memref<32x128xf32, #tpu.memory_space<vmem>>, vector<32x128xf32>
    %cst_142 = arith.constant dense<0.000000e+00> : vector<1x128xf32>
    %277 = tpu.matmul %224, %276, %cst_142 {dimension_numbers = #tpu.dot_dimension_numbers<[1], [0], [0], [1], [0, 0, 1, 1], [], []>} : vector<1x32xf32>, vector<32x128xf32>, vector<1x128xf32> -> vector<1x128xf32>
    %c0_143 = arith.constant 0 : index
    %c0_144 = arith.constant 0 : index
    %278 = vector.load %arg12[%c0_143, %c0_144] : memref<1x128xf32, #tpu.memory_space<vmem>>, vector<1x128xf32>
    %279 = arith.addf %277, %278 : vector<1x128xf32>
    %280 = vector.extract_strided_slice %275 {offsets = [0, 0], sizes = [1, 32], strides = [1, 1]} : vector<1x128xf32> to vector<1x32xf32>
    %281 = vector.extract_strided_slice %279 {offsets = [0, 0], sizes = [1, 32], strides = [1, 1]} : vector<1x128xf32> to vector<1x32xf32>
    %282 = arith.addf %280, %281 : vector<1x32xf32>
    %283 = arith.negf %282 : vector<1x32xf32>
    %284 = math.exp %283 : vector<1x32xf32>
    %cst_145 = arith.constant 1.000000e+00 : f32
    %285 = vector.broadcast %cst_145 : f32 to vector<1x32xf32>
    %286 = arith.addf %285, %284 : vector<1x32xf32>
    %287 = arith.divf %285, %286 : vector<1x32xf32>
    %288 = vector.extract_strided_slice %275 {offsets = [0, 32], sizes = [1, 32], strides = [1, 1]} : vector<1x128xf32> to vector<1x32xf32>
    %289 = vector.extract_strided_slice %279 {offsets = [0, 32], sizes = [1, 32], strides = [1, 1]} : vector<1x128xf32> to vector<1x32xf32>
    %290 = arith.addf %288, %289 : vector<1x32xf32>
    %291 = arith.negf %290 : vector<1x32xf32>
    %292 = math.exp %291 : vector<1x32xf32>
    %cst_146 = arith.constant 1.000000e+00 : f32
    %293 = vector.broadcast %cst_146 : f32 to vector<1x32xf32>
    %294 = arith.addf %293, %292 : vector<1x32xf32>
    %295 = arith.divf %293, %294 : vector<1x32xf32>
    %296 = vector.extract_strided_slice %275 {offsets = [0, 64], sizes = [1, 32], strides = [1, 1]} : vector<1x128xf32> to vector<1x32xf32>
    %297 = vector.extract_strided_slice %279 {offsets = [0, 64], sizes = [1, 32], strides = [1, 1]} : vector<1x128xf32> to vector<1x32xf32>
    %298 = arith.mulf %287, %297 : vector<1x32xf32>
    %299 = arith.addf %296, %298 : vector<1x32xf32>
    %300 = math.tanh %299 : vector<1x32xf32>
    %cst_147 = arith.constant 1.000000e+00 : f32
    %301 = vector.broadcast %cst_147 : f32 to vector<1x32xf32>
    %302 = arith.subf %301, %295 : vector<1x32xf32>
    %303 = arith.mulf %302, %300 : vector<1x32xf32>
    %304 = arith.mulf %295, %224 : vector<1x32xf32>
    %305 = arith.addf %303, %304 : vector<1x32xf32>
    %c0_148 = arith.constant 0 : index
    %c0_149 = arith.constant 0 : index
    %306 = vector.load %arg13[%c0_148, %c0_149] : memref<32x128xf32, #tpu.memory_space<vmem>>, vector<32x128xf32>
    %cst_150 = arith.constant dense<0.000000e+00> : vector<1x128xf32>
    %307 = tpu.matmul %305, %306, %cst_150 {dimension_numbers = #tpu.dot_dimension_numbers<[1], [0], [0], [1], [0, 0, 1, 1], [], []>} : vector<1x32xf32>, vector<32x128xf32>, vector<1x128xf32> -> vector<1x128xf32>
    %c0_151 = arith.constant 0 : index
    %c0_152 = arith.constant 0 : index
    %308 = vector.load %arg14[%c0_151, %c0_152] : memref<1x128xf32, #tpu.memory_space<vmem>>, vector<1x128xf32>
    %309 = arith.addf %307, %308 : vector<1x128xf32>
    %cst_153 = arith.constant dense<0xFF800000> : vector<1xf32>
    %310 = vector.multi_reduction <maximumf>, %309, %cst_153 [1] : vector<1x128xf32> to vector<1xf32>
    %311 = vector.shape_cast %310 : vector<1xf32> to vector<1x1xf32>
    %312 = vector.broadcast %311 : vector<1x1xf32> to vector<1x128xf32>
    %313 = arith.subf %309, %312 : vector<1x128xf32>
    %314 = math.exp %313 : vector<1x128xf32>
    %cst_154 = arith.constant dense<0.000000e+00> : vector<1xf32>
    %315 = vector.multi_reduction <add>, %314, %cst_154 [1] : vector<1x128xf32> to vector<1xf32>
    %316 = vector.shape_cast %315 : vector<1xf32> to vector<1x1xf32>
    %317 = math.log %316 : vector<1x1xf32>
    %318 = arith.addf %317, %311 : vector<1x1xf32>
    %319 = vector.broadcast %318 : vector<1x1xf32> to vector<1x128xf32>
    %320 = arith.subf %309, %319 : vector<1x128xf32>
    %321 = tpu.concatenate %305, %0 in 1 : vector<1x32xf32>, vector<1x96xf32> -> vector<1x128xf32>
    %322 = tpu.concatenate %320, %262, %321 in 0 : vector<1x128xf32>, vector<1x128xf32>, vector<1x128xf32> -> vector<3x128xf32>
    %323 = vector.shape_cast %322 : vector<3x128xf32> to vector<1x3x128xf32>
    %324 = arith.index_cast %c3_i32 : i32 to index
    %c0_155 = arith.constant 0 : index
    %c0_156 = arith.constant 0 : index
    %325 = vector.load %arg15[%324, %c0_155, %c0_156] : memref<8x3x128xf32, #tpu.memory_space<vmem>>, vector<1x3x128xf32>
    tpu.vector_store %arg15[%324, %c0_155, %c0_156], %323 {strides = array<i32>} : memref<8x3x128xf32, #tpu.memory_space<vmem>>, vector<1x3x128xf32>,
    %c4_i32 = arith.constant 4 : i32
    %326 = arith.index_cast %c4_i32 : i32 to index
    %327 = memref.load %arg1[%326] : memref<8xi32, #tpu.memory_space<smem>>
    %328 = arith.index_cast %327 : i32 to index
    %c0_157 = arith.constant 0 : index
    %329 = vector.load %arg2[%328, %c0_157] : memref<64x32xf32, #tpu.memory_space<vmem>>, vector<1x32xf32>
    %330 = tpu.concatenate %329, %305 in 1 : vector<1x32xf32>, vector<1x32xf32> -> vector<1x64xf32>
    %c0_158 = arith.constant 0 : index
    %c0_159 = arith.constant 0 : index
    %331 = vector.load %arg5[%c0_158, %c0_159] : memref<64x128xf32, #tpu.memory_space<vmem>>, vector<64x128xf32>
    %cst_160 = arith.constant dense<0.000000e+00> : vector<1x128xf32>
    %332 = tpu.matmul %330, %331, %cst_160 {dimension_numbers = #tpu.dot_dimension_numbers<[1], [0], [0], [1], [0, 0, 1, 1], [], []>} : vector<1x64xf32>, vector<64x128xf32>, vector<1x128xf32> -> vector<1x128xf32>
    %c0_161 = arith.constant 0 : index
    %c0_162 = arith.constant 0 : index
    %333 = vector.load %arg6[%c0_161, %c0_162] : memref<1x128xf32, #tpu.memory_space<vmem>>, vector<1x128xf32>
    %334 = arith.addf %332, %333 : vector<1x128xf32>
    %cst_163 = arith.constant dense<0xFF800000> : vector<1xf32>
    %335 = vector.multi_reduction <maximumf>, %334, %cst_163 [1] : vector<1x128xf32> to vector<1xf32>
    %336 = vector.shape_cast %335 : vector<1xf32> to vector<1x1xf32>
    %337 = vector.broadcast %336 : vector<1x1xf32> to vector<1x128xf32>
    %338 = arith.subf %334, %337 : vector<1x128xf32>
    %339 = math.exp %338 : vector<1x128xf32>
    %cst_164 = arith.constant dense<0.000000e+00> : vector<1xf32>
    %340 = vector.multi_reduction <add>, %339, %cst_164 [1] : vector<1x128xf32> to vector<1xf32>
    %341 = vector.shape_cast %340 : vector<1xf32> to vector<1x1xf32>
    %342 = vector.broadcast %341 : vector<1x1xf32> to vector<1x128xf32>
    %343 = arith.divf %339, %342 : vector<1x128xf32>
    %c0_165 = arith.constant 0 : index
    %c0_166 = arith.constant 0 : index
    %344 = vector.load %arg3[%c0_165, %c0_166] : memref<128x32xf32, #tpu.memory_space<vmem>>, vector<128x32xf32>
    %cst_167 = arith.constant dense<0.000000e+00> : vector<1x32xf32>
    %345 = tpu.matmul %343, %344, %cst_167 {dimension_numbers = #tpu.dot_dimension_numbers<[1], [0], [0], [1], [0, 0, 1, 1], [], []>} : vector<1x128xf32>, vector<128x32xf32>, vector<1x32xf32> -> vector<1x32xf32>
    %346 = tpu.concatenate %329, %345 in 1 : vector<1x32xf32>, vector<1x32xf32> -> vector<1x64xf32>
    %c0_168 = arith.constant 0 : index
    %c0_169 = arith.constant 0 : index
    %347 = vector.load %arg7[%c0_168, %c0_169] : memref<64x32xf32, #tpu.memory_space<vmem>>, vector<64x32xf32>
    %cst_170 = arith.constant dense<0.000000e+00> : vector<1x32xf32>
    %348 = tpu.matmul %346, %347, %cst_170 {dimension_numbers = #tpu.dot_dimension_numbers<[1], [0], [0], [1], [0, 0, 1, 1], [], []>} : vector<1x64xf32>, vector<64x32xf32>, vector<1x32xf32> -> vector<1x32xf32>
    %c0_171 = arith.constant 0 : index
    %c0_172 = arith.constant 0 : index
    %349 = vector.load %arg8[%c0_171, %c0_172] : memref<1x32xf32, #tpu.memory_space<vmem>>, vector<1x32xf32>
    %350 = arith.addf %348, %349 : vector<1x32xf32>
    %cst_173 = arith.constant 0.000000e+00 : f32
    %351 = vector.broadcast %cst_173 : f32 to vector<1x32xf32>
    %352 = arith.maximumf %350, %351 : vector<1x32xf32>
    %c0_174 = arith.constant 0 : index
    %c0_175 = arith.constant 0 : index
    %353 = vector.load %arg9[%c0_174, %c0_175] : memref<32x128xf32, #tpu.memory_space<vmem>>, vector<32x128xf32>
    %cst_176 = arith.constant dense<0.000000e+00> : vector<1x128xf32>
    %354 = tpu.matmul %352, %353, %cst_176 {dimension_numbers = #tpu.dot_dimension_numbers<[1], [0], [0], [1], [0, 0, 1, 1], [], []>} : vector<1x32xf32>, vector<32x128xf32>, vector<1x128xf32> -> vector<1x128xf32>
    %c0_177 = arith.constant 0 : index
    %c0_178 = arith.constant 0 : index
    %355 = vector.load %arg10[%c0_177, %c0_178] : memref<1x128xf32, #tpu.memory_space<vmem>>, vector<1x128xf32>
    %356 = arith.addf %354, %355 : vector<1x128xf32>
    %c0_179 = arith.constant 0 : index
    %c0_180 = arith.constant 0 : index
    %357 = vector.load %arg11[%c0_179, %c0_180] : memref<32x128xf32, #tpu.memory_space<vmem>>, vector<32x128xf32>
    %cst_181 = arith.constant dense<0.000000e+00> : vector<1x128xf32>
    %358 = tpu.matmul %305, %357, %cst_181 {dimension_numbers = #tpu.dot_dimension_numbers<[1], [0], [0], [1], [0, 0, 1, 1], [], []>} : vector<1x32xf32>, vector<32x128xf32>, vector<1x128xf32> -> vector<1x128xf32>
    %c0_182 = arith.constant 0 : index
    %c0_183 = arith.constant 0 : index
    %359 = vector.load %arg12[%c0_182, %c0_183] : memref<1x128xf32, #tpu.memory_space<vmem>>, vector<1x128xf32>
    %360 = arith.addf %358, %359 : vector<1x128xf32>
    %361 = vector.extract_strided_slice %356 {offsets = [0, 0], sizes = [1, 32], strides = [1, 1]} : vector<1x128xf32> to vector<1x32xf32>
    %362 = vector.extract_strided_slice %360 {offsets = [0, 0], sizes = [1, 32], strides = [1, 1]} : vector<1x128xf32> to vector<1x32xf32>
    %363 = arith.addf %361, %362 : vector<1x32xf32>
    %364 = arith.negf %363 : vector<1x32xf32>
    %365 = math.exp %364 : vector<1x32xf32>
    %cst_184 = arith.constant 1.000000e+00 : f32
    %366 = vector.broadcast %cst_184 : f32 to vector<1x32xf32>
    %367 = arith.addf %366, %365 : vector<1x32xf32>
    %368 = arith.divf %366, %367 : vector<1x32xf32>
    %369 = vector.extract_strided_slice %356 {offsets = [0, 32], sizes = [1, 32], strides = [1, 1]} : vector<1x128xf32> to vector<1x32xf32>
    %370 = vector.extract_strided_slice %360 {offsets = [0, 32], sizes = [1, 32], strides = [1, 1]} : vector<1x128xf32> to vector<1x32xf32>
    %371 = arith.addf %369, %370 : vector<1x32xf32>
    %372 = arith.negf %371 : vector<1x32xf32>
    %373 = math.exp %372 : vector<1x32xf32>
    %cst_185 = arith.constant 1.000000e+00 : f32
    %374 = vector.broadcast %cst_185 : f32 to vector<1x32xf32>
    %375 = arith.addf %374, %373 : vector<1x32xf32>
    %376 = arith.divf %374, %375 : vector<1x32xf32>
    %377 = vector.extract_strided_slice %356 {offsets = [0, 64], sizes = [1, 32], strides = [1, 1]} : vector<1x128xf32> to vector<1x32xf32>
    %378 = vector.extract_strided_slice %360 {offsets = [0, 64], sizes = [1, 32], strides = [1, 1]} : vector<1x128xf32> to vector<1x32xf32>
    %379 = arith.mulf %368, %378 : vector<1x32xf32>
    %380 = arith.addf %377, %379 : vector<1x32xf32>
    %381 = math.tanh %380 : vector<1x32xf32>
    %cst_186 = arith.constant 1.000000e+00 : f32
    %382 = vector.broadcast %cst_186 : f32 to vector<1x32xf32>
    %383 = arith.subf %382, %376 : vector<1x32xf32>
    %384 = arith.mulf %383, %381 : vector<1x32xf32>
    %385 = arith.mulf %376, %305 : vector<1x32xf32>
    %386 = arith.addf %384, %385 : vector<1x32xf32>
    %c0_187 = arith.constant 0 : index
    %c0_188 = arith.constant 0 : index
    %387 = vector.load %arg13[%c0_187, %c0_188] : memref<32x128xf32, #tpu.memory_space<vmem>>, vector<32x128xf32>
    %cst_189 = arith.constant dense<0.000000e+00> : vector<1x128xf32>
    %388 = tpu.matmul %386, %387, %cst_189 {dimension_numbers = #tpu.dot_dimension_numbers<[1], [0], [0], [1], [0, 0, 1, 1], [], []>} : vector<1x32xf32>, vector<32x128xf32>, vector<1x128xf32> -> vector<1x128xf32>
    %c0_190 = arith.constant 0 : index
    %c0_191 = arith.constant 0 : index
    %389 = vector.load %arg14[%c0_190, %c0_191] : memref<1x128xf32, #tpu.memory_space<vmem>>, vector<1x128xf32>
    %390 = arith.addf %388, %389 : vector<1x128xf32>
    %cst_192 = arith.constant dense<0xFF800000> : vector<1xf32>
    %391 = vector.multi_reduction <maximumf>, %390, %cst_192 [1] : vector<1x128xf32> to vector<1xf32>
    %392 = vector.shape_cast %391 : vector<1xf32> to vector<1x1xf32>
    %393 = vector.broadcast %392 : vector<1x1xf32> to vector<1x128xf32>
    %394 = arith.subf %390, %393 : vector<1x128xf32>
    %395 = math.exp %394 : vector<1x128xf32>
    %cst_193 = arith.constant dense<0.000000e+00> : vector<1xf32>
    %396 = vector.multi_reduction <add>, %395, %cst_193 [1] : vector<1x128xf32> to vector<1xf32>
    %397 = vector.shape_cast %396 : vector<1xf32> to vector<1x1xf32>
    %398 = math.log %397 : vector<1x1xf32>
    %399 = arith.addf %398, %392 : vector<1x1xf32>
    %400 = vector.broadcast %399 : vector<1x1xf32> to vector<1x128xf32>
    %401 = arith.subf %390, %400 : vector<1x128xf32>
    %402 = tpu.concatenate %386, %0 in 1 : vector<1x32xf32>, vector<1x96xf32> -> vector<1x128xf32>
    %403 = tpu.concatenate %401, %343, %402 in 0 : vector<1x128xf32>, vector<1x128xf32>, vector<1x128xf32> -> vector<3x128xf32>
    %404 = vector.shape_cast %403 : vector<3x128xf32> to vector<1x3x128xf32>
    %405 = arith.index_cast %c4_i32 : i32 to index
    %c0_194 = arith.constant 0 : index
    %c0_195 = arith.constant 0 : index
    %406 = vector.load %arg15[%405, %c0_194, %c0_195] : memref<8x3x128xf32, #tpu.memory_space<vmem>>, vector<1x3x128xf32>
    tpu.vector_store %arg15[%405, %c0_194, %c0_195], %404 {strides = array<i32>} : memref<8x3x128xf32, #tpu.memory_space<vmem>>, vector<1x3x128xf32>,
    %c5_i32 = arith.constant 5 : i32
    %407 = arith.index_cast %c5_i32 : i32 to index
    %408 = memref.load %arg1[%407] : memref<8xi32, #tpu.memory_space<smem>>
    %409 = arith.index_cast %408 : i32 to index
    %c0_196 = arith.constant 0 : index
    %410 = vector.load %arg2[%409, %c0_196] : memref<64x32xf32, #tpu.memory_space<vmem>>, vector<1x32xf32>
    %411 = tpu.concatenate %410, %386 in 1 : vector<1x32xf32>, vector<1x32xf32> -> vector<1x64xf32>
    %c0_197 = arith.constant 0 : index
    %c0_198 = arith.constant 0 : index
    %412 = vector.load %arg5[%c0_197, %c0_198] : memref<64x128xf32, #tpu.memory_space<vmem>>, vector<64x128xf32>
    %cst_199 = arith.constant dense<0.000000e+00> : vector<1x128xf32>
    %413 = tpu.matmul %411, %412, %cst_199 {dimension_numbers = #tpu.dot_dimension_numbers<[1], [0], [0], [1], [0, 0, 1, 1], [], []>} : vector<1x64xf32>, vector<64x128xf32>, vector<1x128xf32> -> vector<1x128xf32>
    %c0_200 = arith.constant 0 : index
    %c0_201 = arith.constant 0 : index
    %414 = vector.load %arg6[%c0_200, %c0_201] : memref<1x128xf32, #tpu.memory_space<vmem>>, vector<1x128xf32>
    %415 = arith.addf %413, %414 : vector<1x128xf32>
    %cst_202 = arith.constant dense<0xFF800000> : vector<1xf32>
    %416 = vector.multi_reduction <maximumf>, %415, %cst_202 [1] : vector<1x128xf32> to vector<1xf32>
    %417 = vector.shape_cast %416 : vector<1xf32> to vector<1x1xf32>
    %418 = vector.broadcast %417 : vector<1x1xf32> to vector<1x128xf32>
    %419 = arith.subf %415, %418 : vector<1x128xf32>
    %420 = math.exp %419 : vector<1x128xf32>
    %cst_203 = arith.constant dense<0.000000e+00> : vector<1xf32>
    %421 = vector.multi_reduction <add>, %420, %cst_203 [1] : vector<1x128xf32> to vector<1xf32>
    %422 = vector.shape_cast %421 : vector<1xf32> to vector<1x1xf32>
    %423 = vector.broadcast %422 : vector<1x1xf32> to vector<1x128xf32>
    %424 = arith.divf %420, %423 : vector<1x128xf32>
    %c0_204 = arith.constant 0 : index
    %c0_205 = arith.constant 0 : index
    %425 = vector.load %arg3[%c0_204, %c0_205] : memref<128x32xf32, #tpu.memory_space<vmem>>, vector<128x32xf32>
    %cst_206 = arith.constant dense<0.000000e+00> : vector<1x32xf32>
    %426 = tpu.matmul %424, %425, %cst_206 {dimension_numbers = #tpu.dot_dimension_numbers<[1], [0], [0], [1], [0, 0, 1, 1], [], []>} : vector<1x128xf32>, vector<128x32xf32>, vector<1x32xf32> -> vector<1x32xf32>
    %427 = tpu.concatenate %410, %426 in 1 : vector<1x32xf32>, vector<1x32xf32> -> vector<1x64xf32>
    %c0_207 = arith.constant 0 : index
    %c0_208 = arith.constant 0 : index
    %428 = vector.load %arg7[%c0_207, %c0_208] : memref<64x32xf32, #tpu.memory_space<vmem>>, vector<64x32xf32>
    %cst_209 = arith.constant dense<0.000000e+00> : vector<1x32xf32>
    %429 = tpu.matmul %427, %428, %cst_209 {dimension_numbers = #tpu.dot_dimension_numbers<[1], [0], [0], [1], [0, 0, 1, 1], [], []>} : vector<1x64xf32>, vector<64x32xf32>, vector<1x32xf32> -> vector<1x32xf32>
    %c0_210 = arith.constant 0 : index
    %c0_211 = arith.constant 0 : index
    %430 = vector.load %arg8[%c0_210, %c0_211] : memref<1x32xf32, #tpu.memory_space<vmem>>, vector<1x32xf32>
    %431 = arith.addf %429, %430 : vector<1x32xf32>
    %cst_212 = arith.constant 0.000000e+00 : f32
    %432 = vector.broadcast %cst_212 : f32 to vector<1x32xf32>
    %433 = arith.maximumf %431, %432 : vector<1x32xf32>
    %c0_213 = arith.constant 0 : index
    %c0_214 = arith.constant 0 : index
    %434 = vector.load %arg9[%c0_213, %c0_214] : memref<32x128xf32, #tpu.memory_space<vmem>>, vector<32x128xf32>
    %cst_215 = arith.constant dense<0.000000e+00> : vector<1x128xf32>
    %435 = tpu.matmul %433, %434, %cst_215 {dimension_numbers = #tpu.dot_dimension_numbers<[1], [0], [0], [1], [0, 0, 1, 1], [], []>} : vector<1x32xf32>, vector<32x128xf32>, vector<1x128xf32> -> vector<1x128xf32>
    %c0_216 = arith.constant 0 : index
    %c0_217 = arith.constant 0 : index
    %436 = vector.load %arg10[%c0_216, %c0_217] : memref<1x128xf32, #tpu.memory_space<vmem>>, vector<1x128xf32>
    %437 = arith.addf %435, %436 : vector<1x128xf32>
    %c0_218 = arith.constant 0 : index
    %c0_219 = arith.constant 0 : index
    %438 = vector.load %arg11[%c0_218, %c0_219] : memref<32x128xf32, #tpu.memory_space<vmem>>, vector<32x128xf32>
    %cst_220 = arith.constant dense<0.000000e+00> : vector<1x128xf32>
    %439 = tpu.matmul %386, %438, %cst_220 {dimension_numbers = #tpu.dot_dimension_numbers<[1], [0], [0], [1], [0, 0, 1, 1], [], []>} : vector<1x32xf32>, vector<32x128xf32>, vector<1x128xf32> -> vector<1x128xf32>
    %c0_221 = arith.constant 0 : index
    %c0_222 = arith.constant 0 : index
    %440 = vector.load %arg12[%c0_221, %c0_222] : memref<1x128xf32, #tpu.memory_space<vmem>>, vector<1x128xf32>
    %441 = arith.addf %439, %440 : vector<1x128xf32>
    %442 = vector.extract_strided_slice %437 {offsets = [0, 0], sizes = [1, 32], strides = [1, 1]} : vector<1x128xf32> to vector<1x32xf32>
    %443 = vector.extract_strided_slice %441 {offsets = [0, 0], sizes = [1, 32], strides = [1, 1]} : vector<1x128xf32> to vector<1x32xf32>
    %444 = arith.addf %442, %443 : vector<1x32xf32>
    %445 = arith.negf %444 : vector<1x32xf32>
    %446 = math.exp %445 : vector<1x32xf32>
    %cst_223 = arith.constant 1.000000e+00 : f32
    %447 = vector.broadcast %cst_223 : f32 to vector<1x32xf32>
    %448 = arith.addf %447, %446 : vector<1x32xf32>
    %449 = arith.divf %447, %448 : vector<1x32xf32>
    %450 = vector.extract_strided_slice %437 {offsets = [0, 32], sizes = [1, 32], strides = [1, 1]} : vector<1x128xf32> to vector<1x32xf32>
    %451 = vector.extract_strided_slice %441 {offsets = [0, 32], sizes = [1, 32], strides = [1, 1]} : vector<1x128xf32> to vector<1x32xf32>
    %452 = arith.addf %450, %451 : vector<1x32xf32>
    %453 = arith.negf %452 : vector<1x32xf32>
    %454 = math.exp %453 : vector<1x32xf32>
    %cst_224 = arith.constant 1.000000e+00 : f32
    %455 = vector.broadcast %cst_224 : f32 to vector<1x32xf32>
    %456 = arith.addf %455, %454 : vector<1x32xf32>
    %457 = arith.divf %455, %456 : vector<1x32xf32>
    %458 = vector.extract_strided_slice %437 {offsets = [0, 64], sizes = [1, 32], strides = [1, 1]} : vector<1x128xf32> to vector<1x32xf32>
    %459 = vector.extract_strided_slice %441 {offsets = [0, 64], sizes = [1, 32], strides = [1, 1]} : vector<1x128xf32> to vector<1x32xf32>
    %460 = arith.mulf %449, %459 : vector<1x32xf32>
    %461 = arith.addf %458, %460 : vector<1x32xf32>
    %462 = math.tanh %461 : vector<1x32xf32>
    %cst_225 = arith.constant 1.000000e+00 : f32
    %463 = vector.broadcast %cst_225 : f32 to vector<1x32xf32>
    %464 = arith.subf %463, %457 : vector<1x32xf32>
    %465 = arith.mulf %464, %462 : vector<1x32xf32>
    %466 = arith.mulf %457, %386 : vector<1x32xf32>
    %467 = arith.addf %465, %466 : vector<1x32xf32>
    %c0_226 = arith.constant 0 : index
    %c0_227 = arith.constant 0 : index
    %468 = vector.load %arg13[%c0_226, %c0_227] : memref<32x128xf32, #tpu.memory_space<vmem>>, vector<32x128xf32>
    %cst_228 = arith.constant dense<0.000000e+00> : vector<1x128xf32>
    %469 = tpu.matmul %467, %468, %cst_228 {dimension_numbers = #tpu.dot_dimension_numbers<[1], [0], [0], [1], [0, 0, 1, 1], [], []>} : vector<1x32xf32>, vector<32x128xf32>, vector<1x128xf32> -> vector<1x128xf32>
    %c0_229 = arith.constant 0 : index
    %c0_230 = arith.constant 0 : index
    %470 = vector.load %arg14[%c0_229, %c0_230] : memref<1x128xf32, #tpu.memory_space<vmem>>, vector<1x128xf32>
    %471 = arith.addf %469, %470 : vector<1x128xf32>
    %cst_231 = arith.constant dense<0xFF800000> : vector<1xf32>
    %472 = vector.multi_reduction <maximumf>, %471, %cst_231 [1] : vector<1x128xf32> to vector<1xf32>
    %473 = vector.shape_cast %472 : vector<1xf32> to vector<1x1xf32>
    %474 = vector.broadcast %473 : vector<1x1xf32> to vector<1x128xf32>
    %475 = arith.subf %471, %474 : vector<1x128xf32>
    %476 = math.exp %475 : vector<1x128xf32>
    %cst_232 = arith.constant dense<0.000000e+00> : vector<1xf32>
    %477 = vector.multi_reduction <add>, %476, %cst_232 [1] : vector<1x128xf32> to vector<1xf32>
    %478 = vector.shape_cast %477 : vector<1xf32> to vector<1x1xf32>
    %479 = math.log %478 : vector<1x1xf32>
    %480 = arith.addf %479, %473 : vector<1x1xf32>
    %481 = vector.broadcast %480 : vector<1x1xf32> to vector<1x128xf32>
    %482 = arith.subf %471, %481 : vector<1x128xf32>
    %483 = tpu.concatenate %467, %0 in 1 : vector<1x32xf32>, vector<1x96xf32> -> vector<1x128xf32>
    %484 = tpu.concatenate %482, %424, %483 in 0 : vector<1x128xf32>, vector<1x128xf32>, vector<1x128xf32> -> vector<3x128xf32>
    %485 = vector.shape_cast %484 : vector<3x128xf32> to vector<1x3x128xf32>
    %486 = arith.index_cast %c5_i32 : i32 to index
    %c0_233 = arith.constant 0 : index
    %c0_234 = arith.constant 0 : index
    %487 = vector.load %arg15[%486, %c0_233, %c0_234] : memref<8x3x128xf32, #tpu.memory_space<vmem>>, vector<1x3x128xf32>
    tpu.vector_store %arg15[%486, %c0_233, %c0_234], %485 {strides = array<i32>} : memref<8x3x128xf32, #tpu.memory_space<vmem>>, vector<1x3x128xf32>,
    %c6_i32 = arith.constant 6 : i32
    %488 = arith.index_cast %c6_i32 : i32 to index
    %489 = memref.load %arg1[%488] : memref<8xi32, #tpu.memory_space<smem>>
    %490 = arith.index_cast %489 : i32 to index
    %c0_235 = arith.constant 0 : index
    %491 = vector.load %arg2[%490, %c0_235] : memref<64x32xf32, #tpu.memory_space<vmem>>, vector<1x32xf32>
    %492 = tpu.concatenate %491, %467 in 1 : vector<1x32xf32>, vector<1x32xf32> -> vector<1x64xf32>
    %c0_236 = arith.constant 0 : index
    %c0_237 = arith.constant 0 : index
    %493 = vector.load %arg5[%c0_236, %c0_237] : memref<64x128xf32, #tpu.memory_space<vmem>>, vector<64x128xf32>
    %cst_238 = arith.constant dense<0.000000e+00> : vector<1x128xf32>
    %494 = tpu.matmul %492, %493, %cst_238 {dimension_numbers = #tpu.dot_dimension_numbers<[1], [0], [0], [1], [0, 0, 1, 1], [], []>} : vector<1x64xf32>, vector<64x128xf32>, vector<1x128xf32> -> vector<1x128xf32>
    %c0_239 = arith.constant 0 : index
    %c0_240 = arith.constant 0 : index
    %495 = vector.load %arg6[%c0_239, %c0_240] : memref<1x128xf32, #tpu.memory_space<vmem>>, vector<1x128xf32>
    %496 = arith.addf %494, %495 : vector<1x128xf32>
    %cst_241 = arith.constant dense<0xFF800000> : vector<1xf32>
    %497 = vector.multi_reduction <maximumf>, %496, %cst_241 [1] : vector<1x128xf32> to vector<1xf32>
    %498 = vector.shape_cast %497 : vector<1xf32> to vector<1x1xf32>
    %499 = vector.broadcast %498 : vector<1x1xf32> to vector<1x128xf32>
    %500 = arith.subf %496, %499 : vector<1x128xf32>
    %501 = math.exp %500 : vector<1x128xf32>
    %cst_242 = arith.constant dense<0.000000e+00> : vector<1xf32>
    %502 = vector.multi_reduction <add>, %501, %cst_242 [1] : vector<1x128xf32> to vector<1xf32>
    %503 = vector.shape_cast %502 : vector<1xf32> to vector<1x1xf32>
    %504 = vector.broadcast %503 : vector<1x1xf32> to vector<1x128xf32>
    %505 = arith.divf %501, %504 : vector<1x128xf32>
    %c0_243 = arith.constant 0 : index
    %c0_244 = arith.constant 0 : index
    %506 = vector.load %arg3[%c0_243, %c0_244] : memref<128x32xf32, #tpu.memory_space<vmem>>, vector<128x32xf32>
    %cst_245 = arith.constant dense<0.000000e+00> : vector<1x32xf32>
    %507 = tpu.matmul %505, %506, %cst_245 {dimension_numbers = #tpu.dot_dimension_numbers<[1], [0], [0], [1], [0, 0, 1, 1], [], []>} : vector<1x128xf32>, vector<128x32xf32>, vector<1x32xf32> -> vector<1x32xf32>
    %508 = tpu.concatenate %491, %507 in 1 : vector<1x32xf32>, vector<1x32xf32> -> vector<1x64xf32>
    %c0_246 = arith.constant 0 : index
    %c0_247 = arith.constant 0 : index
    %509 = vector.load %arg7[%c0_246, %c0_247] : memref<64x32xf32, #tpu.memory_space<vmem>>, vector<64x32xf32>
    %cst_248 = arith.constant dense<0.000000e+00> : vector<1x32xf32>
    %510 = tpu.matmul %508, %509, %cst_248 {dimension_numbers = #tpu.dot_dimension_numbers<[1], [0], [0], [1], [0, 0, 1, 1], [], []>} : vector<1x64xf32>, vector<64x32xf32>, vector<1x32xf32> -> vector<1x32xf32>
    %c0_249 = arith.constant 0 : index
    %c0_250 = arith.constant 0 : index
    %511 = vector.load %arg8[%c0_249, %c0_250] : memref<1x32xf32, #tpu.memory_space<vmem>>, vector<1x32xf32>
    %512 = arith.addf %510, %511 : vector<1x32xf32>
    %cst_251 = arith.constant 0.000000e+00 : f32
    %513 = vector.broadcast %cst_251 : f32 to vector<1x32xf32>
    %514 = arith.maximumf %512, %513 : vector<1x32xf32>
    %c0_252 = arith.constant 0 : index
    %c0_253 = arith.constant 0 : index
    %515 = vector.load %arg9[%c0_252, %c0_253] : memref<32x128xf32, #tpu.memory_space<vmem>>, vector<32x128xf32>
    %cst_254 = arith.constant dense<0.000000e+00> : vector<1x128xf32>
    %516 = tpu.matmul %514, %515, %cst_254 {dimension_numbers = #tpu.dot_dimension_numbers<[1], [0], [0], [1], [0, 0, 1, 1], [], []>} : vector<1x32xf32>, vector<32x128xf32>, vector<1x128xf32> -> vector<1x128xf32>
    %c0_255 = arith.constant 0 : index
    %c0_256 = arith.constant 0 : index
    %517 = vector.load %arg10[%c0_255, %c0_256] : memref<1x128xf32, #tpu.memory_space<vmem>>, vector<1x128xf32>
    %518 = arith.addf %516, %517 : vector<1x128xf32>
    %c0_257 = arith.constant 0 : index
    %c0_258 = arith.constant 0 : index
    %519 = vector.load %arg11[%c0_257, %c0_258] : memref<32x128xf32, #tpu.memory_space<vmem>>, vector<32x128xf32>
    %cst_259 = arith.constant dense<0.000000e+00> : vector<1x128xf32>
    %520 = tpu.matmul %467, %519, %cst_259 {dimension_numbers = #tpu.dot_dimension_numbers<[1], [0], [0], [1], [0, 0, 1, 1], [], []>} : vector<1x32xf32>, vector<32x128xf32>, vector<1x128xf32> -> vector<1x128xf32>
    %c0_260 = arith.constant 0 : index
    %c0_261 = arith.constant 0 : index
    %521 = vector.load %arg12[%c0_260, %c0_261] : memref<1x128xf32, #tpu.memory_space<vmem>>, vector<1x128xf32>
    %522 = arith.addf %520, %521 : vector<1x128xf32>
    %523 = vector.extract_strided_slice %518 {offsets = [0, 0], sizes = [1, 32], strides = [1, 1]} : vector<1x128xf32> to vector<1x32xf32>
    %524 = vector.extract_strided_slice %522 {offsets = [0, 0], sizes = [1, 32], strides = [1, 1]} : vector<1x128xf32> to vector<1x32xf32>
    %525 = arith.addf %523, %524 : vector<1x32xf32>
    %526 = arith.negf %525 : vector<1x32xf32>
    %527 = math.exp %526 : vector<1x32xf32>
    %cst_262 = arith.constant 1.000000e+00 : f32
    %528 = vector.broadcast %cst_262 : f32 to vector<1x32xf32>
    %529 = arith.addf %528, %527 : vector<1x32xf32>
    %530 = arith.divf %528, %529 : vector<1x32xf32>
    %531 = vector.extract_strided_slice %518 {offsets = [0, 32], sizes = [1, 32], strides = [1, 1]} : vector<1x128xf32> to vector<1x32xf32>
    %532 = vector.extract_strided_slice %522 {offsets = [0, 32], sizes = [1, 32], strides = [1, 1]} : vector<1x128xf32> to vector<1x32xf32>
    %533 = arith.addf %531, %532 : vector<1x32xf32>
    %534 = arith.negf %533 : vector<1x32xf32>
    %535 = math.exp %534 : vector<1x32xf32>
    %cst_263 = arith.constant 1.000000e+00 : f32
    %536 = vector.broadcast %cst_263 : f32 to vector<1x32xf32>
    %537 = arith.addf %536, %535 : vector<1x32xf32>
    %538 = arith.divf %536, %537 : vector<1x32xf32>
    %539 = vector.extract_strided_slice %518 {offsets = [0, 64], sizes = [1, 32], strides = [1, 1]} : vector<1x128xf32> to vector<1x32xf32>
    %540 = vector.extract_strided_slice %522 {offsets = [0, 64], sizes = [1, 32], strides = [1, 1]} : vector<1x128xf32> to vector<1x32xf32>
    %541 = arith.mulf %530, %540 : vector<1x32xf32>
    %542 = arith.addf %539, %541 : vector<1x32xf32>
    %543 = math.tanh %542 : vector<1x32xf32>
    %cst_264 = arith.constant 1.000000e+00 : f32
    %544 = vector.broadcast %cst_264 : f32 to vector<1x32xf32>
    %545 = arith.subf %544, %538 : vector<1x32xf32>
    %546 = arith.mulf %545, %543 : vector<1x32xf32>
    %547 = arith.mulf %538, %467 : vector<1x32xf32>
    %548 = arith.addf %546, %547 : vector<1x32xf32>
    %c0_265 = arith.constant 0 : index
    %c0_266 = arith.constant 0 : index
    %549 = vector.load %arg13[%c0_265, %c0_266] : memref<32x128xf32, #tpu.memory_space<vmem>>, vector<32x128xf32>
    %cst_267 = arith.constant dense<0.000000e+00> : vector<1x128xf32>
    %550 = tpu.matmul %548, %549, %cst_267 {dimension_numbers = #tpu.dot_dimension_numbers<[1], [0], [0], [1], [0, 0, 1, 1], [], []>} : vector<1x32xf32>, vector<32x128xf32>, vector<1x128xf32> -> vector<1x128xf32>
    %c0_268 = arith.constant 0 : index
    %c0_269 = arith.constant 0 : index
    %551 = vector.load %arg14[%c0_268, %c0_269] : memref<1x128xf32, #tpu.memory_space<vmem>>, vector<1x128xf32>
    %552 = arith.addf %550, %551 : vector<1x128xf32>
    %cst_270 = arith.constant dense<0xFF800000> : vector<1xf32>
    %553 = vector.multi_reduction <maximumf>, %552, %cst_270 [1] : vector<1x128xf32> to vector<1xf32>
    %554 = vector.shape_cast %553 : vector<1xf32> to vector<1x1xf32>
    %555 = vector.broadcast %554 : vector<1x1xf32> to vector<1x128xf32>
    %556 = arith.subf %552, %555 : vector<1x128xf32>
    %557 = math.exp %556 : vector<1x128xf32>
    %cst_271 = arith.constant dense<0.000000e+00> : vector<1xf32>
    %558 = vector.multi_reduction <add>, %557, %cst_271 [1] : vector<1x128xf32> to vector<1xf32>
    %559 = vector.shape_cast %558 : vector<1xf32> to vector<1x1xf32>
    %560 = math.log %559 : vector<1x1xf32>
    %561 = arith.addf %560, %554 : vector<1x1xf32>
    %562 = vector.broadcast %561 : vector<1x1xf32> to vector<1x128xf32>
    %563 = arith.subf %552, %562 : vector<1x128xf32>
    %564 = tpu.concatenate %548, %0 in 1 : vector<1x32xf32>, vector<1x96xf32> -> vector<1x128xf32>
    %565 = tpu.concatenate %563, %505, %564 in 0 : vector<1x128xf32>, vector<1x128xf32>, vector<1x128xf32> -> vector<3x128xf32>
    %566 = vector.shape_cast %565 : vector<3x128xf32> to vector<1x3x128xf32>
    %567 = arith.index_cast %c6_i32 : i32 to index
    %c0_272 = arith.constant 0 : index
    %c0_273 = arith.constant 0 : index
    %568 = vector.load %arg15[%567, %c0_272, %c0_273] : memref<8x3x128xf32, #tpu.memory_space<vmem>>, vector<1x3x128xf32>
    tpu.vector_store %arg15[%567, %c0_272, %c0_273], %566 {strides = array<i32>} : memref<8x3x128xf32, #tpu.memory_space<vmem>>, vector<1x3x128xf32>,
    %c7_i32 = arith.constant 7 : i32
    %569 = arith.index_cast %c7_i32 : i32 to index
    %570 = memref.load %arg1[%569] : memref<8xi32, #tpu.memory_space<smem>>
    %571 = arith.index_cast %570 : i32 to index
    %c0_274 = arith.constant 0 : index
    %572 = vector.load %arg2[%571, %c0_274] : memref<64x32xf32, #tpu.memory_space<vmem>>, vector<1x32xf32>
    %573 = tpu.concatenate %572, %548 in 1 : vector<1x32xf32>, vector<1x32xf32> -> vector<1x64xf32>
    %c0_275 = arith.constant 0 : index
    %c0_276 = arith.constant 0 : index
    %574 = vector.load %arg5[%c0_275, %c0_276] : memref<64x128xf32, #tpu.memory_space<vmem>>, vector<64x128xf32>
    %cst_277 = arith.constant dense<0.000000e+00> : vector<1x128xf32>
    %575 = tpu.matmul %573, %574, %cst_277 {dimension_numbers = #tpu.dot_dimension_numbers<[1], [0], [0], [1], [0, 0, 1, 1], [], []>} : vector<1x64xf32>, vector<64x128xf32>, vector<1x128xf32> -> vector<1x128xf32>
    %c0_278 = arith.constant 0 : index
    %c0_279 = arith.constant 0 : index
    %576 = vector.load %arg6[%c0_278, %c0_279] : memref<1x128xf32, #tpu.memory_space<vmem>>, vector<1x128xf32>
    %577 = arith.addf %575, %576 : vector<1x128xf32>
    %cst_280 = arith.constant dense<0xFF800000> : vector<1xf32>
    %578 = vector.multi_reduction <maximumf>, %577, %cst_280 [1] : vector<1x128xf32> to vector<1xf32>
    %579 = vector.shape_cast %578 : vector<1xf32> to vector<1x1xf32>
    %580 = vector.broadcast %579 : vector<1x1xf32> to vector<1x128xf32>
    %581 = arith.subf %577, %580 : vector<1x128xf32>
    %582 = math.exp %581 : vector<1x128xf32>
    %cst_281 = arith.constant dense<0.000000e+00> : vector<1xf32>
    %583 = vector.multi_reduction <add>, %582, %cst_281 [1] : vector<1x128xf32> to vector<1xf32>
    %584 = vector.shape_cast %583 : vector<1xf32> to vector<1x1xf32>
    %585 = vector.broadcast %584 : vector<1x1xf32> to vector<1x128xf32>
    %586 = arith.divf %582, %585 : vector<1x128xf32>
    %c0_282 = arith.constant 0 : index
    %c0_283 = arith.constant 0 : index
    %587 = vector.load %arg3[%c0_282, %c0_283] : memref<128x32xf32, #tpu.memory_space<vmem>>, vector<128x32xf32>
    %cst_284 = arith.constant dense<0.000000e+00> : vector<1x32xf32>
    %588 = tpu.matmul %586, %587, %cst_284 {dimension_numbers = #tpu.dot_dimension_numbers<[1], [0], [0], [1], [0, 0, 1, 1], [], []>} : vector<1x128xf32>, vector<128x32xf32>, vector<1x32xf32> -> vector<1x32xf32>
    %589 = tpu.concatenate %572, %588 in 1 : vector<1x32xf32>, vector<1x32xf32> -> vector<1x64xf32>
    %c0_285 = arith.constant 0 : index
    %c0_286 = arith.constant 0 : index
    %590 = vector.load %arg7[%c0_285, %c0_286] : memref<64x32xf32, #tpu.memory_space<vmem>>, vector<64x32xf32>
    %cst_287 = arith.constant dense<0.000000e+00> : vector<1x32xf32>
    %591 = tpu.matmul %589, %590, %cst_287 {dimension_numbers = #tpu.dot_dimension_numbers<[1], [0], [0], [1], [0, 0, 1, 1], [], []>} : vector<1x64xf32>, vector<64x32xf32>, vector<1x32xf32> -> vector<1x32xf32>
    %c0_288 = arith.constant 0 : index
    %c0_289 = arith.constant 0 : index
    %592 = vector.load %arg8[%c0_288, %c0_289] : memref<1x32xf32, #tpu.memory_space<vmem>>, vector<1x32xf32>
    %593 = arith.addf %591, %592 : vector<1x32xf32>
    %cst_290 = arith.constant 0.000000e+00 : f32
    %594 = vector.broadcast %cst_290 : f32 to vector<1x32xf32>
    %595 = arith.maximumf %593, %594 : vector<1x32xf32>
    %c0_291 = arith.constant 0 : index
    %c0_292 = arith.constant 0 : index
    %596 = vector.load %arg9[%c0_291, %c0_292] : memref<32x128xf32, #tpu.memory_space<vmem>>, vector<32x128xf32>
    %cst_293 = arith.constant dense<0.000000e+00> : vector<1x128xf32>
    %597 = tpu.matmul %595, %596, %cst_293 {dimension_numbers = #tpu.dot_dimension_numbers<[1], [0], [0], [1], [0, 0, 1, 1], [], []>} : vector<1x32xf32>, vector<32x128xf32>, vector<1x128xf32> -> vector<1x128xf32>
    %c0_294 = arith.constant 0 : index
    %c0_295 = arith.constant 0 : index
    %598 = vector.load %arg10[%c0_294, %c0_295] : memref<1x128xf32, #tpu.memory_space<vmem>>, vector<1x128xf32>
    %599 = arith.addf %597, %598 : vector<1x128xf32>
    %c0_296 = arith.constant 0 : index
    %c0_297 = arith.constant 0 : index
    %600 = vector.load %arg11[%c0_296, %c0_297] : memref<32x128xf32, #tpu.memory_space<vmem>>, vector<32x128xf32>
    %cst_298 = arith.constant dense<0.000000e+00> : vector<1x128xf32>
    %601 = tpu.matmul %548, %600, %cst_298 {dimension_numbers = #tpu.dot_dimension_numbers<[1], [0], [0], [1], [0, 0, 1, 1], [], []>} : vector<1x32xf32>, vector<32x128xf32>, vector<1x128xf32> -> vector<1x128xf32>
    %c0_299 = arith.constant 0 : index
    %c0_300 = arith.constant 0 : index
    %602 = vector.load %arg12[%c0_299, %c0_300] : memref<1x128xf32, #tpu.memory_space<vmem>>, vector<1x128xf32>
    %603 = arith.addf %601, %602 : vector<1x128xf32>
    %604 = vector.extract_strided_slice %599 {offsets = [0, 0], sizes = [1, 32], strides = [1, 1]} : vector<1x128xf32> to vector<1x32xf32>
    %605 = vector.extract_strided_slice %603 {offsets = [0, 0], sizes = [1, 32], strides = [1, 1]} : vector<1x128xf32> to vector<1x32xf32>
    %606 = arith.addf %604, %605 : vector<1x32xf32>
    %607 = arith.negf %606 : vector<1x32xf32>
    %608 = math.exp %607 : vector<1x32xf32>
    %cst_301 = arith.constant 1.000000e+00 : f32
    %609 = vector.broadcast %cst_301 : f32 to vector<1x32xf32>
    %610 = arith.addf %609, %608 : vector<1x32xf32>
    %611 = arith.divf %609, %610 : vector<1x32xf32>
    %612 = vector.extract_strided_slice %599 {offsets = [0, 32], sizes = [1, 32], strides = [1, 1]} : vector<1x128xf32> to vector<1x32xf32>
    %613 = vector.extract_strided_slice %603 {offsets = [0, 32], sizes = [1, 32], strides = [1, 1]} : vector<1x128xf32> to vector<1x32xf32>
    %614 = arith.addf %612, %613 : vector<1x32xf32>
    %615 = arith.negf %614 : vector<1x32xf32>
    %616 = math.exp %615 : vector<1x32xf32>
    %cst_302 = arith.constant 1.000000e+00 : f32
    %617 = vector.broadcast %cst_302 : f32 to vector<1x32xf32>
    %618 = arith.addf %617, %616 : vector<1x32xf32>
    %619 = arith.divf %617, %618 : vector<1x32xf32>
    %620 = vector.extract_strided_slice %599 {offsets = [0, 64], sizes = [1, 32], strides = [1, 1]} : vector<1x128xf32> to vector<1x32xf32>
    %621 = vector.extract_strided_slice %603 {offsets = [0, 64], sizes = [1, 32], strides = [1, 1]} : vector<1x128xf32> to vector<1x32xf32>
    %622 = arith.mulf %611, %621 : vector<1x32xf32>
    %623 = arith.addf %620, %622 : vector<1x32xf32>
    %624 = math.tanh %623 : vector<1x32xf32>
    %cst_303 = arith.constant 1.000000e+00 : f32
    %625 = vector.broadcast %cst_303 : f32 to vector<1x32xf32>
    %626 = arith.subf %625, %619 : vector<1x32xf32>
    %627 = arith.mulf %626, %624 : vector<1x32xf32>
    %628 = arith.mulf %619, %548 : vector<1x32xf32>
    %629 = arith.addf %627, %628 : vector<1x32xf32>
    %c0_304 = arith.constant 0 : index
    %c0_305 = arith.constant 0 : index
    %630 = vector.load %arg13[%c0_304, %c0_305] : memref<32x128xf32, #tpu.memory_space<vmem>>, vector<32x128xf32>
    %cst_306 = arith.constant dense<0.000000e+00> : vector<1x128xf32>
    %631 = tpu.matmul %629, %630, %cst_306 {dimension_numbers = #tpu.dot_dimension_numbers<[1], [0], [0], [1], [0, 0, 1, 1], [], []>} : vector<1x32xf32>, vector<32x128xf32>, vector<1x128xf32> -> vector<1x128xf32>
    %c0_307 = arith.constant 0 : index
    %c0_308 = arith.constant 0 : index
    %632 = vector.load %arg14[%c0_307, %c0_308] : memref<1x128xf32, #tpu.memory_space<vmem>>, vector<1x128xf32>
    %633 = arith.addf %631, %632 : vector<1x128xf32>
    %cst_309 = arith.constant dense<0xFF800000> : vector<1xf32>
    %634 = vector.multi_reduction <maximumf>, %633, %cst_309 [1] : vector<1x128xf32> to vector<1xf32>
    %635 = vector.shape_cast %634 : vector<1xf32> to vector<1x1xf32>
    %636 = vector.broadcast %635 : vector<1x1xf32> to vector<1x128xf32>
    %637 = arith.subf %633, %636 : vector<1x128xf32>
    %638 = math.exp %637 : vector<1x128xf32>
    %cst_310 = arith.constant dense<0.000000e+00> : vector<1xf32>
    %639 = vector.multi_reduction <add>, %638, %cst_310 [1] : vector<1x128xf32> to vector<1xf32>
    %640 = vector.shape_cast %639 : vector<1xf32> to vector<1x1xf32>
    %641 = math.log %640 : vector<1x1xf32>
    %642 = arith.addf %641, %635 : vector<1x1xf32>
    %643 = vector.broadcast %642 : vector<1x1xf32> to vector<1x128xf32>
    %644 = arith.subf %633, %643 : vector<1x128xf32>
    %645 = tpu.concatenate %629, %0 in 1 : vector<1x32xf32>, vector<1x96xf32> -> vector<1x128xf32>
    %646 = tpu.concatenate %644, %586, %645 in 0 : vector<1x128xf32>, vector<1x128xf32>, vector<1x128xf32> -> vector<3x128xf32>
    %647 = vector.shape_cast %646 : vector<3x128xf32> to vector<1x3x128xf32>
    %648 = arith.index_cast %c7_i32 : i32 to index
    %c0_311 = arith.constant 0 : index
    %c0_312 = arith.constant 0 : index
    %649 = vector.load %arg15[%648, %c0_311, %c0_312] : memref<8x3x128xf32, #tpu.memory_space<vmem>>, vector<1x3x128xf32>
    tpu.vector_store %arg15[%648, %c0_311, %c0_312], %647 {strides = array<i32>} : memref<8x3x128xf32, #tpu.memory_space<vmem>>, vector<1x3x128xf32>,
    %c8_i32 = arith.constant 8 : i32
    return
  }
  func.func @transform_0(%arg0: i32, %arg1: memref<8xi32, #tpu.memory_space<smem>>) -> (i32, i32) {
    %c0_i32 = arith.constant 0 : i32
    %c0_i32_0 = arith.constant 0 : i32
    %c0_i32_1 = arith.constant 0 : i32
    return %c0_i32, %c0_i32_0 : i32, i32
  }
  func.func @transform_1(%arg0: i32, %arg1: memref<8xi32, #tpu.memory_space<smem>>) -> (i32, i32) {
    %c0_i32 = arith.constant 0 : i32
    %c0_i32_0 = arith.constant 0 : i32
    %c0_i32_1 = arith.constant 0 : i32
    return %c0_i32, %c0_i32_0 : i32, i32
  }
  func.func @transform_2(%arg0: i32, %arg1: memref<8xi32, #tpu.memory_space<smem>>) -> (i32, i32) {
    %c0_i32 = arith.constant 0 : i32
    %c0_i32_0 = arith.constant 0 : i32
    %c0_i32_1 = arith.constant 0 : i32
    return %c0_i32, %c0_i32_0 : i32, i32
  }
  func.func @transform_3(%arg0: i32, %arg1: memref<8xi32, #tpu.memory_space<smem>>) -> (i32, i32) {
    %c0_i32 = arith.constant 0 : i32
    %c0_i32_0 = arith.constant 0 : i32
    %c0_i32_1 = arith.constant 0 : i32
    return %c0_i32, %c0_i32_0 : i32, i32
  }
  func.func @transform_4(%arg0: i32, %arg1: memref<8xi32, #tpu.memory_space<smem>>) -> (i32, i32) {
    %c0_i32 = arith.constant 0 : i32
    %c0_i32_0 = arith.constant 0 : i32
    %c0_i32_1 = arith.constant 0 : i32
    return %c0_i32, %c0_i32_0 : i32, i32
  }
  func.func @transform_5(%arg0: i32, %arg1: memref<8xi32, #tpu.memory_space<smem>>) -> (i32, i32) {
    %c0_i32 = arith.constant 0 : i32
    %c0_i32_0 = arith.constant 0 : i32
    %c0_i32_1 = arith.constant 0 : i32
    return %c0_i32, %c0_i32_0 : i32, i32
  }
  func.func @transform_6(%arg0: i32, %arg1: memref<8xi32, #tpu.memory_space<smem>>) -> (i32, i32) {
    %c0_i32 = arith.constant 0 : i32
    %c0_i32_0 = arith.constant 0 : i32
    %c0_i32_1 = arith.constant 0 : i32
    return %c0_i32, %c0_i32_0 : i32, i32
  }
  func.func @transform_7(%arg0: i32, %arg1: memref<8xi32, #tpu.memory_space<smem>>) -> (i32, i32) {
    %c0_i32 = arith.constant 0 : i32
    %c0_i32_0 = arith.constant 0 : i32
    %c0_i32_1 = arith.constant 0 : i32
    return %c0_i32, %c0_i32_0 : i32, i32
  }
  func.func @transform_8(%arg0: i32, %arg1: memref<8xi32, #tpu.memory_space<smem>>) -> (i32, i32) {
    %c0_i32 = arith.constant 0 : i32
    %c0_i32_0 = arith.constant 0 : i32
    %c0_i32_1 = arith.constant 0 : i32
    return %c0_i32, %c0_i32_0 : i32, i32
  }
  func.func @transform_9(%arg0: i32, %arg1: memref<8xi32, #tpu.memory_space<smem>>) -> (i32, i32) {
    %c0_i32 = arith.constant 0 : i32
    %c0_i32_0 = arith.constant 0 : i32
    %c0_i32_1 = arith.constant 0 : i32
    return %c0_i32, %c0_i32_0 : i32, i32
  }
  func.func @transform_10(%arg0: i32, %arg1: memref<8xi32, #tpu.memory_space<smem>>) -> (i32, i32) {
    %c0_i32 = arith.constant 0 : i32
    %c0_i32_0 = arith.constant 0 : i32
    %c0_i32_1 = arith.constant 0 : i32
    return %c0_i32, %c0_i32_0 : i32, i32
  }
  func.func @transform_11(%arg0: i32, %arg1: memref<8xi32, #tpu.memory_space<smem>>) -> (i32, i32) {
    %c0_i32 = arith.constant 0 : i32
    %c0_i32_0 = arith.constant 0 : i32
    %c0_i32_1 = arith.constant 0 : i32
    return %c0_i32, %c0_i32_0 : i32, i32
  }
  func.func @transform_12(%arg0: i32, %arg1: memref<8xi32, #tpu.memory_space<smem>>) -> (i32, i32) {
    %c0_i32 = arith.constant 0 : i32
    %c0_i32_0 = arith.constant 0 : i32
    %c0_i32_1 = arith.constant 0 : i32
    return %c0_i32, %c0_i32_0 : i32, i32
  }
  func.func @transform_13(%arg0: i32, %arg1: memref<8xi32, #tpu.memory_space<smem>>) -> (i32, i32, i32) {
    %c0_i32 = arith.constant 0 : i32
    %c0_i32_0 = arith.constant 0 : i32
    %c0_i32_1 = arith.constant 0 : i32
    %c0_i32_2 = arith.constant 0 : i32
    return %c0_i32, %c0_i32_0, %c0_i32_1 : i32, i32, i32
  }
}

</mosaic_0001>

<bundles_post_ra>
// kernel: attn_decoder_decode.1
= control target key start
LH: loop header
LB: loop body
LE: loop exit
PB: predicated region body
PF: predicated region fallthrough
CT: control target
= control target key end

     0   :  { %s8104_s0 = inlined_call_operand.vmem [shape: s32[8], index: 0, kind: input, shape index: {}]   ;;  %s8105_s1 = inlined_call_operand.vmem [shape: f32[64,32], index: 1, kind: input, shape index: {}]   ;;  %s8106_s2 = inlined_call_operand.vmem [shape: f32[128,32], index: 2, kind: input, shape index: {}]   ;;  %s8107_s3 = inlined_call_operand.vmem [shape: f32[1,32], index: 3, kind: input, shape index: {}]   ;;  %s8108_s4 = inlined_call_operand.vmem [shape: f32[64,128], index: 4, kind: input, shape index: {}]   ;;  %s8109_s5 = inlined_call_operand.vmem [shape: f32[1,128], index: 5, kind: input, shape index: {}]   ;;  %s8110_s6 = inlined_call_operand.vmem [shape: f32[64,32], index: 6, kind: input, shape index: {}]   ;;  %s8111_s7 = inlined_call_operand.vmem [shape: f32[1,32], index: 7, kind: input, shape index: {}]   ;;  %s8112_s8 = inlined_call_operand.vmem [shape: f32[32,128], index: 8, kind: input, shape index: {}]   ;;  %s8113_s9 = inlined_call_operand.vmem [shape: f32[1,128], index: 9, kind: input, shape index: {}]   ;;  %s8114_s10 = inlined_call_operand.vmem [shape: f32[32,128], index: 10, kind: input, shape index: {}]   ;;  %s8115_s11 = inlined_call_operand.vmem [shape: f32[1,128], index: 11, kind: input, shape index: {}]   ;;  %s8116_s12 = inlined_call_operand.vmem [shape: f32[32,128], index: 12, kind: input, shape index: {}]   ;;  %s8117_s13 = inlined_call_operand.vmem [shape: f32[1,128], index: 13, kind: input, shape index: {}]   ;;  %s8118_s14 = inlined_call_operand.vmem [shape: f32[8,3,128], index: 14, kind: output, shape index: {}]  }
   0x1   :  { %s19_s15 = sshll.u32 %s8104_s0, 4  ;;  %s20_s15 = int_to_ptr.vmem [resolvable:$true] %s19_s15 }
   0x2   :  { %s6474_s16 = scalar_lea.vmem %s20_s15, 16  ;;  %p6479_p1 = scmp.lt.s32.totalorder %s20_s15, %s20_s15 }
   0x3   :  { %p6475_p0 = scmp.ne.s32.totalorder %s20_s15, %s6474_s16  ;;  %p6480_p2 = scmp.lt.s32.totalorder %s6474_s16, %s6474_s16 }
   0x5   :  { %p6481_p3 = por %p6480_p2, %p6479_p1 }
   0x7   :  { %p6482_p4 = pnand %p6481_p3, %p6475_p0 }
   0x9   :  { %6485 = shalt.err (!%p6482_p4)  }
   0xa   :  { %s6488_s17 = smov [#allocation3]  }
   0xb   :  { %22 = dma.vmem_to_smem %s20_s15, 16, %s6488_s17, [#allocation2] }
   0xc   :  { %6486 = dma.done.wait [#allocation2], 16 }
   0xd   :  { %6487 = vsyncadd [#allocation2], 4294967280 }
   0xe   :  { %24 = sfence }
   0xf   :  { %v56_v0 = vlaneseq  ;;  %v65_v1 = vld [vmem:[%s8108_s4] sm:$0xff]  ;;  %v66_v2 = vld [vmem:[%s8108_s4 + $0x8] sm:$0xff]  ;;  %v6489_v3 = vmov 0.0|0.0   ;;  %v67_v5 = vld [vmem:[%s8108_s4 + $0x10] sm:$0xff]  ;;  %vm6490_vm0 = vmmov 0   ;;  %v6491_v10 = vmov 0.0  }
  0x10   :  { %5827 = vmatprep.subr.bf16.mxu0 %v6489_v3  ;;  %v6580_v4 = vpack.c.bf16 %v66_v2, %v65_v1  ;;  %v68_v6 = vld [vmem:[%s8108_s4 + $0x18] sm:$0xff]  ;;  %5839 = vmatprep.subr.bf16.mxu1 %v6489_v3  ;;  %v6592_v8 = vld [vmem:[%s8107_s3] sm:$0x1]  ;;  %v70_v13 = vld [vmem:[%s8108_s4 + $0x28] sm:$0xff]  ;;  %s6492_s3 = smov 32   ;;  %s52_s19 = sld [smem:[#allocation3]] }
  0x11   :  { %v57_v7 = vshrl.u32 %v56_v0, 7  ;;  %v6595_v9 = vpack.c.bf16 %v68_v6, %v67_v5  ;;  %4995 = vmatprep.mubr.msk.f32.mxu0 %vm6490_vm0, %v6491_v10  ;;  %v69_v12 = vld [vmem:[%s8108_s4 + $0x20] sm:$0xff]  ;;  %5030 = vmatprep.mubr.msk.f32.mxu1 %vm6490_vm0, %v6491_v10  ;;  %v71_v16 = vld [vmem:[%s8108_s4 + $0x30] sm:$0xff]  ;;  %v72_v17 = vld [vmem:[%s8108_s4 + $0x38] sm:$0xff]  ;;  %vm63_vm1 = vcmask 261120   ;;  %vm74_vm2 = vcmask 523264  }
  0x12   :  { %5829 = vmatpush3.bf16.msra.mxu0 %v6580_v4  ;;  %v6610_v15 = vpack.c.bf16 %v70_v13, %v69_v12  ;;  %v6621_v18 = vpack.c.bf16 %v72_v17, %v71_v16  ;;  %v73_v22 = vld [vmem:[%s8109_s5] sm:$0x1]  ;;  %vm148_vm3 = vcmask 1040384   ;;  %v161_v28 = vld [vmem:[%s8106_s2 + $0x8] sm:$0xff]  ;;  %v162_v29 = vld [vmem:[%s8106_s2 + $0x10] sm:$0xff]  ;;  %s6493_s22 = smov 64  }
  0x13   :  { %v58_v11 = vsub.s32 0, %v57_v7  ;;  %5830 = vmatprep.subr.bf16.mxu0 %v6489_v3  ;;  %v160_v27 = vld [vmem:[%s8106_s2] sm:$0xff]  ;;  %v163_v31 = vld [vmem:[%s8106_s2 + $0x18] sm:$0xff]  ;;  %v165_v34 = vld [vmem:[%s8106_s2 + $0x28] sm:$0xff]  ;;  %s4523_s20 = sld [smem:[#allocation3 + $0x1]]  ;;  %s4531_s16 = sld [smem:[#allocation3 + $0x2]] }
  0x14   :  { %v6652_v30 = vpack.c.bf16 %v161_v28, %v160_v27  ;;  %v6658_v32 = vpack.c.bf16 %v163_v31, %v162_v29  ;;  %v164_v33 = vld [vmem:[%s8106_s2 + $0x20] sm:$0xff]  ;;  %v166_v36 = vld [vmem:[%s8106_s2 + $0x30] sm:$0xff]  ;;  %v167_v37 = vld [vmem:[%s8106_s2 + $0x38] sm:$0xff]  ;;  %s4539_s30 = sld [smem:[#allocation3 + $0x3]]  ;;  %s4547_s24 = sld [smem:[#allocation3 + $0x4]]  ;;  %vm617_vm4 = vcmask 1041408  }
  0x15   :  { %v59_v14 = vrot.slane %v6592_v8, %v58_v11  ;;  %v6668_v35 = vpack.c.bf16 %v165_v34, %v164_v33  ;;  %v6678_v38 = vpack.c.bf16 %v167_v37, %v166_v36  ;;  %v168_v39 = vld [vmem:[%s8106_s2 + $0x40] sm:$0xff]  ;;  %v169_v40 = vld [vmem:[%s8106_s2 + $0x48] sm:$0xff]  ;;  %v170_v47 = vld [vmem:[%s8106_s2 + $0x50] sm:$0xff]  ;;  %s4555_s0 = sld [smem:[#allocation3 + $0x5]]  ;;  %s4563_s18 = sld [smem:[#allocation3 + $0x6]] }
  0x16   :  { %5832 = vmatpush3.bf16.msra.mxu0 %v6595_v9  ;;  %s53_s21 = scalar_lea.vmem %s8105_s1, %s52_s19  ;;  %5841 = vmatpush3.bf16.msra.mxu1 %v6652_v30  ;;  %v6688_v41 = vpack.c.bf16 %v169_v40, %v168_v39  ;;  %v171_v48 = vld [vmem:[%s8106_s2 + $0x58] sm:$0xff]  ;;  %v172_v50 = vld [vmem:[%s8106_s2 + $0x60] sm:$0xff]  ;;  %v173_v51 = vld [vmem:[%s8106_s2 + $0x68] sm:$0xff]  ;;  %s6494_s19 = smov 96  }
  0x17   :  { %60 = vrot.lane.b32.xlu0 %v59_v14, %s6492_s3  ;;  %5833 = vmatprep.subr.bf16.mxu0 %v6489_v3  ;;  %v6629_v19 = vld [vmem:[%s53_s21] sm:$0x1]  ;;  %v6700_v49 = vpack.c.bf16 %v171_v48, %v170_v47  ;;  %v6709_v52 = vpack.c.bf16 %v173_v51, %v172_v50  ;;  %v174_v53 = vld [vmem:[%s8106_s2 + $0x70] sm:$0xff]  ;;  %v175_v54 = vld [vmem:[%s8106_s2 + $0x78] sm:$0xff] }
  0x18   :  { %5842 = vmatprep.subr.bf16.mxu1 %v6489_v3  ;;  %v6719_v55 = vpack.c.bf16 %v175_v54, %v174_v53  ;;  %v251_v59 = vld [vmem:[%s8110_s6] sm:$0xff]  ;;  %v252_v60 = vld [vmem:[%s8110_s6 + $0x8] sm:$0xff]  ;;  %v253_v61 = vld [vmem:[%s8110_s6 + $0x10] sm:$0xff] }
  0x19   :  { %v6738_v62 = vpack.c.bf16 %v252_v60, %v251_v59  ;;  %v254_v63 = vld [vmem:[%s8110_s6 + $0x18] sm:$0xff]  ;;  %v255_v1 = vld [vmem:[%s8110_s6 + $0x20] sm:$0xff]  ;;  %v256_v2 = vld [vmem:[%s8110_s6 + $0x28] sm:$0xff]  ;;  %s621_s23 = scalar_lea.vmem %s8105_s1, %s4523_s20  ;;  %s1176_s20 = scalar_lea.vmem %s8105_s1, %s4531_s16 }
  0x1a   :  { %5835 = vmatpush3.bf16.msra.mxu0 %v6610_v15  ;;  %5844 = vmatpush3.bf16.msra.mxu1 %v6658_v32  ;;  %v6744_v0 = vpack.c.bf16 %v254_v63, %v253_v61  ;;  %v6754_v5 = vpack.c.bf16 %v256_v2, %v255_v1  ;;  %v257_v6 = vld [vmem:[%s8110_s6 + $0x30] sm:$0xff]  ;;  %v258_v7 = vld [vmem:[%s8110_s6 + $0x38] sm:$0xff]  ;;  %v412_v12 = vld [vmem:[%s8114_s10] sm:$0xff]  ;;  %s1731_s17 = scalar_lea.vmem %s8105_s1, %s4539_s30  ;;  %s2286_s27 = scalar_lea.vmem %s8105_s1, %s4547_s24 }
  0x1b   :  { %5836 = vmatprep.subr.bf16.mxu0 %v6489_v3  ;;  %5845 = vmatprep.subr.bf16.mxu1 %v6489_v3  ;;  %v6764_v11 = vpack.c.bf16 %v258_v7, %v257_v6  ;;  %v413_v13 = vld [vmem:[%s8114_s10 + $0x8] sm:$0xff]  ;;  %v414_v14 = vld [vmem:[%s8114_s10 + $0x10] sm:$0xff]  ;;  %v415_v17 = vld [vmem:[%s8114_s10 + $0x18] sm:$0xff]  ;;  %s2841_s24 = scalar_lea.vmem %s8105_s1, %s4555_s0  ;;  %s3396_s21 = scalar_lea.vmem %s8105_s1, %s4563_s18 }
  0x1c   :  { %v6778_v16 = vpack.c.bf16 %v413_v13, %v412_v12  ;;  %v336_v28 = vld [vmem:[%s8112_s8 + $0x10] sm:$0xff]  ;;  %v337_v29 = vld [vmem:[%s8112_s8 + $0x18] sm:$0xff]  ;;  %v259_v37 = vld [vmem:[%s8111_s7] sm:$0x1] }
  0x1d   :  { %v6823_v31 = vpack.c.bf16 %v337_v29, %v336_v28  ;;  %v515_v61 = vld [vmem:[%s8116_s12] sm:$0xff]  ;;  %v516_v63 = vld [vmem:[%s8116_s12 + $0x8] sm:$0xff]  ;;  %v517_v1 = vld [vmem:[%s8116_s12 + $0x10] sm:$0xff] }
  0x1e   :  { %5838 = vmatpush3.bf16.msra.mxu0 %v6621_v18  ;;  %5847 = vmatpush3.bf16.msra.mxu1 %v6668_v35  ;;  %v6850_v2 = vpack.c.bf16 %v516_v63, %v515_v61  ;;  %v518_v6 = vld [vmem:[%s8116_s12 + $0x18] sm:$0xff] }
  0x1f   :  { %5863 = vmatprep.subr.bf16.mxu0 %v6489_v3  ;;  %5848 = vmatprep.subr.bf16.mxu1 %v6489_v3  ;;  %v6856_v7 = vpack.c.bf16 %v518_v6, %v517_v1 }
  0x22   :  { %5850 = vmatpush3.bf16.msra.mxu1 %v6678_v38 }
  0x23   :  { %5851 = vmatprep.subr.bf16.mxu1 %v6489_v3 }
  0x26   :  { %5853 = vmatpush3.bf16.msra.mxu1 %v6688_v41 }
  0x27   :  { %5854 = vmatprep.subr.bf16.mxu1 %v6489_v3 }
  0x2a   :  { %5856 = vmatpush3.bf16.msra.mxu1 %v6700_v49 }
  0x2b   :  { %5857 = vmatprep.subr.bf16.mxu1 %v6489_v3 }
  0x2e   :  { %5859 = vmatpush3.bf16.msra.mxu1 %v6709_v52 }
  0x2f   :  { %5860 = vmatprep.subr.bf16.mxu1 %v6489_v3 }
  0x32   :  { %5862 = vmatpush3.bf16.msra.mxu1 %v6719_v55 }
  0x33   :  { %5881 = vmatprep.subr.bf16.mxu1 %v6489_v3 }
  0x89   :  { %v6631_v20 = vpop.permute.xlu0 %60 }
  0x8a   :  { %v64_v21 = vsel %vm63_vm1, %v6629_v19, %v6631_v20 }
  0x8b   :  { %4996 = vmatmul.mubr.msk.f32.vlgmr.msra.gmra.mrb[0].mxu0 %vm74_vm2, %v64_v21  ;;  %v6784_v21 = vpack.c.bf16 %v415_v17, %v414_v14 }
  0x8c   :  { %5049 = vmatprep.mubr.msk.f32.mxu0 %vm6490_vm0, %v6491_v10  ;;  %5865 = vmatpush3.bf16.msra.mxu0 %v6738_v62 }
  0x8d   :  { %5866 = vmatprep.subr.bf16.mxu0 %v6489_v3 }
  0x90   :  { %5868 = vmatpush3.bf16.msra.mxu0 %v6744_v0 }
  0x91   :  { %5869 = vmatprep.subr.bf16.mxu0 %v6489_v3 }
  0x94   :  { %5871 = vmatpush3.bf16.msra.mxu0 %v6754_v5 }
  0x95   :  { %5872 = vmatprep.subr.bf16.mxu0 %v6489_v3 }
  0x98   :  { %5874 = vmatpush3.bf16.msra.mxu0 %v6764_v11 }
  0x99   :  { %5875 = vmatprep.subr.bf16.mxu0 %v6489_v3 }
 0x15e   :  { %v144_v23 = vpop.f32.mrb[0].mxu0 }
 0x15f   :  { %v145_v24 = vadd.f32 %v144_v23, %v73_v22  ;;  %v4997_v25 = vpop.f32.mrb[1].mxu0 }
 0x161   :  { %v149_v26 = vsel %vm148_vm3, %v145_v24, -inf }
 0x162   :  { %150 = vmax.xlane.f32.xlu0 %v149_v26 }
 0x1ef   :  { %v151_v42 = vpop.xlane.xlu0 %150 }
 0x1f0   :  { %v152_v43 = vsub.f32 %v145_v24, %v151_v42  ;;  %v335_v24 = vld [vmem:[%s8112_s8 + $0x8] sm:$0xff] }
 0x1f2   :  { %v153_v44 = vmul.f32 1.442695, %v152_v43 }
 0x1f4   :  { %6362 = vpow2.f32 %v153_v44  ;;  %v338_v44 = vld [vmem:[%s8113_s9] sm:$0x1] }
 0x1fe   :  { %v6363_v45 = vpop.eup %6362 }
 0x1ff   :  { %v155_v46 = vsel %vm148_vm3, %v6363_v45, 0.0 }
 0x200   :  { %156 = vadd.xlane.f32.xlu1 %v155_v46 }
 0x28d   :  { %v157_v56 = vpop.xlane.xlu1 %156 }
 0x28e   :  { %6364 = vrcp.f32 %v157_v56 }
 0x298   :  { %v6365_v57 = vpop.eup %6364 }
 0x299   :  { %v6724_v58 = vmul.f32 %v6365_v57, %v6363_v45 }
 0x29b   :  { %5031 = vmatmul.mubr.f32.vlgmr.msra.gmra.mrb[0].mxu1 %v6724_v58 }
 0x29c   :  { %5071 = vmatprep.mubr.msk.f32.mxu1 %vm6490_vm0, %v6491_v10  ;;  %5883 = vmatpush3.bf16.msra.mxu1 %v6778_v16 }
 0x29d   :  { %5884 = vmatprep.subr.bf16.mxu1 %v6489_v3 }
 0x2a0   :  { %5886 = vmatpush3.bf16.msra.mxu1 %v6784_v21 }
 0x2a1   :  { %5893 = vmatprep.subr.bf16.mxu1 %v6489_v3 }
 0x2a3   :  { %5072 = vmatmul.mubr.msk.f32.vlgmr.msra.gmra.mrb[2].mxu1 %vm63_vm1, %v6592_v8  ;;  %v334_v8 = vld [vmem:[%s8112_s8] sm:$0xff] }
 0x2a4   :  { %5895 = vmatpush3.bf16.msra.mxu1 %v6580_v4  ;;  %5101 = vmatprep.mubr.msk.f32.mxu1 %vm6490_vm0, %v6491_v10  ;;  %v6808_v25 = vpack.c.bf16 %v335_v24, %v334_v8 }
 0x2a5   :  { %5896 = vmatprep.subr.bf16.mxu1 %v6489_v3 }
 0x2a8   :  { %5898 = vmatpush3.bf16.msra.mxu1 %v6595_v9 }
 0x2a9   :  { %5899 = vmatprep.subr.bf16.mxu1 %v6489_v3 }
 0x2ac   :  { %5901 = vmatpush3.bf16.msra.mxu1 %v6610_v15 }
 0x2ad   :  { %5902 = vmatprep.subr.bf16.mxu1 %v6489_v3 }
 0x2b0   :  { %5904 = vmatpush3.bf16.msra.mxu1 %v6621_v18 }
 0x2b1   :  { %5929 = vmatprep.subr.bf16.mxu1 %v6489_v3 }
 0x36e   :  { %v242_v22 = vpop.f32.mrb[0].mxu1 }
 0x36f   :  { %247 = vrot.lane.b32.xlu1 %v242_v22, %s6492_s3  ;;  %v5032_v23 = vpop.f32.mrb[1].mxu1 }
 0x370   :  { %v6866_v23 = vld [vmem:[%s621_s23] sm:$0x1] }
 0x376   :  { %v485_v33 = vpop.f32.mrb[2].mxu1 }
 0x377   :  { %v5073_v36 = vpop.f32.mrb[3].mxu1 }
 0x3e1   :  { %v248_v26 = vpop.permute.xlu1 %247 }
 0x3e2   :  { %v250_v27 = vsel %vm63_vm1, %v6629_v19, %v248_v26  ;;  %v416_v19 = vld [vmem:[%s8115_s11] sm:$0x1] }
 0x3e3   :  { %5050 = vmatmul.mubr.msk.f32.vlgmr.msra.gmra.mrb[2].mxu0 %vm74_vm2, %v250_v27  ;;  %v486_v34 = vadd.f32 %v485_v33, %v416_v19  ;;  %v632_v26 = vld [vmem:[%s8109_s5] sm:$0x1] }
 0x3e4   :  { %5877 = vmatpush3.bf16.msra.mxu0 %v6808_v25  ;;  %5060 = vmatprep.mubr.msk.f32.mxu0 %vm6490_vm0, %v6491_v10 }
 0x3e5   :  { %5878 = vmatprep.subr.bf16.mxu0 %v6489_v3  ;;  %497 = vrot.lane.b32.xlu1 %v486_v34, %s6493_s22 }
 0x3e8   :  { %5880 = vmatpush3.bf16.msra.mxu0 %v6823_v31 }
 0x3e9   :  { %5887 = vmatprep.subr.bf16.mxu0 %v6489_v3 }
 0x457   :  { %v498_v54 = vpop.permute.xlu1 %497 }
 0x4b6   :  { %v329_v39 = vpop.f32.mrb[2].mxu0 }
 0x4b7   :  { %v330_v40 = vadd.f32 %v329_v39, %v259_v37  ;;  %v5051_v42 = vpop.f32.mrb[3].mxu0 }
 0x4b9   :  { %v333_v43 = vmax.f32 %v330_v40, 0.0 }
 0x4bb   :  { %5061 = vmatmul.mubr.msk.f32.vlgmr.msra.gmra.mrb[4].mxu0 %vm63_vm1, %v333_v43 }
 0x4bc   :  { %5082 = vmatprep.mubr.msk.f32.mxu0 %vm6490_vm0, %v6491_v10  ;;  %5889 = vmatpush3.bf16.msra.mxu0 %v6850_v2 }
 0x4bd   :  { %5890 = vmatprep.subr.bf16.mxu0 %v6489_v3 }
 0x4c0   :  { %5892 = vmatpush3.bf16.msra.mxu0 %v6856_v7 }
 0x4c1   :  { %5905 = vmatprep.subr.bf16.mxu0 %v6489_v3 }
 0x58e   :  { %v408_v45 = vpop.f32.mrb[4].mxu0 }
 0x58f   :  { %v409_v46 = vadd.f32 %v408_v45, %v338_v44  ;;  %v5062_v47 = vpop.f32.mrb[5].mxu0 }
 0x590   :  { %v973_v47 = vld [vmem:[%s8115_s11] sm:$0x1] }
 0x591   :  { %v489_v48 = vadd.f32 %v486_v34, %v409_v46 }
 0x593   :  { %v4521_v50 = vmul.f32 -1.442695, %v489_v48 }
 0x595   :  { %6366 = vpow2.f32 %v4521_v50 }
 0x59f   :  { %v6367_v51 = vpop.eup %6366 }
 0x5a0   :  { %v493_v53 = vadd.f32 1.0, %v6367_v51 }
 0x5a2   :  { %6368 = vrcp.f32 %v493_v53 }
 0x5ac   :  { %v6369_v56 = vpop.eup %6368 }
 0x5ad   :  { %v500_v57 = vmul.f32 %v6369_v56, %v498_v54  ;;  %v507_v13 = vsub.f32 1.0, %v6369_v56  ;;  %v513_v17 = vmul.f32 %v6369_v56, %v6631_v20 }
 0x5af   :  { %502 = vrot.lane.b32.xlu1 %v500_v57, %s6493_s22 }
 0x621   :  { %v503_v59 = vpop.permute.xlu1 %502 }
 0x622   :  { %v505_v60 = vadd.f32 %v503_v59, %v409_v46  ;;  %v895_v59 = vld [vmem:[%s8113_s9] sm:$0x1] }
 0x624   :  { %6370 = vtanh.f32 %v505_v60 }
 0x62e   :  { %v6371_v12 = vpop.eup %6370 }
 0x62f   :  { %509 = vrot.lane.b32.xlu1 %v6371_v12, %s6494_s19 }
 0x6a1   :  { %v510_v14 = vpop.permute.xlu1 %509 }
 0x6a2   :  { %v512_v22 = vmul.f32 %v510_v14, %v507_v13 }
 0x6a4   :  { %v6868_v8 = vadd.f32 %v513_v17, %v512_v22 }
 0x6a6   :  { %521 = vrot.lane.b32.xlu0 %v6868_v8, %s6494_s19  ;;  %v623_v24 = vsel %vm63_vm1, %v6866_v23, %v6868_v8 }
 0x6a7   :  { %5102 = vmatmul.mubr.msk.f32.vlgmr.msra.gmra.mrb[4].mxu1 %vm74_vm2, %v623_v24 }
 0x6a8   :  { %5931 = vmatpush3.bf16.msra.mxu1 %v6738_v62  ;;  %5155 = vmatprep.mubr.msk.f32.mxu1 %vm6490_vm0, %v6491_v10 }
 0x6a9   :  { %5932 = vmatprep.subr.bf16.mxu1 %v6489_v3 }
 0x6ac   :  { %5934 = vmatpush3.bf16.msra.mxu1 %v6744_v0 }
 0x6ad   :  { %5935 = vmatprep.subr.bf16.mxu1 %v6489_v3 }
 0x6b0   :  { %5937 = vmatpush3.bf16.msra.mxu1 %v6754_v5 }
 0x6b1   :  { %5938 = vmatprep.subr.bf16.mxu1 %v6489_v3 }
 0x6b4   :  { %5940 = vmatpush3.bf16.msra.mxu1 %v6764_v11 }
 0x6b5   :  { %5941 = vmatprep.subr.bf16.mxu1 %v6489_v3 }
 0x718   :  { %v6886_v20 = vpop.permute.xlu0 %521 }
 0x719   :  { %5083 = vmatmul.mubr.msk.f32.vlgmr.msra.gmra.mrb[6].mxu0 %vm63_vm1, %v6886_v20 }
 0x71a   :  { %5907 = vmatpush3.bf16.msra.mxu0 %v6652_v30  ;;  %5136 = vmatprep.mubr.msk.f32.mxu0 %vm6490_vm0, %v6491_v10 }
 0x71b   :  { %5908 = vmatprep.subr.bf16.mxu0 %v6489_v3 }
 0x71e   :  { %5910 = vmatpush3.bf16.msra.mxu0 %v6658_v32 }
 0x71f   :  { %5911 = vmatprep.subr.bf16.mxu0 %v6489_v3 }
 0x722   :  { %5913 = vmatpush3.bf16.msra.mxu0 %v6668_v35 }
 0x723   :  { %5914 = vmatprep.subr.bf16.mxu0 %v6489_v3 }
 0x726   :  { %5916 = vmatpush3.bf16.msra.mxu0 %v6678_v38 }
 0x727   :  { %5917 = vmatprep.subr.bf16.mxu0 %v6489_v3 }
 0x72a   :  { %5919 = vmatpush3.bf16.msra.mxu0 %v6688_v41 }
 0x72b   :  { %5920 = vmatprep.subr.bf16.mxu0 %v6489_v3 }
 0x72e   :  { %5922 = vmatpush3.bf16.msra.mxu0 %v6700_v49 }
 0x72f   :  { %5923 = vmatprep.subr.bf16.mxu0 %v6489_v3 }
 0x732   :  { %5925 = vmatpush3.bf16.msra.mxu0 %v6709_v52 }
 0x733   :  { %5926 = vmatprep.subr.bf16.mxu0 %v6489_v3 }
 0x736   :  { %5928 = vmatpush3.bf16.msra.mxu0 %v6719_v55 }
 0x737   :  { %5947 = vmatprep.subr.bf16.mxu0 %v6489_v3 }
 0x77a   :  { %v702_v27 = vpop.f32.mrb[4].mxu1 }
 0x77b   :  { %v703_v28 = vadd.f32 %v702_v27, %v632_v26  ;;  %v5103_v29 = vpop.f32.mrb[5].mxu1 }
 0x77d   :  { %v706_v19 = vsel %vm148_vm3, %v703_v28, -inf }
 0x77e   :  { %707 = vmax.xlane.f32.xlu1 %v706_v19 }
 0x7ec   :  { %v6912_v33 = vpop.f32.mrb[6].mxu0 }
 0x7ed   :  { %v5084_v34 = vpop.f32.mrb[7].mxu0 }
 0x7ee   :  { %v6969_v34 = vld [vmem:[%s1176_s20] sm:$0x1] }
 0x80b   :  { %v708_v36 = vpop.xlane.xlu1 %707 }
 0x80c   :  { %v709_v37 = vsub.f32 %v703_v28, %v708_v36 }
 0x80e   :  { %v710_v39 = vmul.f32 1.442695, %v709_v37 }
 0x810   :  { %6372 = vpow2.f32 %v710_v39 }
 0x81a   :  { %v6373_v40 = vpop.eup %6372 }
 0x81b   :  { %v712_v42 = vsel %vm148_vm3, %v6373_v40, 0.0 }
 0x81c   :  { %713 = vadd.xlane.f32.xlu0 %v712_v42 }
 0x8a9   :  { %v714_v43 = vpop.xlane.xlu0 %713 }
 0x8aa   :  { %6374 = vrcp.f32 %v714_v43 }
 0x8b4   :  { %v6375_v44 = vpop.eup %6374 }
 0x8b5   :  { %v6915_v45 = vmul.f32 %v6375_v44, %v6373_v40 }
 0x8b7   :  { %5137 = vmatmul.mubr.f32.vlgmr.msra.gmra.mrb[8].mxu0 %v6915_v45 }
 0x8b8   :  { %5949 = vmatpush3.bf16.msra.mxu0 %v6778_v16  ;;  %5177 = vmatprep.mubr.msk.f32.mxu0 %vm6490_vm0, %v6491_v10 }
 0x8b9   :  { %5950 = vmatprep.subr.bf16.mxu0 %v6489_v3 }
 0x8bc   :  { %5952 = vmatpush3.bf16.msra.mxu0 %v6784_v21 }
 0x8bd   :  { %5959 = vmatprep.subr.bf16.mxu0 %v6489_v3 }
 0x8bf   :  { %5178 = vmatmul.mubr.msk.f32.vlgmr.msra.gmra.mrb[10].mxu0 %vm63_vm1, %v6886_v20 }
 0x8c0   :  { %5961 = vmatpush3.bf16.msra.mxu0 %v6580_v4  ;;  %5207 = vmatprep.mubr.msk.f32.mxu0 %vm6490_vm0, %v6491_v10 }
 0x8c1   :  { %5962 = vmatprep.subr.bf16.mxu0 %v6489_v3 }
 0x8c4   :  { %5964 = vmatpush3.bf16.msra.mxu0 %v6595_v9 }
 0x8c5   :  { %5965 = vmatprep.subr.bf16.mxu0 %v6489_v3 }
 0x8c8   :  { %5967 = vmatpush3.bf16.msra.mxu0 %v6610_v15 }
 0x8c9   :  { %5968 = vmatprep.subr.bf16.mxu0 %v6489_v3 }
 0x8cc   :  { %5970 = vmatpush3.bf16.msra.mxu0 %v6621_v18  ;;  %v816_v18 = vld [vmem:[%s8111_s7] sm:$0x1] }
 0x8cd   :  { %5995 = vmatprep.subr.bf16.mxu0 %v6489_v3 }
 0x98a   :  { %v799_v46 = vpop.f32.mrb[8].mxu0 }
 0x98b   :  { %804 = vrot.lane.b32.xlu1 %v799_v46, %s6492_s3  ;;  %v5138_v4 = vpop.f32.mrb[9].mxu0 }
 0x992   :  { %v1040_v48 = vpop.f32.mrb[10].mxu0 }
 0x993   :  { %v1041_v9 = vadd.f32 %v1040_v48, %v973_v47  ;;  %v5179_v50 = vpop.f32.mrb[11].mxu0 }
 0x995   :  { %1052 = vrot.lane.b32.xlu1 %v1041_v9, %s6493_s22 }
 0x9fd   :  { %v805_v15 = vpop.permute.xlu1 %804 }
 0x9fe   :  { %v807_v51 = vsel %vm63_vm1, %v6866_v23, %v805_v15 }
 0x9ff   :  { %5156 = vmatmul.mubr.msk.f32.vlgmr.msra.gmra.mrb[6].mxu1 %vm74_vm2, %v807_v51 }
 0xa00   :  { %5943 = vmatpush3.bf16.msra.mxu1 %v6808_v25  ;;  %5166 = vmatprep.mubr.msk.f32.mxu1 %vm6490_vm0, %v6491_v10 }
 0xa01   :  { %5944 = vmatprep.subr.bf16.mxu1 %v6489_v3 }
 0xa04   :  { %5946 = vmatpush3.bf16.msra.mxu1 %v6823_v31 }
 0xa05   :  { %5953 = vmatprep.subr.bf16.mxu1 %v6489_v3 }
 0xa07   :  { %v1053_v17 = vpop.permute.xlu1 %1052 }
 0xad2   :  { %v886_v53 = vpop.f32.mrb[6].mxu1 }
 0xad3   :  { %v887_v54 = vadd.f32 %v886_v53, %v816_v18  ;;  %v5157_v56 = vpop.f32.mrb[7].mxu1 }
 0xad5   :  { %v890_v57 = vmax.f32 %v887_v54, 0.0 }
 0xad7   :  { %5167 = vmatmul.mubr.msk.f32.vlgmr.msra.gmra.mrb[8].mxu1 %vm63_vm1, %v890_v57 }
 0xad8   :  { %5955 = vmatpush3.bf16.msra.mxu1 %v6850_v2  ;;  %5188 = vmatprep.mubr.msk.f32.mxu1 %vm6490_vm0, %v6491_v10 }
 0xad9   :  { %5956 = vmatprep.subr.bf16.mxu1 %v6489_v3 }
 0xadc   :  { %5958 = vmatpush3.bf16.msra.mxu1 %v6856_v7 }
 0xadd   :  { %5971 = vmatprep.subr.bf16.mxu1 %v6489_v3 }
 0xbaa   :  { %v965_v60 = vpop.f32.mrb[8].mxu1 }
 0xbab   :  { %v966_v61 = vadd.f32 %v965_v60, %v895_v59  ;;  %v5168_v63 = vpop.f32.mrb[9].mxu1 }
 0xbad   :  { %v1044_v1 = vadd.f32 %v1041_v9, %v966_v61  ;;  %v1371_v9 = vld [vmem:[%s8111_s7] sm:$0x1] }
 0xbaf   :  { %v4528_v6 = vmul.f32 -1.442695, %v1044_v1  ;;  %v1735_v1 = vld [vmem:[%s8108_s4 + $0x8] sm:$0xff] }
 0xbb1   :  { %6376 = vpow2.f32 %v4528_v6  ;;  %v1736_v6 = vld [vmem:[%s8108_s4 + $0x10] sm:$0xff] }
 0xbbb   :  { %v6377_v12 = vpop.eup %6376 }
 0xbbc   :  { %v1048_v13 = vadd.f32 1.0, %v6377_v12 }
 0xbbe   :  { %6378 = vrcp.f32 %v1048_v13  ;;  %v1737_v13 = vld [vmem:[%s8108_s4 + $0x18] sm:$0xff] }
 0xbc8   :  { %v6379_v14 = vpop.eup %6378 }
 0xbc9   :  { %v1055_v22 = vmul.f32 %v6379_v14, %v1053_v17  ;;  %v1062_v27 = vsub.f32 1.0, %v6379_v14  ;;  %v1068_v29 = vmul.f32 %v6379_v14, %v6868_v8  ;;  %v7074_v14 = vpack.c.bf16 %v1737_v13, %v1736_v6  ;;  %v1738_v17 = vld [vmem:[%s8108_s4 + $0x20] sm:$0xff]  ;;  %v1842_v6 = vld [vmem:[%s8106_s2 + $0x78] sm:$0xff] }
 0xbcb   :  { %1057 = vrot.lane.b32.xlu0 %v1055_v22, %s6493_s22  ;;  %v1739_v22 = vld [vmem:[%s8108_s4 + $0x28] sm:$0xff] }
 0xc3d   :  { %v1058_v23 = vpop.permute.xlu0 %1057 }
 0xc3e   :  { %v1060_v24 = vadd.f32 %v1058_v23, %v966_v61  ;;  %v7084_v23 = vpack.c.bf16 %v1739_v22, %v1738_v17  ;;  %v2079_v22 = vld [vmem:[%s8114_s10] sm:$0xff] }
 0xc40   :  { %6380 = vtanh.f32 %v1060_v24 }
 0xc4a   :  { %v6381_v26 = vpop.eup %6380 }
 0xc4b   :  { %1064 = vrot.lane.b32.xlu1 %v6381_v26, %s6494_s19 }
 0xcbd   :  { %v1065_v28 = vpop.permute.xlu1 %1064 }
 0xcbe   :  { %v1067_v19 = vmul.f32 %v1065_v28, %v1062_v27  ;;  %v1740_v27 = vld [vmem:[%s8108_s4 + $0x30] sm:$0xff]  ;;  %v1741_v28 = vld [vmem:[%s8108_s4 + $0x38] sm:$0xff] }
 0xcc0   :  { %v6971_v36 = vadd.f32 %v1068_v29, %v1067_v19  ;;  %v7095_v29 = vpack.c.bf16 %v1741_v28, %v1740_v27 }
 0xcc2   :  { %1076 = vrot.lane.b32.xlu0 %v6971_v36, %s6494_s19  ;;  %v1178_v37 = vsel %vm63_vm1, %v6969_v34, %v6971_v36 }
 0xcc3   :  { %5208 = vmatmul.mubr.msk.f32.vlgmr.msra.gmra.mrb[12].mxu0 %vm74_vm2, %v1178_v37 }
 0xcc4   :  { %5997 = vmatpush3.bf16.msra.mxu0 %v6738_v62  ;;  %5261 = vmatprep.mubr.msk.f32.mxu0 %vm6490_vm0, %v6491_v10 }
 0xcc5   :  { %5998 = vmatprep.subr.bf16.mxu0 %v6489_v3 }
 0xcc8   :  { %6000 = vmatpush3.bf16.msra.mxu0 %v6744_v0 }
 0xcc9   :  { %6001 = vmatprep.subr.bf16.mxu0 %v6489_v3 }
 0xccc   :  { %6003 = vmatpush3.bf16.msra.mxu0 %v6754_v5 }
 0xccd   :  { %6004 = vmatprep.subr.bf16.mxu0 %v6489_v3 }
 0xcd0   :  { %6006 = vmatpush3.bf16.msra.mxu0 %v6764_v11 }
 0xcd1   :  { %6007 = vmatprep.subr.bf16.mxu0 %v6489_v3 }
 0xd34   :  { %v6989_v8 = vpop.permute.xlu0 %1076 }
 0xd35   :  { %5189 = vmatmul.mubr.msk.f32.vlgmr.msra.gmra.mrb[10].mxu1 %vm63_vm1, %v6989_v8 }
 0xd36   :  { %5973 = vmatpush3.bf16.msra.mxu1 %v6652_v30  ;;  %5242 = vmatprep.mubr.msk.f32.mxu1 %vm6490_vm0, %v6491_v10  ;;  %v1187_v30 = vld [vmem:[%s8109_s5] sm:$0x1] }
 0xd37   :  { %5974 = vmatprep.subr.bf16.mxu1 %v6489_v3 }
 0xd3a   :  { %5976 = vmatpush3.bf16.msra.mxu1 %v6658_v32 }
 0xd3b   :  { %5977 = vmatprep.subr.bf16.mxu1 %v6489_v3 }
 0xd3e   :  { %5979 = vmatpush3.bf16.msra.mxu1 %v6668_v35 }
 0xd3f   :  { %5980 = vmatprep.subr.bf16.mxu1 %v6489_v3 }
 0xd42   :  { %5982 = vmatpush3.bf16.msra.mxu1 %v6678_v38 }
 0xd43   :  { %5983 = vmatprep.subr.bf16.mxu1 %v6489_v3 }
 0xd46   :  { %5985 = vmatpush3.bf16.msra.mxu1 %v6688_v41 }
 0xd47   :  { %5986 = vmatprep.subr.bf16.mxu1 %v6489_v3 }
 0xd4a   :  { %5988 = vmatpush3.bf16.msra.mxu1 %v6700_v49 }
 0xd4b   :  { %5989 = vmatprep.subr.bf16.mxu1 %v6489_v3 }
 0xd4e   :  { %5991 = vmatpush3.bf16.msra.mxu1 %v6709_v52 }
 0xd4f   :  { %5992 = vmatprep.subr.bf16.mxu1 %v6489_v3 }
 0xd52   :  { %5994 = vmatpush3.bf16.msra.mxu1 %v6719_v55 }
 0xd53   :  { %6013 = vmatprep.subr.bf16.mxu1 %v6489_v3 }
 0xd96   :  { %v1257_v32 = vpop.f32.mrb[12].mxu0 }
 0xd97   :  { %v1258_v35 = vadd.f32 %v1257_v32, %v1187_v30  ;;  %v5209_v38 = vpop.f32.mrb[13].mxu0 }
 0xd99   :  { %v1261_v41 = vsel %vm148_vm3, %v1258_v35, -inf }
 0xd9a   :  { %1262 = vmax.xlane.f32.xlu1 %v1261_v41 }
 0xe08   :  { %v7015_v49 = vpop.f32.mrb[10].mxu1 }
 0xe09   :  { %v5190_v62 = vpop.f32.mrb[11].mxu1 }
 0xe27   :  { %v1263_v52 = vpop.xlane.xlu1 %1262 }
 0xe28   :  { %v1264_v0 = vsub.f32 %v1258_v35, %v1263_v52  ;;  %v7104_v35 = vld [vmem:[%s1731_s17] sm:$0x1] }
 0xe2a   :  { %v1265_v5 = vmul.f32 1.442695, %v1264_v0 }
 0xe2c   :  { %6382 = vpow2.f32 %v1265_v5 }
 0xe36   :  { %v6383_v55 = vpop.eup %6382 }
 0xe37   :  { %v1267_v11 = vsel %vm148_vm3, %v6383_v55, 0.0 }
 0xe38   :  { %1268 = vadd.xlane.f32.xlu0 %v1267_v11  ;;  %v1827_v11 = vld [vmem:[%s8106_s2] sm:$0xff] }
 0xec5   :  { %v1269_v39 = vpop.xlane.xlu0 %1268 }
 0xec6   :  { %6384 = vrcp.f32 %v1269_v39  ;;  %v1828_v39 = vld [vmem:[%s8106_s2 + $0x8] sm:$0xff] }
 0xed0   :  { %v6385_v40 = vpop.eup %6384 }
 0xed1   :  { %v7018_v42 = vmul.f32 %v6385_v40, %v6383_v55  ;;  %v1829_v40 = vld [vmem:[%s8106_s2 + $0x10] sm:$0xff] }
 0xed3   :  { %5243 = vmatmul.mubr.f32.vlgmr.msra.gmra.mrb[12].mxu1 %v7018_v42 }
 0xed4   :  { %6015 = vmatpush3.bf16.msra.mxu1 %v6778_v16  ;;  %5283 = vmatprep.mubr.msk.f32.mxu1 %vm6490_vm0, %v6491_v10  ;;  %v1528_v16 = vld [vmem:[%s8115_s11] sm:$0x1] }
 0xed5   :  { %6016 = vmatprep.subr.bf16.mxu1 %v6489_v3 }
 0xed8   :  { %6018 = vmatpush3.bf16.msra.mxu1 %v6784_v21 }
 0xed9   :  { %6025 = vmatprep.subr.bf16.mxu1 %v6489_v3 }
 0xedb   :  { %5284 = vmatmul.mubr.msk.f32.vlgmr.msra.gmra.mrb[14].mxu1 %vm63_vm1, %v6989_v8 }
 0xedc   :  { %5313 = vmatprep.mubr.msk.f32.mxu1 %vm6490_vm0, %v6491_v10 }
 0xfa6   :  { %v1354_v43 = vpop.f32.mrb[12].mxu1 }
 0xfa7   :  { %1359 = vrot.lane.b32.xlu1 %v1354_v43, %s6492_s3  ;;  %v5244_v44 = vpop.f32.mrb[13].mxu1  ;;  %v7135_v43 = vpack.c.bf16 %v1828_v39, %v1827_v11  ;;  %v1924_v39 = vld [vmem:[%s8110_s6 + $0x30] sm:$0xff] }
 0xfa8   :  { %v1830_v44 = vld [vmem:[%s8106_s2 + $0x18] sm:$0xff] }
 0xfae   :  { %v1595_v46 = vpop.f32.mrb[14].mxu1 }
 0xfaf   :  { %v1596_v4 = vadd.f32 %v1595_v46, %v1528_v16  ;;  %v5285_v47 = vpop.f32.mrb[15].mxu1  ;;  %v7141_v16 = vpack.c.bf16 %v1830_v44, %v1829_v40  ;;  %v1831_v46 = vld [vmem:[%s8106_s2 + $0x20] sm:$0xff]  ;;  %v1925_v40 = vld [vmem:[%s8110_s6 + $0x38] sm:$0xff] }
 0xfb0   :  { %v7281_v44 = vpack.c.bf16 %v1925_v40, %v1924_v39  ;;  %v2180_v40 = vld [vmem:[%s8116_s12] sm:$0xff] }
 0xfb1   :  { %1607 = vrot.lane.b32.xlu0 %v1596_v4, %s6493_s22 }
0x1019   :  { %v1360_v21 = vpop.permute.xlu1 %1359 }
0x101a   :  { %v1362_v48 = vsel %vm63_vm1, %v6969_v34, %v1360_v21  ;;  %v1833_v21 = vld [vmem:[%s8106_s2 + $0x30] sm:$0xff] }
0x101b   :  { %5262 = vmatmul.mubr.msk.f32.vlgmr.msra.gmra.mrb[14].mxu0 %vm74_vm2, %v1362_v48  ;;  %v1834_v48 = vld [vmem:[%s8106_s2 + $0x38] sm:$0xff] }
0x101c   :  { %6009 = vmatpush3.bf16.msra.mxu0 %v6808_v25  ;;  %5272 = vmatprep.mubr.msk.f32.mxu0 %vm6490_vm0, %v6491_v10  ;;  %v1450_v25 = vld [vmem:[%s8113_s9] sm:$0x1] }
0x101d   :  { %6010 = vmatprep.subr.bf16.mxu0 %v6489_v3 }
0x1020   :  { %6012 = vmatpush3.bf16.msra.mxu0 %v6823_v31 }
0x1021   :  { %6019 = vmatprep.subr.bf16.mxu0 %v6489_v3 }
0x1023   :  { %v1608_v61 = vpop.permute.xlu0 %1607 }
0x10ee   :  { %v1441_v50 = vpop.f32.mrb[14].mxu0 }
0x10ef   :  { %v1442_v15 = vadd.f32 %v1441_v50, %v1371_v9  ;;  %v5263_v51 = vpop.f32.mrb[15].mxu0  ;;  %v7161_v9 = vpack.c.bf16 %v1834_v48, %v1833_v21  ;;  %v1835_v50 = vld [vmem:[%s8106_s2 + $0x40] sm:$0xff] }
0x10f0   :  { %v2083_v21 = vld [vmem:[%s8115_s11] sm:$0x1] }
0x10f1   :  { %v1445_v18 = vmax.f32 %v1442_v15, 0.0  ;;  %v1836_v15 = vld [vmem:[%s8106_s2 + $0x48] sm:$0xff] }
0x10f2   :  { %v7171_v51 = vpack.c.bf16 %v1836_v15, %v1835_v50 }
0x10f3   :  { %5273 = vmatmul.mubr.msk.f32.vlgmr.msra.gmra.mrb[16].mxu0 %vm63_vm1, %v1445_v18 }
0x10f4   :  { %6021 = vmatpush3.bf16.msra.mxu0 %v6850_v2  ;;  %5294 = vmatprep.mubr.msk.f32.mxu0 %vm6490_vm0, %v6491_v10 }
0x10f5   :  { %6022 = vmatprep.subr.bf16.mxu0 %v6489_v3 }
0x10f8   :  { %6024 = vmatpush3.bf16.msra.mxu0 %v6856_v7  ;;  %v1734_v7 = vld [vmem:[%s8108_s4] sm:$0xff] }
0x10f9   :  { %6037 = vmatprep.subr.bf16.mxu0 %v6489_v3  ;;  %v7068_v12 = vpack.c.bf16 %v1735_v1, %v1734_v7  ;;  %v1841_v1 = vld [vmem:[%s8106_s2 + $0x70] sm:$0xff] }
0x10fa   :  { %v7204_v13 = vpack.c.bf16 %v1842_v6, %v1841_v1 }
0x10fb   :  { %6027 = vmatpush3.bf16.msra.mxu1 %v7068_v12 }
0x10fc   :  { %6028 = vmatprep.subr.bf16.mxu1 %v6489_v3 }
0x10ff   :  { %6030 = vmatpush3.bf16.msra.mxu1 %v7074_v14 }
0x1100   :  { %6031 = vmatprep.subr.bf16.mxu1 %v6489_v3 }
0x1103   :  { %6033 = vmatpush3.bf16.msra.mxu1 %v7084_v23 }
0x1104   :  { %6034 = vmatprep.subr.bf16.mxu1 %v6489_v3 }
0x1107   :  { %6036 = vmatpush3.bf16.msra.mxu1 %v7095_v29 }
0x1108   :  { %6061 = vmatprep.subr.bf16.mxu1 %v6489_v3 }
0x11c6   :  { %v1520_v31 = vpop.f32.mrb[16].mxu0 }
0x11c7   :  { %v1521_v53 = vadd.f32 %v1520_v31, %v1450_v25  ;;  %v5274_v54 = vpop.f32.mrb[17].mxu0 }
0x11c9   :  { %v1599_v56 = vadd.f32 %v1596_v4, %v1521_v53  ;;  %v1832_v4 = vld [vmem:[%s8106_s2 + $0x28] sm:$0xff] }
0x11ca   :  { %v7151_v47 = vpack.c.bf16 %v1832_v4, %v1831_v46 }
0x11cb   :  { %v4536_v57 = vmul.f32 -1.442695, %v1599_v56 }
0x11cd   :  { %6386 = vpow2.f32 %v4536_v57 }
0x11d7   :  { %v6387_v2 = vpop.eup %6386 }
0x11d8   :  { %v1603_v59 = vadd.f32 1.0, %v6387_v2  ;;  %v1837_v2 = vld [vmem:[%s8106_s2 + $0x50] sm:$0xff] }
0x11da   :  { %6388 = vrcp.f32 %v1603_v59  ;;  %v1838_v59 = vld [vmem:[%s8106_s2 + $0x58] sm:$0xff] }
0x11e4   :  { %v6389_v60 = vpop.eup %6388 }
0x11e5   :  { %v1610_v63 = vmul.f32 %v6389_v60, %v1608_v61  ;;  %v1617_v34 = vsub.f32 1.0, %v6389_v60  ;;  %v1623_v30 = vmul.f32 %v6389_v60, %v6971_v36  ;;  %v1742_v36 = vld [vmem:[%s8109_s5] sm:$0x1]  ;;  %v7185_v60 = vpack.c.bf16 %v1838_v59, %v1837_v2  ;;  %v2004_v2 = vld [vmem:[%s8112_s8 + $0x18] sm:$0xff] }
0x11e6   :  { %v1839_v61 = vld [vmem:[%s8106_s2 + $0x60] sm:$0xff] }
0x11e7   :  { %1612 = vrot.lane.b32.xlu1 %v1610_v63, %s6493_s22  ;;  %v1840_v63 = vld [vmem:[%s8106_s2 + $0x68] sm:$0xff] }
0x11e8   :  { %v7194_v7 = vpack.c.bf16 %v1840_v63, %v1839_v61 }
0x1259   :  { %v1613_v24 = vpop.permute.xlu1 %1612 }
0x125a   :  { %v1615_v26 = vadd.f32 %v1613_v24, %v1521_v53  ;;  %v2080_v24 = vld [vmem:[%s8114_s10 + $0x8] sm:$0xff] }
0x125b   :  { %v7215_v27 = vpack.c.bf16 %v2080_v24, %v2079_v22 }
0x125c   :  { %6390 = vtanh.f32 %v1615_v26 }
0x1266   :  { %v6391_v19 = vpop.eup %6390 }
0x1267   :  { %1619 = vrot.lane.b32.xlu1 %v6391_v19, %s6494_s19  ;;  %v2081_v19 = vld [vmem:[%s8114_s10 + $0x10] sm:$0xff] }
0x12d9   :  { %v1620_v37 = vpop.permute.xlu1 %1619 }
0x12da   :  { %v1622_v32 = vmul.f32 %v1620_v37, %v1617_v34  ;;  %v2082_v34 = vld [vmem:[%s8114_s10 + $0x18] sm:$0xff] }
0x12db   :  { %v7227_v37 = vpack.c.bf16 %v2082_v34, %v2081_v19 }
0x12dc   :  { %v7106_v38 = vadd.f32 %v1623_v30, %v1622_v32  ;;  %v1918_v30 = vld [vmem:[%s8110_s6] sm:$0xff]  ;;  %v1919_v32 = vld [vmem:[%s8110_s6 + $0x8] sm:$0xff] }
0x12de   :  { %1631 = vrot.lane.b32.xlu0 %v7106_v38, %s6494_s19  ;;  %v1733_v41 = vsel %vm63_vm1, %v7104_v35, %v7106_v38 }
0x12df   :  { %5314 = vmatmul.mubr.msk.f32.vlgmr.msra.gmra.mrb[16].mxu1 %vm74_vm2, %v1733_v41  ;;  %v1920_v41 = vld [vmem:[%s8110_s6 + $0x10] sm:$0xff] }
0x12e0   :  { %5367 = vmatprep.mubr.msk.f32.mxu1 %vm6490_vm0, %v6491_v10 }
0x1350   :  { %v7116_v62 = vpop.permute.xlu0 %1631 }
0x1351   :  { %5295 = vmatmul.mubr.msk.f32.vlgmr.msra.gmra.mrb[18].mxu0 %vm63_vm1, %v7116_v62 }
0x1352   :  { %5348 = vmatprep.mubr.msk.f32.mxu0 %vm6490_vm0, %v6491_v10  ;;  %6039 = vmatpush3.bf16.msra.mxu0 %v7135_v43 }
0x1353   :  { %6040 = vmatprep.subr.bf16.mxu0 %v6489_v3 }
0x1356   :  { %6042 = vmatpush3.bf16.msra.mxu0 %v7141_v16 }
0x1357   :  { %6043 = vmatprep.subr.bf16.mxu0 %v6489_v3 }
0x135a   :  { %6045 = vmatpush3.bf16.msra.mxu0 %v7151_v47 }
0x135b   :  { %6046 = vmatprep.subr.bf16.mxu0 %v6489_v3 }
0x135e   :  { %6048 = vmatpush3.bf16.msra.mxu0 %v7161_v9 }
0x135f   :  { %6049 = vmatprep.subr.bf16.mxu0 %v6489_v3 }
0x1362   :  { %6051 = vmatpush3.bf16.msra.mxu0 %v7171_v51 }
0x1363   :  { %6052 = vmatprep.subr.bf16.mxu0 %v6489_v3 }
0x1366   :  { %6054 = vmatpush3.bf16.msra.mxu0 %v7185_v60 }
0x1367   :  { %6055 = vmatprep.subr.bf16.mxu0 %v6489_v3 }
0x136a   :  { %6057 = vmatpush3.bf16.msra.mxu0 %v7194_v7 }
0x136b   :  { %6058 = vmatprep.subr.bf16.mxu0 %v6489_v3 }
0x136e   :  { %6060 = vmatpush3.bf16.msra.mxu0 %v7204_v13 }
0x136f   :  { %6079 = vmatprep.subr.bf16.mxu0 %v6489_v3 }
0x13b2   :  { %v1812_v52 = vpop.f32.mrb[16].mxu1 }
0x13b3   :  { %v1813_v0 = vadd.f32 %v1812_v52, %v1742_v36  ;;  %v5315_v5 = vpop.f32.mrb[17].mxu1  ;;  %v7255_v36 = vpack.c.bf16 %v1919_v32, %v1918_v30  ;;  %v1921_v52 = vld [vmem:[%s8110_s6 + $0x18] sm:$0xff] }
0x13b4   :  { %v1922_v5 = vld [vmem:[%s8110_s6 + $0x20] sm:$0xff] }
0x13b5   :  { %v1816_v55 = vsel %vm148_vm3, %v1813_v0, -inf  ;;  %6063 = vmatpush3.bf16.msra.mxu1 %v7255_v36 }
0x13b6   :  { %1817 = vmax.xlane.f32.xlu1 %v1816_v55  ;;  %6064 = vmatprep.subr.bf16.mxu1 %v6489_v3  ;;  %v1923_v55 = vld [vmem:[%s8110_s6 + $0x28] sm:$0xff] }
0x13b7   :  { %v7271_v11 = vpack.c.bf16 %v1923_v55, %v1922_v5 }
0x1424   :  { %v7176_v18 = vpop.f32.mrb[18].mxu0 }
0x1425   :  { %v5296_v25 = vpop.f32.mrb[19].mxu0 }
0x1426   :  { %v2001_v25 = vld [vmem:[%s8112_s8] sm:$0xff] }
0x1443   :  { %v1818_v31 = vpop.xlane.xlu1 %1817 }
0x1444   :  { %v1819_v53 = vsub.f32 %v1813_v0, %v1818_v31  ;;  %v7261_v0 = vpack.c.bf16 %v1921_v52, %v1920_v41  ;;  %v2002_v31 = vld [vmem:[%s8112_s8 + $0x8] sm:$0xff] }
0x1446   :  { %v1820_v54 = vmul.f32 1.442695, %v1819_v53  ;;  %6066 = vmatpush3.bf16.msra.mxu1 %v7261_v0  ;;  %v7297_v53 = vpack.c.bf16 %v2002_v31, %v2001_v25 }
0x1447   :  { %6067 = vmatprep.subr.bf16.mxu1 %v6489_v3 }
0x1448   :  { %6392 = vpow2.f32 %v1820_v54 }
0x144a   :  { %6069 = vmatpush3.bf16.msra.mxu1 %v7271_v11 }
0x144b   :  { %6070 = vmatprep.subr.bf16.mxu1 %v6489_v3 }
0x144e   :  { %6072 = vmatpush3.bf16.msra.mxu1 %v7281_v44 }
0x144f   :  { %6073 = vmatprep.subr.bf16.mxu1 %v6489_v3 }
0x1452   :  { %v6393_v56 = vpop.eup %6392 }
0x1453   :  { %v1822_v57 = vsel %vm148_vm3, %v6393_v56, 0.0 }
0x1454   :  { %1823 = vadd.xlane.f32.xlu0 %v1822_v57  ;;  %v2003_v57 = vld [vmem:[%s8112_s8 + $0x10] sm:$0xff] }
0x1455   :  { %v7312_v59 = vpack.c.bf16 %v2004_v2, %v2003_v57  ;;  %v7351_v57 = vld [vmem:[%s2286_s27] sm:$0x1] }
0x14e1   :  { %v1824_v17 = vpop.xlane.xlu0 %1823 }
0x14e2   :  { %6394 = vrcp.f32 %v1824_v17  ;;  %v2005_v17 = vld [vmem:[%s8113_s9] sm:$0x1] }
0x14ec   :  { %v6395_v26 = vpop.eup %6394 }
0x14ed   :  { %v7217_v28 = vmul.f32 %v6395_v26, %v6393_v56 }
0x14ef   :  { %5349 = vmatmul.mubr.f32.vlgmr.msra.gmra.mrb[20].mxu0 %v7217_v28 }
0x14f0   :  { %6081 = vmatpush3.bf16.msra.mxu0 %v7215_v27  ;;  %5389 = vmatprep.mubr.msk.f32.mxu0 %vm6490_vm0, %v6491_v10 }
0x14f1   :  { %6082 = vmatprep.subr.bf16.mxu0 %v6489_v3 }
0x14f4   :  { %6084 = vmatpush3.bf16.msra.mxu0 %v7227_v37 }
0x14f5   :  { %6091 = vmatprep.subr.bf16.mxu0 %v6489_v3 }
0x14f7   :  { %5390 = vmatmul.mubr.msk.f32.vlgmr.msra.gmra.mrb[22].mxu0 %vm63_vm1, %v7116_v62 }
0x14f8   :  { %6093 = vmatpush3.bf16.msra.mxu0 %v7068_v12  ;;  %5419 = vmatprep.mubr.msk.f32.mxu0 %vm6490_vm0, %v6491_v10 }
0x14f9   :  { %6094 = vmatprep.subr.bf16.mxu0 %v6489_v3 }
0x14fc   :  { %6096 = vmatpush3.bf16.msra.mxu0 %v7074_v14 }
0x14fd   :  { %6097 = vmatprep.subr.bf16.mxu0 %v6489_v3 }
0x1500   :  { %6099 = vmatpush3.bf16.msra.mxu0 %v7084_v23 }
0x1501   :  { %6100 = vmatprep.subr.bf16.mxu0 %v6489_v3 }
0x1504   :  { %6102 = vmatpush3.bf16.msra.mxu0 %v7095_v29 }
0x1505   :  { %6127 = vmatprep.subr.bf16.mxu0 %v6489_v3 }
0x15c2   :  { %v1909_v46 = vpop.f32.mrb[20].mxu0 }
0x15c3   :  { %1914 = vrot.lane.b32.xlu1 %v1909_v46, %s6492_s3  ;;  %v5350_v4 = vpop.f32.mrb[21].mxu0  ;;  %v2181_v46 = vld [vmem:[%s8116_s12 + $0x8] sm:$0xff] }
0x15c4   :  { %v2182_v4 = vld [vmem:[%s8116_s12 + $0x10] sm:$0xff] }
0x15ca   :  { %v2150_v48 = vpop.f32.mrb[22].mxu0 }
0x15cb   :  { %v2151_v50 = vadd.f32 %v2150_v48, %v2083_v21  ;;  %v5391_v15 = vpop.f32.mrb[23].mxu0  ;;  %v7335_v21 = vpack.c.bf16 %v2181_v46, %v2180_v40  ;;  %v2183_v48 = vld [vmem:[%s8116_s12 + $0x18] sm:$0xff] }
0x15cd   :  { %2162 = vrot.lane.b32.xlu0 %v2151_v50, %s6493_s22 }
0x1635   :  { %v1915_v54 = vpop.permute.xlu1 %1914 }
0x1636   :  { %v1917_v56 = vsel %vm63_vm1, %v7104_v35, %v1915_v54  ;;  %v1926_v35 = vld [vmem:[%s8111_s7] sm:$0x1] }
0x1637   :  { %5368 = vmatmul.mubr.msk.f32.vlgmr.msra.gmra.mrb[18].mxu1 %vm74_vm2, %v1917_v56 }
0x1638   :  { %6075 = vmatpush3.bf16.msra.mxu1 %v7297_v53  ;;  %5378 = vmatprep.mubr.msk.f32.mxu1 %vm6490_vm0, %v6491_v10 }
0x1639   :  { %6076 = vmatprep.subr.bf16.mxu1 %v6489_v3 }
0x163c   :  { %6078 = vmatpush3.bf16.msra.mxu1 %v7312_v59 }
0x163d   :  { %6085 = vmatprep.subr.bf16.mxu1 %v6489_v3 }
0x163f   :  { %v2163_v52 = vpop.permute.xlu0 %2162 }
0x170a   :  { %v1996_v61 = vpop.f32.mrb[18].mxu1 }
0x170b   :  { %v1997_v63 = vadd.f32 %v1996_v61, %v1926_v35  ;;  %v5369_v1 = vpop.f32.mrb[19].mxu1  ;;  %v2297_v61 = vld [vmem:[%s8109_s5] sm:$0x1] }
0x170d   :  { %v2000_v6 = vmax.f32 %v1997_v63, 0.0 }
0x170f   :  { %5379 = vmatmul.mubr.msk.f32.vlgmr.msra.gmra.mrb[20].mxu1 %vm63_vm1, %v2000_v6 }
0x1710   :  { %5400 = vmatprep.mubr.msk.f32.mxu1 %vm6490_vm0, %v6491_v10  ;;  %6087 = vmatpush3.bf16.msra.mxu1 %v7335_v21 }
0x1711   :  { %6088 = vmatprep.subr.bf16.mxu1 %v6489_v3 }
0x17e2   :  { %v2075_v22 = vpop.f32.mrb[20].mxu1 }
0x17e3   :  { %v2076_v24 = vadd.f32 %v2075_v22, %v2005_v17  ;;  %v5380_v26 = vpop.f32.mrb[21].mxu1 }
0x17e5   :  { %v2154_v19 = vadd.f32 %v2151_v50, %v2076_v24  ;;  %v7341_v50 = vpack.c.bf16 %v2183_v48, %v2182_v4 }
0x17e7   :  { %v4544_v34 = vmul.f32 -1.442695, %v2154_v19  ;;  %6090 = vmatpush3.bf16.msra.mxu1 %v7341_v50 }
0x17e8   :  { %6103 = vmatprep.subr.bf16.mxu1 %v6489_v3 }
0x17e9   :  { %6396 = vpow2.f32 %v4544_v34 }
0x17f3   :  { %v6397_v30 = vpop.eup %6396 }
0x17f4   :  { %v2158_v32 = vadd.f32 1.0, %v6397_v30 }
0x17f6   :  { %6398 = vrcp.f32 %v2158_v32 }
0x1800   :  { %v6399_v41 = vpop.eup %6398 }
0x1801   :  { %v2165_v5 = vmul.f32 %v6399_v41, %v2163_v52  ;;  %v2172_v25 = vsub.f32 1.0, %v6399_v41  ;;  %v2178_v54 = vmul.f32 %v6399_v41, %v7106_v38 }
0x1803   :  { %2167 = vrot.lane.b32.xlu1 %v2165_v5, %s6493_s22 }
0x1875   :  { %v2168_v55 = vpop.permute.xlu1 %2167 }
0x1876   :  { %v2170_v39 = vadd.f32 %v2168_v55, %v2076_v24 }
0x1878   :  { %6400 = vtanh.f32 %v2170_v39  ;;  %v2638_v39 = vld [vmem:[%s8115_s11] sm:$0x1] }
0x1882   :  { %v6401_v15 = vpop.eup %6400 }
0x1883   :  { %2174 = vrot.lane.b32.xlu1 %v6401_v15, %s6494_s19 }
0x18f5   :  { %v2175_v31 = vpop.permute.xlu1 %2174 }
0x18f6   :  { %v2177_v56 = vmul.f32 %v2175_v31, %v2172_v25 }
0x18f8   :  { %v7353_v2 = vadd.f32 %v2178_v54, %v2177_v56  ;;  %v2560_v54 = vld [vmem:[%s8113_s9] sm:$0x1] }
0x18fa   :  { %2186 = vrot.lane.b32.xlu0 %v7353_v2, %s6494_s19  ;;  %v2288_v35 = vsel %vm63_vm1, %v7351_v57, %v7353_v2 }
0x18fb   :  { %5420 = vmatmul.mubr.msk.f32.vlgmr.msra.gmra.mrb[24].mxu0 %vm74_vm2, %v2288_v35 }
0x18fc   :  { %6129 = vmatpush3.bf16.msra.mxu0 %v7255_v36  ;;  %5473 = vmatprep.mubr.msk.f32.mxu0 %vm6490_vm0, %v6491_v10 }
0x18fd   :  { %6130 = vmatprep.subr.bf16.mxu0 %v6489_v3 }
0x1900   :  { %6132 = vmatpush3.bf16.msra.mxu0 %v7261_v0 }
0x1901   :  { %6133 = vmatprep.subr.bf16.mxu0 %v6489_v3 }
0x1904   :  { %6135 = vmatpush3.bf16.msra.mxu0 %v7271_v11 }
0x1905   :  { %6136 = vmatprep.subr.bf16.mxu0 %v6489_v3 }
0x1908   :  { %6138 = vmatpush3.bf16.msra.mxu0 %v7281_v44 }
0x1909   :  { %6139 = vmatprep.subr.bf16.mxu0 %v6489_v3 }
0x196c   :  { %v7371_v38 = vpop.permute.xlu0 %2186 }
0x196d   :  { %5401 = vmatmul.mubr.msk.f32.vlgmr.msra.gmra.mrb[22].mxu1 %vm63_vm1, %v7371_v38 }
0x196e   :  { %6105 = vmatpush3.bf16.msra.mxu1 %v7135_v43  ;;  %5454 = vmatprep.mubr.msk.f32.mxu1 %vm6490_vm0, %v6491_v10 }
0x196f   :  { %6106 = vmatprep.subr.bf16.mxu1 %v6489_v3 }
0x1972   :  { %6108 = vmatpush3.bf16.msra.mxu1 %v7141_v16 }
0x1973   :  { %6109 = vmatprep.subr.bf16.mxu1 %v6489_v3 }
0x1976   :  { %6111 = vmatpush3.bf16.msra.mxu1 %v7151_v47 }
0x1977   :  { %6112 = vmatprep.subr.bf16.mxu1 %v6489_v3 }
0x197a   :  { %6114 = vmatpush3.bf16.msra.mxu1 %v7161_v9 }
0x197b   :  { %6115 = vmatprep.subr.bf16.mxu1 %v6489_v3 }
0x197e   :  { %6117 = vmatpush3.bf16.msra.mxu1 %v7171_v51 }
0x197f   :  { %6118 = vmatprep.subr.bf16.mxu1 %v6489_v3 }
0x1982   :  { %6120 = vmatpush3.bf16.msra.mxu1 %v7185_v60 }
0x1983   :  { %6121 = vmatprep.subr.bf16.mxu1 %v6489_v3 }
0x1986   :  { %6123 = vmatpush3.bf16.msra.mxu1 %v7194_v7 }
0x1987   :  { %6124 = vmatprep.subr.bf16.mxu1 %v6489_v3 }
0x198a   :  { %6126 = vmatpush3.bf16.msra.mxu1 %v7204_v13 }
0x198b   :  { %6145 = vmatprep.subr.bf16.mxu1 %v6489_v3 }
0x19ce   :  { %v2367_v63 = vpop.f32.mrb[24].mxu0 }
0x19cf   :  { %v2368_v1 = vadd.f32 %v2367_v63, %v2297_v61  ;;  %v5421_v6 = vpop.f32.mrb[25].mxu0 }
0x19d1   :  { %v2371_v17 = vsel %vm148_vm3, %v2368_v1, -inf }
0x19d2   :  { %2372 = vmax.xlane.f32.xlu1 %v2371_v17 }
0x1a40   :  { %v7397_v22 = vpop.f32.mrb[22].mxu1 }
0x1a41   :  { %v5402_v24 = vpop.f32.mrb[23].mxu1 }
0x1a5f   :  { %v2373_v26 = vpop.xlane.xlu1 %2372 }
0x1a60   :  { %v2374_v19 = vsub.f32 %v2368_v1, %v2373_v26 }
0x1a62   :  { %v2375_v34 = vmul.f32 1.442695, %v2374_v19 }
0x1a64   :  { %6402 = vpow2.f32 %v2375_v34 }
0x1a6e   :  { %v6403_v30 = vpop.eup %6402 }
0x1a6f   :  { %v2377_v32 = vsel %vm148_vm3, %v6403_v30, 0.0 }
0x1a70   :  { %2378 = vadd.xlane.f32.xlu0 %v2377_v32 }
0x1afd   :  { %v2379_v41 = vpop.xlane.xlu0 %2378 }
0x1afe   :  { %6404 = vrcp.f32 %v2379_v41 }
0x1b08   :  { %v6405_v52 = vpop.eup %6404 }
0x1b09   :  { %v7400_v5 = vmul.f32 %v6405_v52, %v6403_v30 }
0x1b0b   :  { %5455 = vmatmul.mubr.f32.vlgmr.msra.gmra.mrb[24].mxu1 %v7400_v5 }
0x1b0c   :  { %6147 = vmatpush3.bf16.msra.mxu1 %v7215_v27  ;;  %5495 = vmatprep.mubr.msk.f32.mxu1 %vm6490_vm0, %v6491_v10 }
0x1b0d   :  { %6148 = vmatprep.subr.bf16.mxu1 %v6489_v3 }
0x1b10   :  { %6150 = vmatpush3.bf16.msra.mxu1 %v7227_v37 }
0x1b11   :  { %6157 = vmatprep.subr.bf16.mxu1 %v6489_v3 }
0x1b13   :  { %5496 = vmatmul.mubr.msk.f32.vlgmr.msra.gmra.mrb[26].mxu1 %vm63_vm1, %v7371_v38 }
0x1b14   :  { %6159 = vmatpush3.bf16.msra.mxu1 %v7068_v12  ;;  %5525 = vmatprep.mubr.msk.f32.mxu1 %vm6490_vm0, %v6491_v10 }
0x1b15   :  { %6160 = vmatprep.subr.bf16.mxu1 %v6489_v3 }
0x1b18   :  { %6162 = vmatpush3.bf16.msra.mxu1 %v7074_v14 }
0x1b19   :  { %6163 = vmatprep.subr.bf16.mxu1 %v6489_v3 }
0x1b1c   :  { %6165 = vmatpush3.bf16.msra.mxu1 %v7084_v23 }
0x1b1d   :  { %6166 = vmatprep.subr.bf16.mxu1 %v6489_v3 }
0x1b20   :  { %6168 = vmatpush3.bf16.msra.mxu1 %v7095_v29  ;;  %v2481_v29 = vld [vmem:[%s8111_s7] sm:$0x1] }
0x1b21   :  { %6193 = vmatprep.subr.bf16.mxu1 %v6489_v3 }
0x1bde   :  { %v2464_v55 = vpop.f32.mrb[24].mxu1 }
0x1bdf   :  { %2469 = vrot.lane.b32.xlu1 %v2464_v55, %s6492_s3  ;;  %v5456_v12 = vpop.f32.mrb[25].mxu1 }
0x1be0   :  { %v7454_v12 = vld [vmem:[%s2841_s24] sm:$0x1] }
0x1be6   :  { %v2705_v40 = vpop.f32.mrb[26].mxu1 }
0x1be7   :  { %v2706_v14 = vadd.f32 %v2705_v40, %v2638_v39  ;;  %v5497_v46 = vpop.f32.mrb[27].mxu1 }
0x1be9   :  { %2717 = vrot.lane.b32.xlu0 %v2706_v14, %s6493_s22 }
0x1c51   :  { %v2470_v23 = vpop.permute.xlu1 %2469 }
0x1c52   :  { %v2472_v4 = vsel %vm63_vm1, %v7351_v57, %v2470_v23 }
0x1c53   :  { %5474 = vmatmul.mubr.msk.f32.vlgmr.msra.gmra.mrb[26].mxu0 %vm74_vm2, %v2472_v4 }
0x1c54   :  { %6141 = vmatpush3.bf16.msra.mxu0 %v7297_v53  ;;  %5484 = vmatprep.mubr.msk.f32.mxu0 %vm6490_vm0, %v6491_v10 }
0x1c55   :  { %6142 = vmatprep.subr.bf16.mxu0 %v6489_v3 }
0x1c58   :  { %6144 = vmatpush3.bf16.msra.mxu0 %v7312_v59 }
0x1c59   :  { %6151 = vmatprep.subr.bf16.mxu0 %v6489_v3 }
0x1c5b   :  { %v2718_v24 = vpop.permute.xlu0 %2717 }
0x1d26   :  { %v2551_v48 = vpop.f32.mrb[26].mxu0 }
0x1d27   :  { %v2552_v15 = vadd.f32 %v2551_v48, %v2481_v29  ;;  %v5475_v25 = vpop.f32.mrb[27].mxu0 }
0x1d29   :  { %v2555_v31 = vmax.f32 %v2552_v15, 0.0 }
0x1d2b   :  { %5485 = vmatmul.mubr.msk.f32.vlgmr.msra.gmra.mrb[28].mxu0 %vm63_vm1, %v2555_v31 }
0x1d2c   :  { %6153 = vmatpush3.bf16.msra.mxu0 %v7335_v21  ;;  %5506 = vmatprep.mubr.msk.f32.mxu0 %vm6490_vm0, %v6491_v10 }
0x1d2d   :  { %6154 = vmatprep.subr.bf16.mxu0 %v6489_v3 }
0x1d30   :  { %6156 = vmatpush3.bf16.msra.mxu0 %v7341_v50 }
0x1d31   :  { %6169 = vmatprep.subr.bf16.mxu0 %v6489_v3 }
0x1dfe   :  { %v2630_v56 = vpop.f32.mrb[28].mxu0 }
0x1dff   :  { %v2631_v57 = vadd.f32 %v2630_v56, %v2560_v54  ;;  %v5486_v35 = vpop.f32.mrb[29].mxu0  ;;  %v3036_v54 = vld [vmem:[%s8111_s7] sm:$0x1] }
0x1e01   :  { %v2709_v61 = vadd.f32 %v2706_v14, %v2631_v57 }
0x1e03   :  { %v4552_v63 = vmul.f32 -1.442695, %v2709_v61 }
0x1e05   :  { %6406 = vpow2.f32 %v4552_v63 }
0x1e0f   :  { %v6407_v1 = vpop.eup %6406 }
0x1e10   :  { %v2713_v6 = vadd.f32 1.0, %v6407_v1 }
0x1e12   :  { %6408 = vrcp.f32 %v2713_v6 }
0x1e1c   :  { %v6409_v17 = vpop.eup %6408 }
0x1e1d   :  { %v2720_v26 = vmul.f32 %v6409_v17, %v2718_v24  ;;  %v2727_v32 = vsub.f32 1.0, %v6409_v17  ;;  %v2733_v52 = vmul.f32 %v6409_v17, %v7353_v2 }
0x1e1f   :  { %2722 = vrot.lane.b32.xlu1 %v2720_v26, %s6493_s22 }
0x1e91   :  { %v2723_v19 = vpop.permute.xlu1 %2722 }
0x1e92   :  { %v2725_v34 = vadd.f32 %v2723_v19, %v2631_v57 }
0x1e94   :  { %6410 = vtanh.f32 %v2725_v34 }
0x1e9e   :  { %v6411_v30 = vpop.eup %6410 }
0x1e9f   :  { %2729 = vrot.lane.b32.xlu1 %v6411_v30, %s6494_s19  ;;  %v3400_v30 = vld [vmem:[%s8108_s4 + $0x8] sm:$0xff] }
0x1f11   :  { %v2730_v41 = vpop.permute.xlu1 %2729 }
0x1f12   :  { %v2732_v55 = vmul.f32 %v2730_v41, %v2727_v32  ;;  %v3401_v32 = vld [vmem:[%s8108_s4 + $0x10] sm:$0xff] }
0x1f14   :  { %v7456_v39 = vadd.f32 %v2733_v52, %v2732_v55  ;;  %v3402_v52 = vld [vmem:[%s8108_s4 + $0x18] sm:$0xff] }
0x1f15   :  { %v7559_v55 = vpack.c.bf16 %v3402_v52, %v3401_v32 }
0x1f16   :  { %2741 = vrot.lane.b32.xlu0 %v7456_v39, %s6494_s19  ;;  %v2843_v40 = vsel %vm63_vm1, %v7454_v12, %v7456_v39 }
0x1f17   :  { %5526 = vmatmul.mubr.msk.f32.vlgmr.msra.gmra.mrb[28].mxu1 %vm74_vm2, %v2843_v40  ;;  %v3404_v40 = vld [vmem:[%s8108_s4 + $0x28] sm:$0xff] }
0x1f18   :  { %6195 = vmatpush3.bf16.msra.mxu1 %v7255_v36  ;;  %5579 = vmatprep.mubr.msk.f32.mxu1 %vm6490_vm0, %v6491_v10 }
0x1f19   :  { %6196 = vmatprep.subr.bf16.mxu1 %v6489_v3 }
0x1f1c   :  { %6198 = vmatpush3.bf16.msra.mxu1 %v7261_v0 }
0x1f1d   :  { %6199 = vmatprep.subr.bf16.mxu1 %v6489_v3 }
0x1f20   :  { %6201 = vmatpush3.bf16.msra.mxu1 %v7271_v11 }
0x1f21   :  { %6202 = vmatprep.subr.bf16.mxu1 %v6489_v3 }
0x1f24   :  { %6204 = vmatpush3.bf16.msra.mxu1 %v7281_v44 }
0x1f25   :  { %6205 = vmatprep.subr.bf16.mxu1 %v6489_v3 }
0x1f88   :  { %v7474_v2 = vpop.permute.xlu0 %2741 }
0x1f89   :  { %5507 = vmatmul.mubr.msk.f32.vlgmr.msra.gmra.mrb[30].mxu0 %vm63_vm1, %v7474_v2 }
0x1f8a   :  { %6171 = vmatpush3.bf16.msra.mxu0 %v7135_v43  ;;  %5560 = vmatprep.mubr.msk.f32.mxu0 %vm6490_vm0, %v6491_v10  ;;  %v2852_v43 = vld [vmem:[%s8109_s5] sm:$0x1] }
0x1f8b   :  { %6172 = vmatprep.subr.bf16.mxu0 %v6489_v3 }
0x1f8e   :  { %6174 = vmatpush3.bf16.msra.mxu0 %v7141_v16 }
0x1f8f   :  { %6175 = vmatprep.subr.bf16.mxu0 %v6489_v3 }
0x1f92   :  { %6177 = vmatpush3.bf16.msra.mxu0 %v7151_v47 }
0x1f93   :  { %6178 = vmatprep.subr.bf16.mxu0 %v6489_v3 }
0x1f96   :  { %6180 = vmatpush3.bf16.msra.mxu0 %v7161_v9 }
0x1f97   :  { %6181 = vmatprep.subr.bf16.mxu0 %v6489_v3 }
0x1f9a   :  { %6183 = vmatpush3.bf16.msra.mxu0 %v7171_v51 }
0x1f9b   :  { %6184 = vmatprep.subr.bf16.mxu0 %v6489_v3 }
0x1f9e   :  { %6186 = vmatpush3.bf16.msra.mxu0 %v7185_v60 }
0x1f9f   :  { %6187 = vmatprep.subr.bf16.mxu0 %v6489_v3 }
0x1fa2   :  { %6189 = vmatpush3.bf16.msra.mxu0 %v7194_v7 }
0x1fa3   :  { %6190 = vmatprep.subr.bf16.mxu0 %v6489_v3 }
0x1fa6   :  { %6192 = vmatpush3.bf16.msra.mxu0 %v7204_v13 }
0x1fa7   :  { %6211 = vmatprep.subr.bf16.mxu0 %v6489_v3 }
0x1fea   :  { %v2922_v16 = vpop.f32.mrb[28].mxu1 }
0x1feb   :  { %v2923_v47 = vadd.f32 %v2922_v16, %v2852_v43  ;;  %v5527_v9 = vpop.f32.mrb[29].mxu1 }
0x1fec   :  { %v3405_v9 = vld [vmem:[%s8108_s4 + $0x30] sm:$0xff] }
0x1fed   :  { %v2926_v51 = vsel %vm148_vm3, %v2923_v47, -inf }
0x1fee   :  { %2927 = vmax.xlane.f32.xlu1 %v2926_v51  ;;  %v3406_v51 = vld [vmem:[%s8108_s4 + $0x38] sm:$0xff] }
0x205c   :  { %v7500_v60 = vpop.f32.mrb[30].mxu0 }
0x205d   :  { %v5508_v36 = vpop.f32.mrb[31].mxu0 }
0x205e   :  { %v7580_v36 = vpack.c.bf16 %v3406_v51, %v3405_v9  ;;  %v3505_v9 = vld [vmem:[%s8106_s2 + $0x68] sm:$0xff] }
0x207b   :  { %v2928_v7 = vpop.xlane.xlu1 %2927 }
0x207c   :  { %v2929_v0 = vsub.f32 %v2923_v47, %v2928_v7 }
0x207e   :  { %v2930_v11 = vmul.f32 1.442695, %v2929_v0 }
0x2080   :  { %6412 = vpow2.f32 %v2930_v11 }
0x208a   :  { %v6413_v13 = vpop.eup %6412 }
0x208b   :  { %v2932_v44 = vsel %vm148_vm3, %v6413_v13, 0.0 }
0x208c   :  { %2933 = vadd.xlane.f32.xlu0 %v2932_v44 }
0x2119   :  { %v2934_v14 = vpop.xlane.xlu0 %2933 }
0x211a   :  { %6414 = vrcp.f32 %v2934_v14  ;;  %v7589_v14 = vld [vmem:[%s3396_s21] sm:$0x1] }
0x2124   :  { %v6415_v46 = vpop.eup %6414 }
0x2125   :  { %v7503_v23 = vmul.f32 %v6415_v46, %v6413_v13 }
0x2127   :  { %5561 = vmatmul.mubr.f32.vlgmr.msra.gmra.mrb[32].mxu0 %v7503_v23 }
0x2128   :  { %6213 = vmatpush3.bf16.msra.mxu0 %v7215_v27  ;;  %5601 = vmatprep.mubr.msk.f32.mxu0 %vm6490_vm0, %v6491_v10  ;;  %v3193_v27 = vld [vmem:[%s8115_s11] sm:$0x1] }
0x2129   :  { %6214 = vmatprep.subr.bf16.mxu0 %v6489_v3 }
0x212c   :  { %6216 = vmatpush3.bf16.msra.mxu0 %v7227_v37 }
0x212d   :  { %6223 = vmatprep.subr.bf16.mxu0 %v6489_v3 }
0x212f   :  { %5602 = vmatmul.mubr.msk.f32.vlgmr.msra.gmra.mrb[34].mxu0 %vm63_vm1, %v7474_v2 }
0x2130   :  { %5631 = vmatprep.mubr.msk.f32.mxu0 %vm6490_vm0, %v6491_v10 }
0x21fa   :  { %v3019_v4 = vpop.f32.mrb[32].mxu0 }
0x21fb   :  { %3024 = vrot.lane.b32.xlu1 %v3019_v4, %s6492_s3  ;;  %v5562_v29 = vpop.f32.mrb[33].mxu0 }
0x2202   :  { %v3260_v48 = vpop.f32.mrb[34].mxu0 }
0x2203   :  { %v3261_v15 = vadd.f32 %v3260_v48, %v3193_v27  ;;  %v5603_v25 = vpop.f32.mrb[35].mxu0 }
0x2205   :  { %3272 = vrot.lane.b32.xlu0 %v3261_v15, %s6493_s22 }
0x226d   :  { %v3025_v37 = vpop.permute.xlu1 %3024 }
0x226e   :  { %v3027_v31 = vsel %vm63_vm1, %v7454_v12, %v3025_v37  ;;  %v3403_v12 = vld [vmem:[%s8108_s4 + $0x20] sm:$0xff] }
0x226f   :  { %5580 = vmatmul.mubr.msk.f32.vlgmr.msra.gmra.mrb[30].mxu1 %vm74_vm2, %v3027_v31  ;;  %v7569_v43 = vpack.c.bf16 %v3404_v40, %v3403_v12  ;;  %v3492_v37 = vld [vmem:[%s8106_s2] sm:$0xff]  ;;  %v3493_v31 = vld [vmem:[%s8106_s2 + $0x8] sm:$0xff]  ;;  %v3502_v12 = vld [vmem:[%s8106_s2 + $0x50] sm:$0xff] }
0x2270   :  { %6207 = vmatpush3.bf16.msra.mxu1 %v7297_v53  ;;  %5590 = vmatprep.mubr.msk.f32.mxu1 %vm6490_vm0, %v6491_v10  ;;  %v3115_v53 = vld [vmem:[%s8113_s9] sm:$0x1]  ;;  %v3503_v40 = vld [vmem:[%s8106_s2 + $0x58] sm:$0xff] }
0x2271   :  { %6208 = vmatprep.subr.bf16.mxu1 %v6489_v3 }
0x2274   :  { %6210 = vmatpush3.bf16.msra.mxu1 %v7312_v59 }
0x2275   :  { %6217 = vmatprep.subr.bf16.mxu1 %v6489_v3 }
0x2277   :  { %v3273_v19 = vpop.permute.xlu0 %3272 }
0x2342   :  { %v3106_v56 = vpop.f32.mrb[30].mxu1 }
0x2343   :  { %v3107_v57 = vadd.f32 %v3106_v56, %v3036_v54  ;;  %v5581_v35 = vpop.f32.mrb[31].mxu1  ;;  %v3494_v54 = vld [vmem:[%s8106_s2 + $0x10] sm:$0xff]  ;;  %v7620_v56 = vpack.c.bf16 %v3493_v31, %v3492_v37  ;;  %v3584_v31 = vld [vmem:[%s8110_s6 + $0x8] sm:$0xff] }
0x2345   :  { %v3110_v61 = vmax.f32 %v3107_v57, 0.0  ;;  %v3495_v57 = vld [vmem:[%s8106_s2 + $0x18] sm:$0xff] }
0x2346   :  { %v7626_v35 = vpack.c.bf16 %v3495_v57, %v3494_v54  ;;  %v3587_v57 = vld [vmem:[%s8110_s6 + $0x20] sm:$0xff] }
0x2347   :  { %5591 = vmatmul.mubr.msk.f32.vlgmr.msra.gmra.mrb[32].mxu1 %vm63_vm1, %v3110_v61  ;;  %v3496_v61 = vld [vmem:[%s8106_s2 + $0x20] sm:$0xff] }
0x2348   :  { %6219 = vmatpush3.bf16.msra.mxu1 %v7335_v21  ;;  %5612 = vmatprep.mubr.msk.f32.mxu1 %vm6490_vm0, %v6491_v10 }
0x2349   :  { %6220 = vmatprep.subr.bf16.mxu1 %v6489_v3 }
0x234c   :  { %6222 = vmatpush3.bf16.msra.mxu1 %v7341_v50  ;;  %v3399_v50 = vld [vmem:[%s8108_s4] sm:$0xff] }
0x234d   :  { %6235 = vmatprep.subr.bf16.mxu1 %v6489_v3  ;;  %v7553_v41 = vpack.c.bf16 %v3400_v30, %v3399_v50 }
0x234f   :  { %6225 = vmatpush3.bf16.msra.mxu0 %v7553_v41 }
0x2350   :  { %6226 = vmatprep.subr.bf16.mxu0 %v6489_v3 }
0x2353   :  { %6228 = vmatpush3.bf16.msra.mxu0 %v7559_v55 }
0x2354   :  { %6229 = vmatprep.subr.bf16.mxu0 %v6489_v3 }
0x2357   :  { %6231 = vmatpush3.bf16.msra.mxu0 %v7569_v43 }
0x2358   :  { %6232 = vmatprep.subr.bf16.mxu0 %v6489_v3 }
0x235b   :  { %6234 = vmatpush3.bf16.msra.mxu0 %v7580_v36 }
0x235c   :  { %6259 = vmatprep.subr.bf16.mxu0 %v6489_v3 }
0x241a   :  { %v3185_v59 = vpop.f32.mrb[32].mxu1 }
0x241b   :  { %v3186_v63 = vadd.f32 %v3185_v59, %v3115_v53  ;;  %v5592_v1 = vpop.f32.mrb[33].mxu1  ;;  %v3497_v53 = vld [vmem:[%s8106_s2 + $0x28] sm:$0xff] }
0x241c   :  { %v7636_v59 = vpack.c.bf16 %v3497_v53, %v3496_v61  ;;  %v3499_v1 = vld [vmem:[%s8106_s2 + $0x38] sm:$0xff]  ;;  %v3588_v61 = vld [vmem:[%s8110_s6 + $0x28] sm:$0xff] }
0x241d   :  { %v3264_v6 = vadd.f32 %v3261_v15, %v3186_v63  ;;  %v7756_v53 = vpack.c.bf16 %v3588_v61, %v3587_v57 }
0x241f   :  { %v4560_v17 = vmul.f32 -1.442695, %v3264_v6 }
0x2421   :  { %6416 = vpow2.f32 %v4560_v17  ;;  %v3500_v17 = vld [vmem:[%s8106_s2 + $0x40] sm:$0xff] }
0x242b   :  { %v6417_v21 = vpop.eup %6416 }
0x242c   :  { %v3268_v24 = vadd.f32 1.0, %v6417_v21  ;;  %v3501_v21 = vld [vmem:[%s8106_s2 + $0x48] sm:$0xff] }
0x242e   :  { %6418 = vrcp.f32 %v3268_v24  ;;  %v7656_v24 = vpack.c.bf16 %v3501_v21, %v3500_v17 }
0x2438   :  { %v6419_v26 = vpop.eup %6418 }
0x2439   :  { %v3275_v34 = vmul.f32 %v6419_v26, %v3273_v19  ;;  %v3282_v0 = vsub.f32 1.0, %v6419_v26  ;;  %v3288_v13 = vmul.f32 %v6419_v26, %v7456_v39  ;;  %v3407_v39 = vld [vmem:[%s8109_s5] sm:$0x1] }
0x243b   :  { %3277 = vrot.lane.b32.xlu1 %v3275_v34, %s6493_s22 }
0x24ad   :  { %v3278_v16 = vpop.permute.xlu1 %3277 }
0x24ae   :  { %v3280_v47 = vadd.f32 %v3278_v16, %v3186_v63  ;;  %v3498_v63 = vld [vmem:[%s8106_s2 + $0x30] sm:$0xff]  ;;  %v7670_v16 = vpack.c.bf16 %v3503_v40, %v3502_v12  ;;  %v3667_v12 = vld [vmem:[%s8112_s8 + $0x8] sm:$0xff] }
0x24af   :  { %v7646_v6 = vpack.c.bf16 %v3499_v1, %v3498_v63  ;;  %v3589_v63 = vld [vmem:[%s8110_s6 + $0x30] sm:$0xff]  ;;  %v3590_v1 = vld [vmem:[%s8110_s6 + $0x38] sm:$0xff] }
0x24b0   :  { %6420 = vtanh.f32 %v3280_v47  ;;  %v3504_v47 = vld [vmem:[%s8106_s2 + $0x60] sm:$0xff]  ;;  %v7766_v17 = vpack.c.bf16 %v3590_v1, %v3589_v63 }
0x24b1   :  { %v7679_v51 = vpack.c.bf16 %v3505_v9, %v3504_v47 }
0x24ba   :  { %v6421_v7 = vpop.eup %6420 }
0x24bb   :  { %3284 = vrot.lane.b32.xlu1 %v6421_v7, %s6494_s19  ;;  %v3506_v7 = vld [vmem:[%s8106_s2 + $0x70] sm:$0xff] }
0x252d   :  { %v3285_v11 = vpop.permute.xlu1 %3284 }
0x252e   :  { %v3287_v44 = vmul.f32 %v3285_v11, %v3282_v0  ;;  %v3507_v0 = vld [vmem:[%s8106_s2 + $0x78] sm:$0xff] }
0x252f   :  { %v7689_v11 = vpack.c.bf16 %v3507_v0, %v3506_v7  ;;  %v3668_v7 = vld [vmem:[%s8112_s8 + $0x10] sm:$0xff]  ;;  %v3669_v0 = vld [vmem:[%s8112_s8 + $0x18] sm:$0xff] }
0x2530   :  { %v7591_v46 = vadd.f32 %v3288_v13, %v3287_v44  ;;  %v3744_v44 = vld [vmem:[%s8114_s10] sm:$0xff] }
0x2532   :  { %3296 = vrot.lane.b32.xlu1 %v7591_v46, %s6494_s19  ;;  %v3398_v4 = vsel %vm63_vm1, %v7589_v14, %v7591_v46 }
0x2533   :  { %5632 = vmatmul.mubr.msk.f32.vlgmr.msra.gmra.mrb[36].mxu0 %vm74_vm2, %v3398_v4  ;;  %v3745_v4 = vld [vmem:[%s8114_s10 + $0x8] sm:$0xff] }
0x2534   :  { %5685 = vmatprep.mubr.msk.f32.mxu0 %vm6490_vm0, %v6491_v10 }
0x25a4   :  { %v7601_v29 = vpop.permute.xlu1 %3296 }
0x25a5   :  { %5613 = vmatmul.mubr.msk.f32.vlgmr.msra.gmra.mrb[34].mxu1 %vm63_vm1, %v7601_v29 }
0x25a6   :  { %5666 = vmatprep.mubr.msk.f32.mxu1 %vm6490_vm0, %v6491_v10  ;;  %6237 = vmatpush3.bf16.msra.mxu1 %v7620_v56 }
0x25a7   :  { %6238 = vmatprep.subr.bf16.mxu1 %v6489_v3 }
0x25aa   :  { %6240 = vmatpush3.bf16.msra.mxu1 %v7626_v35 }
0x25ab   :  { %6241 = vmatprep.subr.bf16.mxu1 %v6489_v3 }
0x25ae   :  { %6243 = vmatpush3.bf16.msra.mxu1 %v7636_v59 }
0x25af   :  { %6244 = vmatprep.subr.bf16.mxu1 %v6489_v3 }
0x25b2   :  { %6246 = vmatpush3.bf16.msra.mxu1 %v7646_v6 }
0x25b3   :  { %6247 = vmatprep.subr.bf16.mxu1 %v6489_v3 }
0x25b6   :  { %6249 = vmatpush3.bf16.msra.mxu1 %v7656_v24 }
0x25b7   :  { %6250 = vmatprep.subr.bf16.mxu1 %v6489_v3 }
0x25ba   :  { %6252 = vmatpush3.bf16.msra.mxu1 %v7670_v16 }
0x25bb   :  { %6253 = vmatprep.subr.bf16.mxu1 %v6489_v3 }
0x25be   :  { %6255 = vmatpush3.bf16.msra.mxu1 %v7679_v51 }
0x25bf   :  { %6256 = vmatprep.subr.bf16.mxu1 %v6489_v3 }
0x25c2   :  { %6258 = vmatpush3.bf16.msra.mxu1 %v7689_v11 }
0x25c3   :  { %6277 = vmatprep.subr.bf16.mxu1 %v6489_v3 }
0x2606   :  { %v3477_v27 = vpop.f32.mrb[36].mxu0 }
0x2607   :  { %v3478_v48 = vadd.f32 %v3477_v27, %v3407_v39  ;;  %v5633_v15 = vpop.f32.mrb[37].mxu0  ;;  %v7700_v27 = vpack.c.bf16 %v3745_v4, %v3744_v44 }
0x2608   :  { %v3746_v15 = vld [vmem:[%s8114_s10 + $0x10] sm:$0xff] }
0x2609   :  { %v3481_v25 = vsel %vm148_vm3, %v3478_v48, -inf }
0x260a   :  { %3482 = vmax.xlane.f32.xlu0 %v3481_v25  ;;  %v3747_v25 = vld [vmem:[%s8114_s10 + $0x18] sm:$0xff] }
0x260b   :  { %v7712_v37 = vpack.c.bf16 %v3747_v25, %v3746_v15  ;;  %v3670_v25 = vld [vmem:[%s8113_s9] sm:$0x1] }
0x2678   :  { %v7661_v26 = vpop.f32.mrb[34].mxu1 }
0x2679   :  { %v5614_v19 = vpop.f32.mrb[35].mxu1 }
0x2697   :  { %v3483_v34 = vpop.xlane.xlu0 %3482 }
0x2698   :  { %v3484_v50 = vsub.f32 %v3478_v48, %v3483_v34  ;;  %v3748_v34 = vld [vmem:[%s8115_s11] sm:$0x1] }
0x269a   :  { %v3485_v30 = vmul.f32 1.442695, %v3484_v50 }
0x269c   :  { %6422 = vpow2.f32 %v3485_v30 }
0x26a6   :  { %v6423_v32 = vpop.eup %6422 }
0x26a7   :  { %v3487_v52 = vsel %vm148_vm3, %v6423_v32, 0.0 }
0x26a8   :  { %3488 = vadd.xlane.f32.xlu1 %v3487_v52  ;;  %v3666_v52 = vld [vmem:[%s8112_s8] sm:$0xff] }
0x26a9   :  { %v7782_v40 = vpack.c.bf16 %v3667_v12, %v3666_v52  ;;  %v3847_v52 = vld [vmem:[%s8116_s12 + $0x10] sm:$0xff] }
0x2735   :  { %v3489_v13 = vpop.xlane.xlu1 %3488 }
0x2736   :  { %6424 = vrcp.f32 %v3489_v13  ;;  %v7797_v13 = vpack.c.bf16 %v3669_v0, %v3668_v7 }
0x2740   :  { %v6425_v39 = vpop.eup %6424 }
0x2741   :  { %v7702_v48 = vmul.f32 %v6425_v39, %v6423_v32 }
0x2743   :  { %5667 = vmatmul.mubr.f32.vlgmr.msra.gmra.mrb[36].mxu1 %v7702_v48 }
0x2744   :  { %6279 = vmatpush3.bf16.msra.mxu1 %v7700_v27  ;;  %5707 = vmatprep.mubr.msk.f32.mxu1 %vm6490_vm0, %v6491_v10 }
0x2745   :  { %6280 = vmatprep.subr.bf16.mxu1 %v6489_v3 }
0x2748   :  { %6282 = vmatpush3.bf16.msra.mxu1 %v7712_v37 }
0x2749   :  { %6289 = vmatprep.subr.bf16.mxu1 %v6489_v3 }
0x274b   :  { %5708 = vmatmul.mubr.msk.f32.vlgmr.msra.gmra.mrb[38].mxu1 %vm63_vm1, %v7601_v29 }
0x274c   :  { %6291 = vmatpush3.bf16.msra.mxu1 %v7553_v41  ;;  %5737 = vmatprep.mubr.msk.f32.mxu1 %vm6490_vm0, %v6491_v10  ;;  %v3583_v41 = vld [vmem:[%s8110_s6] sm:$0xff] }
0x274d   :  { %6292 = vmatprep.subr.bf16.mxu1 %v6489_v3  ;;  %v7740_v54 = vpack.c.bf16 %v3584_v31, %v3583_v41 }
0x274f   :  { %6261 = vmatpush3.bf16.msra.mxu0 %v7740_v54 }
0x2750   :  { %6294 = vmatpush3.bf16.msra.mxu1 %v7559_v55  ;;  %v3585_v55 = vld [vmem:[%s8110_s6 + $0x10] sm:$0xff]  ;;  %6262 = vmatprep.subr.bf16.mxu0 %v6489_v3 }
0x2751   :  { %6295 = vmatprep.subr.bf16.mxu1 %v6489_v3 }
0x2754   :  { %6297 = vmatpush3.bf16.msra.mxu1 %v7569_v43  ;;  %v3586_v43 = vld [vmem:[%s8110_s6 + $0x18] sm:$0xff]  ;;  %s4571_s6 = sld [smem:[#allocation3 + $0x7]] }
0x2755   :  { %6298 = vmatprep.subr.bf16.mxu1 %v6489_v3 }
0x2758   :  { %6300 = vmatpush3.bf16.msra.mxu1 %v7580_v36  ;;  %v7746_v36 = vpack.c.bf16 %v3586_v43, %v3585_v55 }
0x2759   :  { %6325 = vmatprep.subr.bf16.mxu1 %v6489_v3 }
0x275a   :  { %6264 = vmatpush3.bf16.msra.mxu0 %v7746_v36  ;;  %s3951_s16 = scalar_lea.vmem %s8105_s1, %s4571_s6 }
0x275b   :  { %6265 = vmatprep.subr.bf16.mxu0 %v6489_v3 }
0x275e   :  { %6267 = vmatpush3.bf16.msra.mxu0 %v7756_v53 }
0x275f   :  { %6268 = vmatprep.subr.bf16.mxu0 %v6489_v3 }
0x2762   :  { %6270 = vmatpush3.bf16.msra.mxu0 %v7766_v17 }
0x2763   :  { %6271 = vmatprep.subr.bf16.mxu0 %v6489_v3 }
0x2816   :  { %v3574_v21 = vpop.f32.mrb[36].mxu1 }
0x2817   :  { %3579 = vrot.lane.b32.xlu0 %v3574_v21, %s6492_s3  ;;  %v5668_v19 = vpop.f32.mrb[37].mxu1 }
0x281e   :  { %v3815_v50 = vpop.f32.mrb[38].mxu1 }
0x281f   :  { %v3816_v30 = vadd.f32 %v3815_v50, %v3748_v34  ;;  %v5709_v32 = vpop.f32.mrb[39].mxu1 }
0x2820   :  { %v3845_v32 = vld [vmem:[%s8116_s12] sm:$0xff] }
0x2821   :  { %3827 = vrot.lane.b32.xlu1 %v3816_v30, %s6493_s22 }
0x2889   :  { %v3580_v47 = vpop.permute.xlu0 %3579 }
0x288a   :  { %v3582_v9 = vsel %vm63_vm1, %v7589_v14, %v3580_v47  ;;  %v3591_v14 = vld [vmem:[%s8111_s7] sm:$0x1]  ;;  %v3848_v47 = vld [vmem:[%s8116_s12 + $0x18] sm:$0xff] }
0x288b   :  { %5686 = vmatmul.mubr.msk.f32.vlgmr.msra.gmra.mrb[38].mxu0 %vm74_vm2, %v3582_v9  ;;  %v7826_v9 = vpack.c.bf16 %v3848_v47, %v3847_v52 }
0x288c   :  { %6273 = vmatpush3.bf16.msra.mxu0 %v7782_v40  ;;  %5696 = vmatprep.mubr.msk.f32.mxu0 %vm6490_vm0, %v6491_v10 }
0x288d   :  { %6274 = vmatprep.subr.bf16.mxu0 %v6489_v3 }
0x2890   :  { %6276 = vmatpush3.bf16.msra.mxu0 %v7797_v13 }
0x2891   :  { %6283 = vmatprep.subr.bf16.mxu0 %v6489_v3 }
0x2893   :  { %v3828_v21 = vpop.permute.xlu1 %3827 }
0x295e   :  { %v3661_v44 = vpop.f32.mrb[38].mxu0 }
0x295f   :  { %v3662_v4 = vadd.f32 %v3661_v44, %v3591_v14  ;;  %v5687_v39 = vpop.f32.mrb[39].mxu0 }
0x2960   :  { %v7836_v39 = vld [vmem:[%s3951_s16] sm:$0x1] }
0x2961   :  { %v3665_v15 = vmax.f32 %v3662_v4, 0.0 }
0x2963   :  { %5697 = vmatmul.mubr.msk.f32.vlgmr.msra.gmra.mrb[40].mxu0 %vm63_vm1, %v3665_v15 }
0x2964   :  { %5718 = vmatprep.mubr.msk.f32.mxu0 %vm6490_vm0, %v6491_v10 }
0x2a36   :  { %v3740_v41 = vpop.f32.mrb[40].mxu0 }
0x2a37   :  { %v3741_v31 = vadd.f32 %v3740_v41, %v3670_v25  ;;  %v5698_v55 = vpop.f32.mrb[41].mxu0 }
0x2a39   :  { %v3819_v43 = vadd.f32 %v3816_v30, %v3741_v31  ;;  %v3846_v30 = vld [vmem:[%s8116_s12 + $0x8] sm:$0xff] }
0x2a3a   :  { %v7820_v12 = vpack.c.bf16 %v3846_v30, %v3845_v32 }
0x2a3b   :  { %v4568_v57 = vmul.f32 -1.442695, %v3819_v43 }
0x2a3c   :  { %6285 = vmatpush3.bf16.msra.mxu0 %v7820_v12 }
0x2a3d   :  { %6426 = vpow2.f32 %v4568_v57  ;;  %6286 = vmatprep.subr.bf16.mxu0 %v6489_v3 }
0x2a40   :  { %6288 = vmatpush3.bf16.msra.mxu0 %v7826_v9 }
0x2a41   :  { %6301 = vmatprep.subr.bf16.mxu0 %v6489_v3 }
0x2a47   :  { %v6427_v61 = vpop.eup %6426 }
0x2a48   :  { %v3823_v63 = vadd.f32 1.0, %v6427_v61  ;;  %v4303_v61 = vld [vmem:[%s8115_s11] sm:$0x1] }
0x2a4a   :  { %6428 = vrcp.f32 %v3823_v63 }
0x2a54   :  { %v6429_v1 = vpop.eup %6428 }
0x2a55   :  { %v3830_v19 = vmul.f32 %v6429_v1, %v3828_v21  ;;  %v3837_v0 = vsub.f32 1.0, %v6429_v1  ;;  %v3843_v44 = vmul.f32 %v6429_v1, %v7591_v46 }
0x2a57   :  { %3832 = vrot.lane.b32.xlu0 %v3830_v19, %s6493_s22  ;;  %v4146_v19 = vld [vmem:[%s8111_s7] sm:$0x1] }
0x2ac9   :  { %v3833_v34 = vpop.permute.xlu0 %3832 }
0x2aca   :  { %v3835_v50 = vadd.f32 %v3833_v34, %v3741_v31 }
0x2acc   :  { %6430 = vtanh.f32 %v3835_v50 }
0x2ad6   :  { %v6431_v7 = vpop.eup %6430 }
0x2ad7   :  { %3839 = vrot.lane.b32.xlu0 %v6431_v7, %s6494_s19 }
0x2b49   :  { %v3840_v14 = vpop.permute.xlu0 %3839 }
0x2b4a   :  { %v3842_v4 = vmul.f32 %v3840_v14, %v3837_v0 }
0x2b4c   :  { %v7838_v15 = vadd.f32 %v3843_v44, %v3842_v4 }
0x2b4e   :  { %3851 = vrot.lane.b32.xlu0 %v7838_v15, %s6494_s19  ;;  %v3953_v25 = vsel %vm63_vm1, %v7836_v39, %v7838_v15 }
0x2b4f   :  { %5738 = vmatmul.mubr.msk.f32.vlgmr.msra.gmra.mrb[40].mxu1 %vm74_vm2, %v3953_v25  ;;  %v519_v25 = vld [vmem:[%s8117_s13] sm:$0x1] }
0x2b50   :  { %6327 = vmatpush3.bf16.msra.mxu1 %v7740_v54  ;;  %5791 = vmatprep.mubr.msk.f32.mxu1 %vm6490_vm0, %v6491_v10 }
0x2b51   :  { %6328 = vmatprep.subr.bf16.mxu1 %v6489_v3 }
0x2b54   :  { %6330 = vmatpush3.bf16.msra.mxu1 %v7746_v36 }
0x2b55   :  { %6331 = vmatprep.subr.bf16.mxu1 %v6489_v3 }
0x2b58   :  { %6333 = vmatpush3.bf16.msra.mxu1 %v7756_v53 }
0x2b59   :  { %6334 = vmatprep.subr.bf16.mxu1 %v6489_v3 }
0x2b5c   :  { %6336 = vmatpush3.bf16.msra.mxu1 %v7766_v17 }
0x2b5d   :  { %6337 = vmatprep.subr.bf16.mxu1 %v6489_v3 }
0x2bc0   :  { %v7856_v46 = vpop.permute.xlu0 %3851 }
0x2bc1   :  { %5719 = vmatmul.mubr.msk.f32.vlgmr.msra.gmra.mrb[42].mxu0 %vm63_vm1, %v7856_v46 }
0x2bc2   :  { %6303 = vmatpush3.bf16.msra.mxu0 %v7620_v56  ;;  %5772 = vmatprep.mubr.msk.f32.mxu0 %vm6490_vm0, %v6491_v10  ;;  %v3962_v56 = vld [vmem:[%s8109_s5] sm:$0x1] }
0x2bc3   :  { %6304 = vmatprep.subr.bf16.mxu0 %v6489_v3 }
0x2bc6   :  { %6306 = vmatpush3.bf16.msra.mxu0 %v7626_v35 }
0x2bc7   :  { %6307 = vmatprep.subr.bf16.mxu0 %v6489_v3 }
0x2bca   :  { %6309 = vmatpush3.bf16.msra.mxu0 %v7636_v59 }
0x2bcb   :  { %6310 = vmatprep.subr.bf16.mxu0 %v6489_v3 }
0x2bce   :  { %6312 = vmatpush3.bf16.msra.mxu0 %v7646_v6 }
0x2bcf   :  { %6313 = vmatprep.subr.bf16.mxu0 %v6489_v3 }
0x2bd2   :  { %6315 = vmatpush3.bf16.msra.mxu0 %v7656_v24 }
0x2bd3   :  { %6316 = vmatprep.subr.bf16.mxu0 %v6489_v3 }
0x2bd6   :  { %6318 = vmatpush3.bf16.msra.mxu0 %v7670_v16 }
0x2bd7   :  { %6319 = vmatprep.subr.bf16.mxu0 %v6489_v3 }
0x2bda   :  { %6321 = vmatpush3.bf16.msra.mxu0 %v7679_v51 }
0x2bdb   :  { %6322 = vmatprep.subr.bf16.mxu0 %v6489_v3 }
0x2bde   :  { %6324 = vmatpush3.bf16.msra.mxu0 %v7689_v11 }
0x2bdf   :  { %6343 = vmatprep.subr.bf16.mxu0 %v6489_v3 }
0x2c22   :  { %v4032_v35 = vpop.f32.mrb[40].mxu1 }
0x2c23   :  { %v4033_v59 = vadd.f32 %v4032_v35, %v3962_v56  ;;  %v5739_v6 = vpop.f32.mrb[41].mxu1  ;;  %v7927_v56 = vadd.f32 %v6912_v33, %v519_v25  ;;  %v2184_v35 = vld [vmem:[%s8117_s13] sm:$0x1] }
0x2c25   :  { %v4036_v24 = vsel %vm148_vm3, %v4033_v59, -inf  ;;  %v595_v6 = vsel %vm148_vm3, %v7927_v56, -inf }
0x2c26   :  { %4037 = vmax.xlane.f32.xlu1 %v4036_v24  ;;  %v3294_v24 = vld [vmem:[%s8117_s13] sm:$0x1] }
0x2c94   :  { %v7882_v16 = vpop.f32.mrb[42].mxu0 }
0x2c95   :  { %v5720_v54 = vpop.f32.mrb[43].mxu0 }
0x2c96   :  { %v7941_v54 = vadd.f32 %v7661_v26, %v3294_v24  ;;  %v1074_v26 = vld [vmem:[%s8117_s13] sm:$0x1] }
0x2cb3   :  { %v4038_v51 = vpop.xlane.xlu1 %4037 }
0x2cb4   :  { %v4039_v36 = vsub.f32 %v4033_v59, %v4038_v51  ;;  %v7933_v59 = vadd.f32 %v7397_v22, %v2184_v35  ;;  %v3370_v51 = vsel %vm148_vm3, %v7941_v54, -inf }
0x2cb6   :  { %v4040_v53 = vmul.f32 1.442695, %v4039_v36  ;;  %v2260_v33 = vsel %vm148_vm3, %v7933_v59, -inf }
0x2cb8   :  { %6432 = vpow2.f32 %v4040_v53 }
0x2cc2   :  { %v6433_v11 = vpop.eup %6432 }
0x2cc3   :  { %v4042_v17 = vsel %vm148_vm3, %v6433_v11, 0.0 }
0x2cc4   :  { %4043 = vadd.xlane.f32.xlu0 %v4042_v17 }
0x2d51   :  { %v4044_v41 = vpop.xlane.xlu0 %4043 }
0x2d52   :  { %6434 = vrcp.f32 %v4044_v41  ;;  %v7953_v41 = vadd.f32 %v7015_v49, %v1074_v26 }
0x2d5c   :  { %v6435_v31 = vpop.eup %6434 }
0x2d5d   :  { %v7885_v55 = vmul.f32 %v6435_v31, %v6433_v11  ;;  %v1629_v31 = vld [vmem:[%s8117_s13] sm:$0x1] }
0x2d5f   :  { %5773 = vmatmul.mubr.f32.vlgmr.msra.gmra.mrb[44].mxu0 %v7885_v55 }
0x2d60   :  { %6345 = vmatpush3.bf16.msra.mxu0 %v7700_v27  ;;  %5813 = vmatprep.mubr.msk.f32.mxu0 %vm6490_vm0, %v6491_v10 }
0x2d61   :  { %6346 = vmatprep.subr.bf16.mxu0 %v6489_v3 }
0x2d64   :  { %6348 = vmatpush3.bf16.msra.mxu0 %v7712_v37 }
0x2d67   :  { %5814 = vmatmul.mubr.msk.f32.vlgmr.msra.gmra.mrb[46].mxu0 %vm63_vm1, %v7856_v46 }
0x2e32   :  { %v4129_v43 = vpop.f32.mrb[44].mxu0 }
0x2e33   :  { %4134 = vrot.lane.b32.xlu1 %v4129_v43, %s6492_s3  ;;  %v5774_v57 = vpop.f32.mrb[45].mxu0  ;;  %v7959_v43 = vadd.f32 %v7176_v18, %v1629_v31 }
0x2e34   :  { %v2739_v57 = vld [vmem:[%s8117_s13] sm:$0x1] }
0x2e35   :  { %v1705_v49 = vsel %vm148_vm3, %v7959_v43, -inf }
0x2e3a   :  { %v4370_v63 = vpop.f32.mrb[46].mxu0 }
0x2e3b   :  { %v4371_v27 = vadd.f32 %v4370_v63, %v4303_v61  ;;  %v5815_v1 = vpop.f32.mrb[47].mxu0  ;;  %v7967_v61 = vadd.f32 %v7500_v60, %v2739_v57  ;;  %v3849_v63 = vld [vmem:[%s8117_s13] sm:$0x1] }
0x2e3c   :  { %v7975_v18 = vadd.f32 %v7882_v16, %v3849_v63  ;;  %v4404_v57 = vld [vmem:[%s8117_s13] sm:$0x1] }
0x2e3d   :  { %4382 = vrot.lane.b32.xlu0 %v4371_v27, %s6493_s22 }
0x2e3e   :  { %v3925_v1 = vsel %vm148_vm3, %v7975_v18, -inf }
0x2ea5   :  { %v4135_v21 = vpop.permute.xlu1 %4134 }
0x2ea6   :  { %v4137_v37 = vsel %vm63_vm1, %v7836_v39, %v4135_v21 }
0x2ea7   :  { %5792 = vmatmul.mubr.msk.f32.vlgmr.msra.gmra.mrb[42].mxu1 %vm74_vm2, %v4137_v37 }
0x2ea8   :  { %6339 = vmatpush3.bf16.msra.mxu1 %v7782_v40  ;;  %5802 = vmatprep.mubr.msk.f32.mxu1 %vm6490_vm0, %v6491_v10  ;;  %v4225_v40 = vld [vmem:[%s8113_s9] sm:$0x1] }
0x2ea9   :  { %6340 = vmatprep.subr.bf16.mxu1 %v6489_v3 }
0x2eac   :  { %6342 = vmatpush3.bf16.msra.mxu1 %v7797_v13 }
0x2ead   :  { %6349 = vmatprep.subr.bf16.mxu1 %v6489_v3 }
0x2eaf   :  { %v4383_v4 = vpop.permute.xlu0 %4382 }
0x2f7a   :  { %v4216_v34 = vpop.f32.mrb[42].mxu1 }
0x2f7b   :  { %v4217_v50 = vadd.f32 %v4216_v34, %v4146_v19  ;;  %v5793_v32 = vpop.f32.mrb[43].mxu1 }
0x2f7d   :  { %v4220_v30 = vmax.f32 %v4217_v50, 0.0 }
0x2f7f   :  { %5803 = vmatmul.mubr.msk.f32.vlgmr.msra.gmra.mrb[44].mxu1 %vm63_vm1, %v4220_v30 }
0x2f80   :  { %6351 = vmatpush3.bf16.msra.mxu1 %v7820_v12  ;;  %5824 = vmatprep.mubr.msk.f32.mxu1 %vm6490_vm0, %v6491_v10 }
0x2f81   :  { %6352 = vmatprep.subr.bf16.mxu1 %v6489_v3 }
0x2f84   :  { %6354 = vmatpush3.bf16.msra.mxu1 %v7826_v9 }
0x3052   :  { %v4295_v13 = vpop.f32.mrb[44].mxu1 }
0x3053   :  { %v4296_v52 = vadd.f32 %v4295_v13, %v4225_v40  ;;  %v5804_v47 = vpop.f32.mrb[45].mxu1 }
0x3055   :  { %v4374_v7 = vadd.f32 %v4371_v27, %v4296_v52  ;;  %v2815_v27 = vsel %vm148_vm3, %v7967_v61, -inf }
0x3057   :  { %v4576_v0 = vmul.f32 -1.442695, %v4374_v7 }
0x3059   :  { %6436 = vpow2.f32 %v4576_v0 }
0x3063   :  { %v6437_v14 = vpop.eup %6436 }
0x3064   :  { %v4378_v44 = vadd.f32 1.0, %v6437_v14 }
0x3066   :  { %6438 = vrcp.f32 %v4378_v44 }
0x3070   :  { %v6439_v12 = vpop.eup %6438 }
0x3071   :  { %v4385_v10 = vmul.f32 %v6439_v12, %v4383_v4  ;;  %v4392_v22 = vsub.f32 1.0, %v6439_v12  ;;  %v4398_v53 = vmul.f32 %v6439_v12, %v7838_v15  ;;  %v1150_v15 = vsel %vm148_vm3, %v7953_v41, -inf }
0x3073   :  { %4387 = vrot.lane.b32.xlu1 %v4385_v10, %s6493_s22 }
0x30e5   :  { %v4388_v3 = vpop.permute.xlu1 %4387 }
0x30e6   :  { %v4390_v9 = vadd.f32 %v4388_v3, %v4296_v52 }
0x30e8   :  { %6440 = vtanh.f32 %v4390_v9 }
0x30f2   :  { %v6441_v39 = vpop.eup %6440 }
0x30f3   :  { %4394 = vrot.lane.b32.xlu1 %v6441_v39, %s6494_s19 }
0x3117   :  { %596 = vmax.xlane.f32.xlu1 %v595_v6  ;;  %v609_v6 = vsel %vm63_vm1, %v6886_v20, 0.0 }
0x311b   :  { %2261 = vmax.xlane.f32.xlu1 %v2260_v33  ;;  %v611_v33 = vrot.slane %v6724_v58, 7 }
0x311f   :  { %3371 = vmax.xlane.f32.xlu1 %v3370_v51 }
0x3165   :  { %v4395_v36 = vpop.permute.xlu1 %4394 }
0x3166   :  { %v4397_v11 = vmul.f32 %v4395_v36, %v4392_v22  ;;  %v614_v22 = vrot.slane %v609_v6, 6 }
0x3168   :  { %v4399_v17 = vadd.f32 %v4398_v53, %v4397_v11 }
0x316a   :  { %4406 = vrot.lane.b32.xlu0 %v4399_v17, %s6494_s19 }
0x3189   :  { %1151 = vmax.xlane.f32.xlu0 %v1150_v15 }
0x318d   :  { %1706 = vmax.xlane.f32.xlu0 %v1705_v49 }
0x3191   :  { %2816 = vmax.xlane.f32.xlu0 %v2815_v27 }
0x3195   :  { %3926 = vmax.xlane.f32.xlu0 %v3925_v1 }
0x31a4   :  { %v597_v60 = vpop.xlane.xlu1 %596 }
0x31a5   :  { %v598_v21 = vsub.f32 %v7927_v56, %v597_v60 }
0x31a7   :  { %v599_v37 = vmul.f32 1.442695, %v598_v21 }
0x31a8   :  { %v8013_v11 = vpop.xlane.xlu1 %2261 }
0x31a9   :  { %6442 = vpow2.f32 %v599_v37  ;;  %v2263_v58 = vsub.f32 %v7933_v59, %v8013_v11 }
0x31ac   :  { %v8019_v26 = vpop.xlane.xlu1 %3371 }
0x31ad   :  { %v3373_v31 = vsub.f32 %v7941_v54, %v8019_v26 }
0x31af   :  { %v3374_v15 = vmul.f32 1.442695, %v3373_v31 }
0x31b3   :  { %v6443_v19 = vpop.eup %6442 }
0x31b4   :  { %v601_v34 = vsel %vm148_vm3, %v6443_v19, 0.0 }
0x31b5   :  { %602 = vadd.xlane.f32.xlu0 %v601_v34 }
0x31dc   :  { %v7983_v50 = vpop.permute.xlu0 %4406 }
0x31dd   :  { %5825 = vmatmul.mubr.msk.f32.vlgmr.msra.gmra.mrb[46].mxu1 %vm63_vm1, %v7983_v50 }
0x3216   :  { %v7987_v16 = vpop.xlane.xlu0 %1151 }
0x3217   :  { %v1153_v20 = vsub.f32 %v7953_v41, %v7987_v16 }
0x3219   :  { %v1154_v17 = vmul.f32 1.442695, %v1153_v20 }
0x321a   :  { %v7989_v32 = vpop.xlane.xlu0 %1706 }
0x321b   :  { %v1708_v30 = vsub.f32 %v7959_v43, %v7989_v32 }
0x321d   :  { %v1709_v40 = vmul.f32 1.442695, %v1708_v30 }
0x321e   :  { %v7993_v13 = vpop.xlane.xlu0 %2816 }
0x321f   :  { %6444 = vpow2.f32 %v1709_v40  ;;  %v2818_v52 = vsub.f32 %v7967_v61, %v7993_v13 }
0x3221   :  { %v2819_v47 = vmul.f32 1.442695, %v2818_v52 }
0x3222   :  { %v7997_v7 = vpop.xlane.xlu0 %3926 }
0x3223   :  { %6446 = vpow2.f32 %v2819_v47  ;;  %v3928_v0 = vsub.f32 %v7975_v18, %v7997_v7 }
0x3225   :  { %v3929_v14 = vmul.f32 1.442695, %v3928_v0 }
0x3227   :  { %6448 = vpow2.f32 %v3929_v14 }
0x3229   :  { %v6445_v44 = vpop.eup %6444 }
0x322a   :  { %v1711_v12 = vsel %vm148_vm3, %v6445_v44, 0.0  ;;  %v1719_v44 = vsel %vm63_vm1, %v7116_v62, 0.0  ;;  %v2831_v62 = vrot.slane %v7400_v5, 7 }
0x322b   :  { %1712 = vadd.xlane.f32.xlu0 %v1711_v12 }
0x322d   :  { %v6447_v4 = vpop.eup %6446 }
0x322e   :  { %v2821_v10 = vsel %vm148_vm3, %v6447_v4, 0.0 }
0x322f   :  { %2822 = vadd.xlane.f32.xlu0 %v2821_v10  ;;  %v1721_v10 = vrot.slane %v7018_v42, 7 }
0x3231   :  { %v6449_v3 = vpop.eup %6448 }
0x3232   :  { %v3931_v9 = vsel %vm148_vm3, %v6449_v3, 0.0 }
0x3233   :  { %3932 = vadd.xlane.f32.xlu0 %v3931_v9 }
0x3242   :  { %v603_v39 = vpop.xlane.xlu0 %602 }
0x3243   :  { %6450 = vlog2.f32 %v603_v39  ;;  %v1724_v39 = vrot.slane %v1719_v44, 6 }
0x3244   :  { %6452 = vpow2.f32 %v1154_v17 }
0x324d   :  { %v6451_v25 = vpop.eup %6450 }
0x324e   :  { %v605_v35 = vmul.f32 0.6931472, %v6451_v25  ;;  %v2829_v25 = vsel %vm63_vm1, %v7474_v2, 0.0  ;;  %v3939_v2 = vsel %vm63_vm1, %v7856_v46, 0.0 }
0x3250   :  { %v606_v24 = vadd.f32 %v605_v35, %v597_v60  ;;  %v6453_v60 = vpop.eup %6452 }
0x3251   :  { %v1156_v21 = vsel %vm148_vm3, %v6453_v60, 0.0 }
0x3252   :  { %v607_v51 = vsub.f32 %v7927_v56, %v606_v24  ;;  %v2264_v56 = vmul.f32 1.442695, %v2263_v58 }
0x3254   :  { %v616_v36 = vsel %vm148_vm3, %v607_v51, %v611_v33  ;;  %6454 = vpow2.f32 %v2264_v56 }
0x3255   :  { %v618_v53 = vsel %vm617_vm4, %v616_v36, %v614_v22  ;;  %6456 = vpow2.f32 %v3374_v15  ;;  %v3941_v36 = vrot.slane %v7702_v48, 7 }
0x3256   :  { %619 = vst [vmem:[%s8118_s14] sm:$0x7] %v618_v53 }
0x325e   :  { %v6455_v37 = vpop.eup %6454 }
0x325f   :  { %v2266_v34 = vsel %vm148_vm3, %v6455_v37, 0.0  ;;  %v6457_v30 = vpop.eup %6456 }
0x3260   :  { %v3376_v52 = vsel %vm148_vm3, %v6457_v30, 0.0 }
0x32b0   :  { %v4476_v49 = vpop.f32.mrb[46].mxu1 }
0x32b1   :  { %v8026_v63 = vadd.f32 %v4476_v49, %v4404_v57  ;;  %v5826_v27 = vpop.f32.mrb[47].mxu1 }
0x32b2   :  { %v1164_v27 = vsel %vm63_vm1, %v6989_v8, 0.0 }
0x32b3   :  { %v4480_v1 = vsel %vm148_vm3, %v8026_v63, -inf }
0x32b4   :  { %4481 = vmax.xlane.f32.xlu1 %v4480_v1 }
0x32b8   :  { %1157 = vadd.xlane.f32.xlu1 %v1156_v21  ;;  %v1713_v19 = vpop.xlane.xlu0 %1712  ;;  %v1166_v21 = vrot.slane %v6915_v45, 7  ;;  %v3384_v45 = vsel %vm63_vm1, %v7601_v29, 0.0 }
0x32b9   :  { %6458 = vlog2.f32 %v1713_v19  ;;  %v1169_v19 = vrot.slane %v1164_v27, 6  ;;  %v3389_v44 = vrot.slane %v3384_v45, 6 }
0x32bc   :  { %v2823_v40 = vpop.xlane.xlu0 %2822  ;;  %2267 = vadd.xlane.f32.xlu1 %v2266_v34  ;;  %v2274_v34 = vsel %vm63_vm1, %v7371_v38, 0.0 }
0x32bd   :  { %6460 = vlog2.f32 %v2823_v40 }
0x32c0   :  { %v3933_v47 = vpop.xlane.xlu0 %3932  ;;  %3377 = vadd.xlane.f32.xlu1 %v3376_v52 }
0x32c1   :  { %6462 = vlog2.f32 %v3933_v47  ;;  %v2276_v47 = vrot.slane %v7217_v28, 7  ;;  %v3386_v28 = vrot.slane %v7503_v23, 7  ;;  %v4494_v23 = vsel %vm63_vm1, %v7983_v50, 0.0 }
0x32c3   :  { %v6459_v0 = vpop.eup %6458 }
0x32c4   :  { %v1715_v14 = vmul.f32 0.6931472, %v6459_v0 }
0x32c6   :  { %v1716_v12 = vadd.f32 %v1715_v14, %v7989_v32  ;;  %v2834_v32 = vrot.slane %v2829_v25, 6  ;;  %v2279_v14 = vrot.slane %v2274_v34, 6 }
0x32c7   :  { %v6461_v4 = vpop.eup %6460 }
0x32c8   :  { %v1717_v3 = vsub.f32 %v7959_v43, %v1716_v12  ;;  %v2825_v9 = vmul.f32 0.6931472, %v6461_v4 }
0x32ca   :  { %v1726_v35 = vsel %vm148_vm3, %v1717_v3, %v1721_v10  ;;  %v2826_v6 = vadd.f32 %v2825_v9, %v7993_v13  ;;  %v4496_v9 = vrot.slane %v7885_v55, 7 }
0x32cb   :  { %v6463_v24 = vpop.eup %6462  ;;  %v1727_v33 = vsel %vm617_vm4, %v1726_v35, %v1724_v39  ;;  %v4499_v39 = vrot.slane %v4494_v23, 6 }
0x32cc   :  { %4538 = vst [vmem:[%s8118_s14 + $0x8] sm:$0x7] %v1727_v33  ;;  %v2827_v42 = vsub.f32 %v7967_v61, %v2826_v6  ;;  %v3935_v43 = vmul.f32 0.6931472, %v6463_v24  ;;  %v3944_v61 = vrot.slane %v3939_v2, 6 }
0x32ce   :  { %v2836_v51 = vsel %vm148_vm3, %v2827_v42, %v2831_v62  ;;  %v3936_v13 = vadd.f32 %v3935_v43, %v7997_v7 }
0x32cf   :  { %v2837_v22 = vsel %vm617_vm4, %v2836_v51, %v2834_v32 }
0x32d0   :  { %4554 = vst [vmem:[%s8118_s14 + $0x10] sm:$0x7] %v2837_v22  ;;  %v3937_v5 = vsub.f32 %v7975_v18, %v3936_v13 }
0x32d2   :  { %v3946_v53 = vsel %vm148_vm3, %v3937_v5, %v3941_v36 }
0x32d3   :  { %v3947_v20 = vsel %vm617_vm4, %v3946_v53, %v3944_v61 }
0x32d4   :  { %4570 = vst [vmem:[%s8118_s14 + $0x18] sm:$0x7] %v3947_v20 }
0x3341   :  { %v4482_v46 = vpop.xlane.xlu1 %4481 }
0x3342   :  { %v4483_v7 = vsub.f32 %v8026_v63, %v4482_v46 }
0x3344   :  { %v4484_v58 = vmul.f32 1.442695, %v4483_v7 }
0x3345   :  { %v1158_v48 = vpop.xlane.xlu1 %1157 }
0x3346   :  { %6464 = vpow2.f32 %v4484_v58 }
0x3347   :  { %6466 = vlog2.f32 %v1158_v48 }
0x3349   :  { %v2268_v17 = vpop.xlane.xlu1 %2267 }
0x334a   :  { %6468 = vlog2.f32 %v2268_v17 }
0x334d   :  { %v3378_v56 = vpop.xlane.xlu1 %3377 }
0x334e   :  { %6470 = vlog2.f32 %v3378_v56 }
0x3350   :  { %v6465_v18 = vpop.eup %6464 }
0x3351   :  { %v6467_v31 = vpop.eup %6466  ;;  %v4486_v15 = vsel %vm148_vm3, %v6465_v18, 0.0 }
0x3352   :  { %v1160_v57 = vmul.f32 0.6931472, %v6467_v31  ;;  %4487 = vadd.xlane.f32.xlu1 %v4486_v15 }
0x3354   :  { %v6469_v49 = vpop.eup %6468  ;;  %v1161_v1 = vadd.f32 %v1160_v57, %v7987_v16 }
0x3355   :  { %v2270_v60 = vmul.f32 0.6931472, %v6469_v49 }
0x3356   :  { %v1162_v37 = vsub.f32 %v7953_v41, %v1161_v1 }
0x3357   :  { %v2271_v30 = vadd.f32 %v2270_v60, %v8013_v11 }
0x3358   :  { %v6471_v40 = vpop.eup %6470  ;;  %v1171_v52 = vsel %vm148_vm3, %v1162_v37, %v1166_v21 }
0x3359   :  { %v1172_v8 = vsel %vm617_vm4, %v1171_v52, %v1169_v19  ;;  %v2272_v16 = vsub.f32 %v7933_v59, %v2271_v30  ;;  %v3380_v0 = vmul.f32 0.6931472, %v6471_v40 }
0x335a   :  { %4530 = vst [vmem:[%s8118_s14 + $0x4] sm:$0x7] %v1172_v8 }
0x335b   :  { %v2281_v38 = vsel %vm148_vm3, %v2272_v16, %v2276_v47  ;;  %v3381_v41 = vadd.f32 %v3380_v0, %v8019_v26 }
0x335c   :  { %v2282_v11 = vsel %vm617_vm4, %v2281_v38, %v2279_v14 }
0x335d   :  { %4546 = vst [vmem:[%s8118_s14 + $0xc] sm:$0x7] %v2282_v11  ;;  %v3382_v59 = vsub.f32 %v7941_v54, %v3381_v41 }
0x335f   :  { %v3391_v12 = vsel %vm148_vm3, %v3382_v59, %v3386_v28 }
0x3360   :  { %v3392_v4 = vsel %vm617_vm4, %v3391_v12, %v3389_v44 }
0x3361   :  { %4562 = vst [vmem:[%s8118_s14 + $0x14] sm:$0x7] %v3392_v4 }
0x33df   :  { %v4488_v29 = vpop.xlane.xlu1 %4487 }
0x33e0   :  { %6472 = vlog2.f32 %v4488_v29 }
0x33ea   :  { %v6473_v26 = vpop.eup %6472 }
0x33eb   :  { %v4490_v10 = vmul.f32 0.6931472, %v6473_v26 }
0x33ed   :  { %v4491_v3 = vadd.f32 %v4490_v10, %v4482_v46 }
0x33ef   :  { %v4492_v54 = vsub.f32 %v8026_v63, %v4491_v3 }
0x33f1   :  { %v4501_v25 = vsel %vm148_vm3, %v4492_v54, %v4496_v9 }
0x33f2   :  { %v4502_v35 = vsel %vm617_vm4, %v4501_v25, %v4499_v39 }
0x33f3   :  { %4578 = vst [vmem:[%s8118_s14 + $0x1c] sm:$0x7] %v4502_v35 }

</bundles_post_ra>
